<compile_context>
chip_gen: v7x
topology: tpu7x:2x2x1
jax: 0.10.0
libtpu: 0.0.40
codegen_flags: <defaults>
</compile_context>

<pallas_src>
import functools
import math

import jax
import jax.numpy as jnp
from jax.experimental import pallas as pl
from jax.experimental.pallas import tpu as pltpu


# 48 MiB scoped VMEM: leaves headroom inside v7x's 64 MiB physical VMEM and raises
# the 16/32 MiB defaults on v5e/v6e so row tiles + resident weights never spill.
_VMEM_LIMIT_BYTES = 48 * 1024 * 1024


def _compiler_params(n_axes=1):
    return pltpu.CompilerParams(
        dimension_semantics=("parallel",) * n_axes,
        vmem_limit_bytes=_VMEM_LIMIT_BYTES,
    )


def _row_tile(rows, target):
    """Row-tile size: whole array when small, else a multiple-of-8 tile."""
    if rows <= target:
        return rows
    return target


# ----------------------------------------------------------------------------
# Kernel 1: stem conv (as matmul) + ReLU, then fc + ReLU.  Row-tiled over tokens.
#   patches : (B*S, patch_dim)
#   w_stem  : (patch_dim, C_feat),  b_stem : (1, C_feat)
#   w_fc    : (C_feat, d_model),    b_fc   : (1, d_model)
#   out     : (B*S, d_model)
# ----------------------------------------------------------------------------
def stem_fc_kernel(patch_ref, ws_ref, bs_ref, wf_ref, bf_ref, out_ref):
    p = patch_ref[...]
    # stand-in CNN feature extractor: stride-P conv + ReLU
    feat = jnp.dot(p, ws_ref[...], preferred_element_type=jnp.float32) + bs_ref[...]
    feat = jnp.maximum(feat, 0.0)
    # CNN_dropout(p=0.5): identity at inference
    y = jnp.dot(feat, wf_ref[...], preferred_element_type=jnp.float32) + bf_ref[...]
    out_ref[...] = jnp.maximum(y, 0.0)  # F.relu after self.fc


def stem_fc_relu(patches, w_stem, b_stem, w_fc, b_fc, *, row_tile=256):
    rows, pd = patches.shape
    c_feat = w_stem.shape[1]
    d_model = w_fc.shape[1]
    tm = _row_tile(rows, row_tile)
    cost = pl.CostEstimate(
        flops=2 * rows * (pd * c_feat + c_feat * d_model),
        transcendentals=0,
        bytes_accessed=4 * (rows * pd + pd * c_feat + c_feat
                            + c_feat * d_model + d_model + rows * d_model),
    )
    return pl.pallas_call(
        stem_fc_kernel,
        out_shape=jax.ShapeDtypeStruct((rows, d_model), jnp.float32),
        grid=(pl.cdiv(rows, tm),),
        in_specs=[
            pl.BlockSpec((tm, pd), lambda i: (i, 0)),
            pl.BlockSpec((pd, c_feat), lambda i: (0, 0)),     # resident weights
            pl.BlockSpec((1, c_feat), lambda i: (0, 0)),
            pl.BlockSpec((c_feat, d_model), lambda i: (0, 0)),
            pl.BlockSpec((1, d_model), lambda i: (0, 0)),
        ],
        out_specs=pl.BlockSpec((tm, d_model), lambda i: (i, 0)),
        compiler_params=_compiler_params(),
        cost_estimate=cost,
    )(patches, w_stem, b_stem, w_fc, b_fc)


# ----------------------------------------------------------------------------
# Kernel 2: generic row-tiled dense: out = x @ w + b  (used for fused QKV projection
# over the flattened B*S token axis; output lane width = 2*H*d_k + H*d_v).
# ----------------------------------------------------------------------------
def dense_kernel(x_ref, w_ref, b_ref, out_ref):
    out_ref[...] = (
        jnp.dot(x_ref[...], w_ref[...], preferred_element_type=jnp.float32)
        + b_ref[...]
    )


def dense(x, w, b, *, row_tile=256):
    rows, k = x.shape
    n = w.shape[1]
    tm = _row_tile(rows, row_tile)
    cost = pl.CostEstimate(
        flops=2 * rows * k * n,
        transcendentals=0,
        bytes_accessed=4 * (rows * k + k * n + n + rows * n),
    )
    return pl.pallas_call(
        dense_kernel,
        out_shape=jax.ShapeDtypeStruct((rows, n), jnp.float32),
        grid=(pl.cdiv(rows, tm),),
        in_specs=[
            pl.BlockSpec((tm, k), lambda i: (i, 0)),
            pl.BlockSpec((k, n), lambda i: (0, 0)),
            pl.BlockSpec((1, n), lambda i: (0, 0)),
        ],
        out_specs=pl.BlockSpec((tm, n), lambda i: (i, 0)),
        compiler_params=_compiler_params(),
        cost_estimate=cost,
    )(x, w, b)


# ----------------------------------------------------------------------------
# Kernel 3: attention core (scores / softmax / AV), one grid step per batch element,
# all heads batched through a single dot_general (no per-head lane slicing).
#   q, k : (B, H, S, d_k)   v : (B, H, S, d_v)   ->   ctx : (B, H, S, d_v)
# ----------------------------------------------------------------------------
def attn_core_kernel(q_ref, k_ref, v_ref, ctx_ref, *, scale):
    q = q_ref[0]                     # (H, S, d_k)
    k = k_ref[0]
    v = v_ref[0]
    s = jnp.einsum("hqd,hkd->hqk", q, k,
                   preferred_element_type=jnp.float32) * scale
    s = s - jnp.max(s, axis=-1, keepdims=True)
    e = jnp.exp(s)
    a = e / jnp.sum(e, axis=-1, keepdims=True)   # softmax over keys
    # attention dropout: identity at inference
    ctx_ref[0] = jnp.einsum("hqk,hkd->hqd", a, v,
                            preferred_element_type=jnp.float32)


def attn_core(q, k, v, *, d_k):
    B, H, S, _ = q.shape
    d_v = v.shape[-1]
    kernel = functools.partial(attn_core_kernel, scale=1.0 / math.sqrt(d_k))
    cost = pl.CostEstimate(
        flops=2 * B * H * S * S * (d_k + d_v),
        transcendentals=B * H * S * S,
        bytes_accessed=4 * B * H * S * (2 * d_k + 2 * d_v),
    )
    return pl.pallas_call(
        kernel,
        out_shape=jax.ShapeDtypeStruct((B, H, S, d_v), jnp.float32),
        grid=(B,),
        in_specs=[
            pl.BlockSpec((1, H, S, d_k), lambda b: (b, 0, 0, 0)),
            pl.BlockSpec((1, H, S, d_k), lambda b: (b, 0, 0, 0)),
            pl.BlockSpec((1, H, S, d_v), lambda b: (b, 0, 0, 0)),
        ],
        out_specs=pl.BlockSpec((1, H, S, d_v), lambda b: (b, 0, 0, 0)),
        compiler_params=_compiler_params(),
        cost_estimate=cost,
    )(q, k, v)


# ----------------------------------------------------------------------------
# Kernel 4: fused post-attention block, row-tiled over flattened tokens:
#   o = ctx @ wo + bo ; y = LN1(o + x) ; h = relu(y @ w1 + b1) ;
#   z = h @ w2 + b2  ; out = LN2(z + y)
# ----------------------------------------------------------------------------
def _layer_norm(x, g, b, eps=1e-5):
    mu = jnp.mean(x, axis=-1, keepdims=True)
    var = jnp.mean(jnp.square(x - mu), axis=-1, keepdims=True)
    return (x - mu) * jax.lax.rsqrt(var + eps) * g + b


def post_attn_kernel(ctx_ref, x_ref, wo_ref, bo_ref, g1_ref, be1_ref,
                     w1_ref, b1_ref, w2_ref, b2_ref, g2_ref, be2_ref, out_ref):
    x = x_ref[...]
    # single full-width output projection (K = head_num * d_v)
    o = jnp.dot(ctx_ref[...], wo_ref[...],
                preferred_element_type=jnp.float32) + bo_ref[...]
    # attention dropout: identity at inference
    y = _layer_norm(o + x, g1_ref[...], be1_ref[...])
    # position-wise feed-forward
    h = jnp.dot(y, w1_ref[...], preferred_element_type=jnp.float32) + b1_ref[...]
    h = jnp.maximum(h, 0.0)
    z = jnp.dot(h, w2_ref[...], preferred_element_type=jnp.float32) + b2_ref[...]
    # FFN dropout: identity at inference
    out_ref[...] = _layer_norm(z + y, g2_ref[...], be2_ref[...])


def post_attn(ctx_tok, x_tok, p, *, row_tile=256):
    rows, hdv = ctx_tok.shape
    d_model = p["wo"].shape[1]
    d_inner = p["w1"].shape[1]
    tm = _row_tile(rows, row_tile)

    def resident(shape):
        return pl.BlockSpec(shape, lambda i: (0, 0))

    cost = pl.CostEstimate(
        flops=2 * rows * (hdv * d_model + d_model * d_inner + d_inner * d_model),
        transcendentals=0,
        bytes_accessed=4 * (rows * hdv + 2 * rows * d_model + hdv * d_model
                            + 2 * d_model * d_inner + 6 * d_model + d_inner),
    )
    return pl.pallas_call(
        post_attn_kernel,
        out_shape=jax.ShapeDtypeStruct((rows, d_model), jnp.float32),
        grid=(pl.cdiv(rows, tm),),
        in_specs=[
            pl.BlockSpec((tm, hdv), lambda i: (i, 0)),
            pl.BlockSpec((tm, d_model), lambda i: (i, 0)),
            resident((hdv, d_model)), resident((1, d_model)),
            resident((1, d_model)), resident((1, d_model)),
            resident((d_model, d_inner)), resident((1, d_inner)),
            resident((d_inner, d_model)), resident((1, d_model)),
            resident((1, d_model)), resident((1, d_model)),
        ],
        out_specs=pl.BlockSpec((tm, d_model), lambda i: (i, 0)),
        compiler_params=_compiler_params(),
        cost_estimate=cost,
    )(ctx_tok, x_tok, p["wo"], p["bo"], p["ln1_g"], p["ln1_b"],
      p["w1"], p["b1"], p["w2"], p["b2"], p["ln2_g"], p["ln2_b"])


# ----------------------------------------------------------------------------
# One ImageEncoderLayer (host glue: head split/merge reshapes are plain XLA ops)
# ----------------------------------------------------------------------------
def encoder_layer(x_tok, B, S, p, *, head_num, d_k, d_v, row_tile=256):
    hdk = head_num * d_k
    hdv = head_num * d_v

    # fused QKV projection over flattened tokens (one lane-dense matmul)
    w_qkv = jnp.concatenate([p["wq"], p["wk"], p["wv"]], axis=1)
    b_qkv = jnp.concatenate([p["bq"], p["bk"], p["bv"]], axis=1)
    qkv = dense(x_tok, w_qkv, b_qkv, row_tile=row_tile)       # (B*S, 2*hdk + hdv)

    q = qkv[:, :hdk].reshape(B, S, head_num, d_k).transpose(0, 2, 1, 3)
    k = qkv[:, hdk:2 * hdk].reshape(B, S, head_num, d_k).transpose(0, 2, 1, 3)
    v = qkv[:, 2 * hdk:].reshape(B, S, head_num, d_v).transpose(0, 2, 1, 3)

    ctx = attn_core(q, k, v, d_k=d_k)                         # (B, H, S, d_v)
    ctx_tok = ctx.transpose(0, 2, 1, 3).reshape(B * S, hdv)   # concat heads

    # output projection + residual + LN1 + FFN + residual + LN2, fused & row-tiled
    return post_attn(ctx_tok, x_tok, p, row_tile=row_tile)


# ----------------------------------------------------------------------------
# Full forward (glue in plain JAX: patchify / reshapes / parameter plumbing)
# ----------------------------------------------------------------------------
def image_encoder_forward(image, params, *, patch, head_num, d_k, d_v, row_tile=256):
    B, C, H, W = image.shape
    Hp, Wp = H // patch, W // patch
    S = Hp * Wp
    # im2col for the stride-`patch` stem conv, row-major (h, w) token order
    patches = image.reshape(B, C, Hp, patch, Wp, patch)
    patches = patches.transpose(0, 2, 4, 1, 3, 5)             # (B, Hp, Wp, C, P, P)
    patches = patches.reshape(B * S, C * patch * patch)

    x_tok = stem_fc_relu(patches, params["w_stem"], params["b_stem"],
                         params["w_fc"], params["b_fc"], row_tile=row_tile)
    d_model = x_tok.shape[-1]

    for layer_p in params["layers"]:
        x_tok = encoder_layer(x_tok, B, S, layer_p,
                              head_num=head_num, d_k=d_k, d_v=d_v,
                              row_tile=row_tile)
    return (x_tok.reshape(B, S, d_model),)


# ----------------------------------------------------------------------------
# Deterministic synthetic parameters
# ----------------------------------------------------------------------------
def _dense_init(key, fan_in, fan_out):
    scale = 1.0 / math.sqrt(fan_in)
    return jax.random.uniform(key, (fan_in, fan_out), jnp.float32, -scale, scale)


def make_params(key, *, patch_dim, c_feat, d_model, head_num, d_k, d_v,
                d_inner, layer_num):
    n_layer_keys = 8
    keys = jax.random.split(key, 4 + layer_num * n_layer_keys)
    params = {
        "w_stem": _dense_init(keys[0], patch_dim, c_feat),
        "b_stem": jnp.zeros((1, c_feat), jnp.float32),
        "w_fc": _dense_init(keys[1], c_feat, d_model),
        "b_fc": jnp.zeros((1, d_model), jnp.float32),
        "layers": [],
    }
    for l in range(layer_num):
        k = keys[4 + l * n_layer_keys: 4 + (l + 1) * n_layer_keys]
        params["layers"].append({
            "wq": _dense_init(k[0], d_model, head_num * d_k),
            "bq": jnp.zeros((1, head_num * d_k), jnp.float32),
            "wk": _dense_init(k[1], d_model, head_num * d_k),
            "bk": jnp.zeros((1, head_num * d_k), jnp.float32),
            "wv": _dense_init(k[2], d_model, head_num * d_v),
            "bv": jnp.zeros((1, head_num * d_v), jnp.float32),
            "wo": _dense_init(k[3], head_num * d_v, d_model),
            "bo": jnp.zeros((1, d_model), jnp.float32),
            "ln1_g": jnp.ones((1, d_model), jnp.float32),
            "ln1_b": jnp.zeros((1, d_model), jnp.float32),
            "w1": _dense_init(k[4], d_model, d_inner),
            "b1": jnp.zeros((1, d_inner), jnp.float32),
            "w2": _dense_init(k[5], d_inner, d_model),
            "b2": jnp.zeros((1, d_model), jnp.float32),
            "ln2_g": jnp.ones((1, d_model), jnp.float32),
            "ln2_b": jnp.zeros((1, d_model), jnp.float32),
        })
    return params


if __name__ == "__main__":
    # small shapes, chosen lane-dense (d_model, H*d_k, d_inner multiples of 128)
    B, C, H, W = 2, 3, 32, 32
    PATCH = 4                   # stem downsample factor (stand-in for ResNet's /32)
    C_FEAT = 256                # stand-in for resnet.fc.in_features (=2048)
    D_MODEL, HEAD_NUM, D_K, D_V, D_INNER, LAYER_NUM = 128, 4, 32, 32, 256, 2
    ROW_TILE = 64               # B*S = 128 tokens -> 2 parallel row tiles

    key = jax.random.PRNGKey(0)
    k_img, k_par = jax.random.split(key)
    image = jax.random.normal(k_img, (B, C, H, W), jnp.float32)

    params = make_params(
        k_par, patch_dim=C * PATCH * PATCH, c_feat=C_FEAT, d_model=D_MODEL,
        head_num=HEAD_NUM, d_k=D_K, d_v=D_V, d_inner=D_INNER,
        layer_num=LAYER_NUM)

    fwd = jax.jit(functools.partial(
        image_encoder_forward, patch=PATCH, head_num=HEAD_NUM,
        d_k=D_K, d_v=D_V, row_tile=ROW_TILE))
    (out,) = fwd(image, params)
    out = jax.block_until_ready(out)

    S = (H // PATCH) * (W // PATCH)
    assert out.shape == (B, S, D_MODEL), out.shape
    assert jnp.all(jnp.isfinite(out))
    print("KERNEL_OK")
</pallas_src>

<mosaic_0001>
module attributes {stable_mosaic.version = 11 : i64} {
  func.func @stem_fc_kernel(%arg0: i32, %arg1: memref<64x48xf32, #tpu.memory_space<vmem>>, %arg2: memref<48x256xf32, #tpu.memory_space<vmem>>, %arg3: memref<1x256xf32, #tpu.memory_space<vmem>>, %arg4: memref<256x128xf32, #tpu.memory_space<vmem>>, %arg5: memref<1x128xf32, #tpu.memory_space<vmem>>, %arg6: memref<64x128xf32, #tpu.memory_space<vmem>>) attributes {dimension_semantics = [#tpu.dimension_semantics<parallel>], iteration_bounds = array<i64: 2>, scalar_prefetch = 0 : i64, scratch_operands = 0 : i64, tpu.core_type = #tpu.core_type<tc>, window_params = [{transform_indices = @transform_0, window_bounds = array<i64: 64, 48>}, {pipeline_mode = #tpu.pipeline_mode<synchronous>, transform_indices = @transform_1, window_bounds = array<i64: 48, 256>}, {pipeline_mode = #tpu.pipeline_mode<synchronous>, transform_indices = @transform_2, window_bounds = array<i64: 1, 256>}, {pipeline_mode = #tpu.pipeline_mode<synchronous>, transform_indices = @transform_3, window_bounds = array<i64: 256, 128>}, {pipeline_mode = #tpu.pipeline_mode<synchronous>, transform_indices = @transform_4, window_bounds = array<i64: 1, 128>}, {transform_indices = @transform_5, window_bounds = array<i64: 64, 128>}]} {
    %c0 = arith.constant 0 : index
    %c0_0 = arith.constant 0 : index
    %0 = vector.load %arg1[%c0, %c0_0] : memref<64x48xf32, #tpu.memory_space<vmem>>, vector<64x48xf32>
    %c0_1 = arith.constant 0 : index
    %c0_2 = arith.constant 0 : index
    %1 = vector.load %arg2[%c0_1, %c0_2] : memref<48x256xf32, #tpu.memory_space<vmem>>, vector<48x256xf32>
    %cst = arith.constant dense<0.000000e+00> : vector<64x256xf32>
    %2 = tpu.matmul %0, %1, %cst {dimension_numbers = #tpu.dot_dimension_numbers<[1], [0], [0], [1], [0, 0, 1, 1], [], []>} : vector<64x48xf32>, vector<48x256xf32>, vector<64x256xf32> -> vector<64x256xf32>
    %c0_3 = arith.constant 0 : index
    %c0_4 = arith.constant 0 : index
    %3 = vector.load %arg3[%c0_3, %c0_4] : memref<1x256xf32, #tpu.memory_space<vmem>>, vector<1x256xf32>
    %4 = vector.broadcast %3 : vector<1x256xf32> to vector<64x256xf32>
    %5 = arith.addf %2, %4 : vector<64x256xf32>
    %cst_5 = arith.constant 0.000000e+00 : f32
    %6 = vector.broadcast %cst_5 : f32 to vector<64x256xf32>
    %7 = arith.maximumf %5, %6 : vector<64x256xf32>
    %c0_6 = arith.constant 0 : index
    %c0_7 = arith.constant 0 : index
    %8 = vector.load %arg4[%c0_6, %c0_7] : memref<256x128xf32, #tpu.memory_space<vmem>>, vector<256x128xf32>
    %cst_8 = arith.constant dense<0.000000e+00> : vector<64x128xf32>
    %9 = tpu.matmul %7, %8, %cst_8 {dimension_numbers = #tpu.dot_dimension_numbers<[1], [0], [0], [1], [0, 0, 1, 1], [], []>} : vector<64x256xf32>, vector<256x128xf32>, vector<64x128xf32> -> vector<64x128xf32>
    %c0_9 = arith.constant 0 : index
    %c0_10 = arith.constant 0 : index
    %10 = vector.load %arg5[%c0_9, %c0_10] : memref<1x128xf32, #tpu.memory_space<vmem>>, vector<1x128xf32>
    %11 = vector.broadcast %10 : vector<1x128xf32> to vector<64x128xf32>
    %12 = arith.addf %9, %11 : vector<64x128xf32>
    %cst_11 = arith.constant 0.000000e+00 : f32
    %13 = vector.broadcast %cst_11 : f32 to vector<64x128xf32>
    %14 = arith.maximumf %12, %13 : vector<64x128xf32>
    %c0_12 = arith.constant 0 : index
    %c0_13 = arith.constant 0 : index
    %15 = vector.load %arg6[%c0_12, %c0_13] : memref<64x128xf32, #tpu.memory_space<vmem>>, vector<64x128xf32>
    tpu.vector_store %arg6[%c0_12, %c0_13], %14 {strides = array<i32>} : memref<64x128xf32, #tpu.memory_space<vmem>>, vector<64x128xf32>,
    return
  }
  func.func @transform_0(%arg0: i32) -> (i32, i32) {
    %c0_i32 = arith.constant 0 : i32
    %c0_i32_0 = arith.constant 0 : i32
    return %arg0, %c0_i32 : i32, i32
  }
  func.func @transform_1(%arg0: i32) -> (i32, i32) {
    %c0_i32 = arith.constant 0 : i32
    %c0_i32_0 = arith.constant 0 : i32
    %c0_i32_1 = arith.constant 0 : i32
    return %c0_i32, %c0_i32_0 : i32, i32
  }
  func.func @transform_2(%arg0: i32) -> (i32, i32) {
    %c0_i32 = arith.constant 0 : i32
    %c0_i32_0 = arith.constant 0 : i32
    %c0_i32_1 = arith.constant 0 : i32
    return %c0_i32, %c0_i32_0 : i32, i32
  }
  func.func @transform_3(%arg0: i32) -> (i32, i32) {
    %c0_i32 = arith.constant 0 : i32
    %c0_i32_0 = arith.constant 0 : i32
    %c0_i32_1 = arith.constant 0 : i32
    return %c0_i32, %c0_i32_0 : i32, i32
  }
  func.func @transform_4(%arg0: i32) -> (i32, i32) {
    %c0_i32 = arith.constant 0 : i32
    %c0_i32_0 = arith.constant 0 : i32
    %c0_i32_1 = arith.constant 0 : i32
    return %c0_i32, %c0_i32_0 : i32, i32
  }
  func.func @transform_5(%arg0: i32) -> (i32, i32) {
    %c0_i32 = arith.constant 0 : i32
    %c0_i32_0 = arith.constant 0 : i32
    return %arg0, %c0_i32 : i32, i32
  }
}

module attributes {stable_mosaic.version = 11 : i64} {
  func.func @dense_kernel(%arg0: i32, %arg1: memref<64x128xf32, #tpu.memory_space<vmem>>, %arg2: memref<128x384xf32, #tpu.memory_space<vmem>>, %arg3: memref<1x384xf32, #tpu.memory_space<vmem>>, %arg4: memref<64x384xf32, #tpu.memory_space<vmem>>) attributes {dimension_semantics = [#tpu.dimension_semantics<parallel>], iteration_bounds = array<i64: 2>, scalar_prefetch = 0 : i64, scratch_operands = 0 : i64, tpu.core_type = #tpu.core_type<tc>, window_params = [{transform_indices = @transform_0, window_bounds = array<i64: 64, 128>}, {pipeline_mode = #tpu.pipeline_mode<synchronous>, transform_indices = @transform_1, window_bounds = array<i64: 128, 384>}, {pipeline_mode = #tpu.pipeline_mode<synchronous>, transform_indices = @transform_2, window_bounds = array<i64: 1, 384>}, {transform_indices = @transform_3, window_bounds = array<i64: 64, 384>}]} {
    %c0 = arith.constant 0 : index
    %c0_0 = arith.constant 0 : index
    %0 = vector.load %arg1[%c0, %c0_0] : memref<64x128xf32, #tpu.memory_space<vmem>>, vector<64x128xf32>
    %c0_1 = arith.constant 0 : index
    %c0_2 = arith.constant 0 : index
    %1 = vector.load %arg2[%c0_1, %c0_2] : memref<128x384xf32, #tpu.memory_space<vmem>>, vector<128x384xf32>
    %cst = arith.constant dense<0.000000e+00> : vector<64x384xf32>
    %2 = tpu.matmul %0, %1, %cst {dimension_numbers = #tpu.dot_dimension_numbers<[1], [0], [0], [1], [0, 0, 1, 1], [], []>} : vector<64x128xf32>, vector<128x384xf32>, vector<64x384xf32> -> vector<64x384xf32>
    %c0_3 = arith.constant 0 : index
    %c0_4 = arith.constant 0 : index
    %3 = vector.load %arg3[%c0_3, %c0_4] : memref<1x384xf32, #tpu.memory_space<vmem>>, vector<1x384xf32>
    %4 = vector.broadcast %3 : vector<1x384xf32> to vector<64x384xf32>
    %5 = arith.addf %2, %4 : vector<64x384xf32>
    %c0_5 = arith.constant 0 : index
    %c0_6 = arith.constant 0 : index
    %6 = vector.load %arg4[%c0_5, %c0_6] : memref<64x384xf32, #tpu.memory_space<vmem>>, vector<64x384xf32>
    tpu.vector_store %arg4[%c0_5, %c0_6], %5 {strides = array<i32>} : memref<64x384xf32, #tpu.memory_space<vmem>>, vector<64x384xf32>,
    return
  }
  func.func @transform_0(%arg0: i32) -> (i32, i32) {
    %c0_i32 = arith.constant 0 : i32
    %c0_i32_0 = arith.constant 0 : i32
    return %arg0, %c0_i32 : i32, i32
  }
  func.func @transform_1(%arg0: i32) -> (i32, i32) {
    %c0_i32 = arith.constant 0 : i32
    %c0_i32_0 = arith.constant 0 : i32
    %c0_i32_1 = arith.constant 0 : i32
    return %c0_i32, %c0_i32_0 : i32, i32
  }
  func.func @transform_2(%arg0: i32) -> (i32, i32) {
    %c0_i32 = arith.constant 0 : i32
    %c0_i32_0 = arith.constant 0 : i32
    %c0_i32_1 = arith.constant 0 : i32
    return %c0_i32, %c0_i32_0 : i32, i32
  }
  func.func @transform_3(%arg0: i32) -> (i32, i32) {
    %c0_i32 = arith.constant 0 : i32
    %c0_i32_0 = arith.constant 0 : i32
    return %arg0, %c0_i32 : i32, i32
  }
}

module attributes {stable_mosaic.version = 11 : i64} {
  func.func @attn_core_kernel(%arg0: i32, %arg1: memref<1x4x64x32xf32, #tpu.memory_space<vmem>>, %arg2: memref<1x4x64x32xf32, #tpu.memory_space<vmem>>, %arg3: memref<1x4x64x32xf32, #tpu.memory_space<vmem>>, %arg4: memref<1x4x64x32xf32, #tpu.memory_space<vmem>>) attributes {dimension_semantics = [#tpu.dimension_semantics<parallel>], iteration_bounds = array<i64: 2>, scalar_prefetch = 0 : i64, scratch_operands = 0 : i64, tpu.core_type = #tpu.core_type<tc>, window_params = [{transform_indices = @transform_0, window_bounds = array<i64: 1, 4, 64, 32>}, {transform_indices = @transform_1, window_bounds = array<i64: 1, 4, 64, 32>}, {transform_indices = @transform_2, window_bounds = array<i64: 1, 4, 64, 32>}, {transform_indices = @transform_3, window_bounds = array<i64: 1, 4, 64, 32>}]} {
    %c0 = arith.constant 0 : index
    %c0_0 = arith.constant 0 : index
    %c0_1 = arith.constant 0 : index
    %c0_2 = arith.constant 0 : index
    %0 = vector.load %arg1[%c0, %c0_0, %c0_1, %c0_2] : memref<1x4x64x32xf32, #tpu.memory_space<vmem>>, vector<1x4x64x32xf32>
    %1 = vector.shape_cast %0 : vector<1x4x64x32xf32> to vector<4x64x32xf32>
    %c0_3 = arith.constant 0 : index
    %c0_4 = arith.constant 0 : index
    %c0_5 = arith.constant 0 : index
    %c0_6 = arith.constant 0 : index
    %2 = vector.load %arg2[%c0_3, %c0_4, %c0_5, %c0_6] : memref<1x4x64x32xf32, #tpu.memory_space<vmem>>, vector<1x4x64x32xf32>
    %3 = vector.shape_cast %2 : vector<1x4x64x32xf32> to vector<4x64x32xf32>
    %c0_7 = arith.constant 0 : index
    %c0_8 = arith.constant 0 : index
    %c0_9 = arith.constant 0 : index
    %c0_10 = arith.constant 0 : index
    %4 = vector.load %arg3[%c0_7, %c0_8, %c0_9, %c0_10] : memref<1x4x64x32xf32, #tpu.memory_space<vmem>>, vector<1x4x64x32xf32>
    %5 = vector.shape_cast %4 : vector<1x4x64x32xf32> to vector<4x64x32xf32>
    "tpu.trace_start"() <{level = 10 : i32, message = "hqd,hkd->hqk"}> : () -> ()
    %cst = arith.constant dense<0.000000e+00> : vector<4x64x64xf32>
    %6 = tpu.matmul %1, %3, %cst {dimension_numbers = #tpu.dot_dimension_numbers<[2], [2], [1], [1], [0, 0, 0, 1, 1, 1], [0], [0]>} : vector<4x64x32xf32>, vector<4x64x32xf32>, vector<4x64x64xf32> -> vector<4x64x64xf32>
    "tpu.trace_stop"() : () -> ()
    %cst_11 = arith.constant 0.176776692 : f32
    %7 = vector.broadcast %cst_11 : f32 to vector<4x64x64xf32>
    %8 = arith.mulf %6, %7 : vector<4x64x64xf32>
    %cst_12 = arith.constant dense<0xFF800000> : vector<4x64xf32>
    %9 = vector.multi_reduction <maximumf>, %8, %cst_12 [2] : vector<4x64x64xf32> to vector<4x64xf32>
    %10 = vector.shape_cast %9 : vector<4x64xf32> to vector<4x64x1xf32>
    %11 = vector.broadcast %10 : vector<4x64x1xf32> to vector<4x64x64xf32>
    %12 = arith.subf %8, %11 : vector<4x64x64xf32>
    %13 = math.exp %12 : vector<4x64x64xf32>
    %cst_13 = arith.constant dense<0.000000e+00> : vector<4x64xf32>
    %14 = vector.multi_reduction <add>, %13, %cst_13 [2] : vector<4x64x64xf32> to vector<4x64xf32>
    %15 = vector.shape_cast %14 : vector<4x64xf32> to vector<4x64x1xf32>
    %16 = vector.broadcast %15 : vector<4x64x1xf32> to vector<4x64x64xf32>
    %17 = arith.divf %13, %16 : vector<4x64x64xf32>
    "tpu.trace_start"() <{level = 10 : i32, message = "hqk,hkd->hqd"}> : () -> ()
    %cst_14 = arith.constant dense<0.000000e+00> : vector<4x64x32xf32>
    %18 = tpu.matmul %17, %5, %cst_14 {dimension_numbers = #tpu.dot_dimension_numbers<[2], [1], [1], [2], [0, 0, 0, 1, 1, 2], [0], [0]>} : vector<4x64x64xf32>, vector<4x64x32xf32>, vector<4x64x32xf32> -> vector<4x64x32xf32>
    "tpu.trace_stop"() : () -> ()
    %c0_15 = arith.constant 0 : index
    %c0_16 = arith.constant 0 : index
    %c0_17 = arith.constant 0 : index
    %c0_18 = arith.constant 0 : index
    %19 = vector.load %arg4[%c0_15, %c0_16, %c0_17, %c0_18] : memref<1x4x64x32xf32, #tpu.memory_space<vmem>>, vector<1x4x64x32xf32>
    %20 = vector.shape_cast %19 : vector<1x4x64x32xf32> to vector<4x64x32xf32>
    %21 = vector.shape_cast %18 : vector<4x64x32xf32> to vector<1x4x64x32xf32>
    tpu.vector_store %arg4[%c0_15, %c0_16, %c0_17, %c0_18], %21 {strides = array<i32>} : memref<1x4x64x32xf32, #tpu.memory_space<vmem>>, vector<1x4x64x32xf32>,
    return
  }
  func.func @transform_0(%arg0: i32) -> (i32, i32, i32, i32) {
    %c0_i32 = arith.constant 0 : i32
    %c0_i32_0 = arith.constant 0 : i32
    %c0_i32_1 = arith.constant 0 : i32
    %c0_i32_2 = arith.constant 0 : i32
    return %arg0, %c0_i32, %c0_i32_0, %c0_i32_1 : i32, i32, i32, i32
  }
  func.func @transform_1(%arg0: i32) -> (i32, i32, i32, i32) {
    %c0_i32 = arith.constant 0 : i32
    %c0_i32_0 = arith.constant 0 : i32
    %c0_i32_1 = arith.constant 0 : i32
    %c0_i32_2 = arith.constant 0 : i32
    return %arg0, %c0_i32, %c0_i32_0, %c0_i32_1 : i32, i32, i32, i32
  }
  func.func @transform_2(%arg0: i32) -> (i32, i32, i32, i32) {
    %c0_i32 = arith.constant 0 : i32
    %c0_i32_0 = arith.constant 0 : i32
    %c0_i32_1 = arith.constant 0 : i32
    %c0_i32_2 = arith.constant 0 : i32
    return %arg0, %c0_i32, %c0_i32_0, %c0_i32_1 : i32, i32, i32, i32
  }
  func.func @transform_3(%arg0: i32) -> (i32, i32, i32, i32) {
    %c0_i32 = arith.constant 0 : i32
    %c0_i32_0 = arith.constant 0 : i32
    %c0_i32_1 = arith.constant 0 : i32
    %c0_i32_2 = arith.constant 0 : i32
    return %arg0, %c0_i32, %c0_i32_0, %c0_i32_1 : i32, i32, i32, i32
  }
}

module attributes {stable_mosaic.version = 11 : i64} {
  func.func @post_attn_kernel(%arg0: i32, %arg1: memref<64x128xf32, #tpu.memory_space<vmem>>, %arg2: memref<64x128xf32, #tpu.memory_space<vmem>>, %arg3: memref<128x128xf32, #tpu.memory_space<vmem>>, %arg4: memref<1x128xf32, #tpu.memory_space<vmem>>, %arg5: memref<1x128xf32, #tpu.memory_space<vmem>>, %arg6: memref<1x128xf32, #tpu.memory_space<vmem>>, %arg7: memref<128x256xf32, #tpu.memory_space<vmem>>, %arg8: memref<1x256xf32, #tpu.memory_space<vmem>>, %arg9: memref<256x128xf32, #tpu.memory_space<vmem>>, %arg10: memref<1x128xf32, #tpu.memory_space<vmem>>, %arg11: memref<1x128xf32, #tpu.memory_space<vmem>>, %arg12: memref<1x128xf32, #tpu.memory_space<vmem>>, %arg13: memref<64x128xf32, #tpu.memory_space<vmem>>) attributes {dimension_semantics = [#tpu.dimension_semantics<parallel>], iteration_bounds = array<i64: 2>, scalar_prefetch = 0 : i64, scratch_operands = 0 : i64, tpu.core_type = #tpu.core_type<tc>, window_params = [{transform_indices = @transform_0, window_bounds = array<i64: 64, 128>}, {transform_indices = @transform_1, window_bounds = array<i64: 64, 128>}, {pipeline_mode = #tpu.pipeline_mode<synchronous>, transform_indices = @transform_2, window_bounds = array<i64: 128, 128>}, {pipeline_mode = #tpu.pipeline_mode<synchronous>, transform_indices = @transform_3, window_bounds = array<i64: 1, 128>}, {pipeline_mode = #tpu.pipeline_mode<synchronous>, transform_indices = @transform_4, window_bounds = array<i64: 1, 128>}, {pipeline_mode = #tpu.pipeline_mode<synchronous>, transform_indices = @transform_5, window_bounds = array<i64: 1, 128>}, {pipeline_mode = #tpu.pipeline_mode<synchronous>, transform_indices = @transform_6, window_bounds = array<i64: 128, 256>}, {pipeline_mode = #tpu.pipeline_mode<synchronous>, transform_indices = @transform_7, window_bounds = array<i64: 1, 256>}, {pipeline_mode = #tpu.pipeline_mode<synchronous>, transform_indices = @transform_8, window_bounds = array<i64: 256, 128>}, {pipeline_mode = #tpu.pipeline_mode<synchronous>, transform_indices = @transform_9, window_bounds = array<i64: 1, 128>}, {pipeline_mode = #tpu.pipeline_mode<synchronous>, transform_indices = @transform_10, window_bounds = array<i64: 1, 128>}, {pipeline_mode = #tpu.pipeline_mode<synchronous>, transform_indices = @transform_11, window_bounds = array<i64: 1, 128>}, {transform_indices = @transform_12, window_bounds = array<i64: 64, 128>}]} {
    %c0 = arith.constant 0 : index
    %c0_0 = arith.constant 0 : index
    %0 = vector.load %arg2[%c0, %c0_0] : memref<64x128xf32, #tpu.memory_space<vmem>>, vector<64x128xf32>
    %c0_1 = arith.constant 0 : index
    %c0_2 = arith.constant 0 : index
    %1 = vector.load %arg1[%c0_1, %c0_2] : memref<64x128xf32, #tpu.memory_space<vmem>>, vector<64x128xf32>
    %c0_3 = arith.constant 0 : index
    %c0_4 = arith.constant 0 : index
    %2 = vector.load %arg3[%c0_3, %c0_4] : memref<128x128xf32, #tpu.memory_space<vmem>>, vector<128x128xf32>
    %cst = arith.constant dense<0.000000e+00> : vector<64x128xf32>
    %3 = tpu.matmul %1, %2, %cst {dimension_numbers = #tpu.dot_dimension_numbers<[1], [0], [0], [1], [0, 0, 1, 1], [], []>} : vector<64x128xf32>, vector<128x128xf32>, vector<64x128xf32> -> vector<64x128xf32>
    %c0_5 = arith.constant 0 : index
    %c0_6 = arith.constant 0 : index
    %4 = vector.load %arg4[%c0_5, %c0_6] : memref<1x128xf32, #tpu.memory_space<vmem>>, vector<1x128xf32>
    %5 = vector.broadcast %4 : vector<1x128xf32> to vector<64x128xf32>
    %6 = arith.addf %3, %5 : vector<64x128xf32>
    %7 = arith.addf %6, %0 : vector<64x128xf32>
    %c0_7 = arith.constant 0 : index
    %c0_8 = arith.constant 0 : index
    %8 = vector.load %arg5[%c0_7, %c0_8] : memref<1x128xf32, #tpu.memory_space<vmem>>, vector<1x128xf32>
    %c0_9 = arith.constant 0 : index
    %c0_10 = arith.constant 0 : index
    %9 = vector.load %arg6[%c0_9, %c0_10] : memref<1x128xf32, #tpu.memory_space<vmem>>, vector<1x128xf32>
    %cst_11 = arith.constant dense<0.000000e+00> : vector<64xf32>
    %10 = vector.multi_reduction <add>, %7, %cst_11 [1] : vector<64x128xf32> to vector<64xf32>
    %11 = vector.shape_cast %10 : vector<64xf32> to vector<64x1xf32>
    %cst_12 = arith.constant 1.280000e+02 : f32
    %12 = vector.broadcast %cst_12 : f32 to vector<64x1xf32>
    %13 = arith.divf %11, %12 : vector<64x1xf32>
    %14 = vector.broadcast %13 : vector<64x1xf32> to vector<64x128xf32>
    %15 = arith.subf %7, %14 : vector<64x128xf32>
    %16 = arith.mulf %15, %15 : vector<64x128xf32>
    %cst_13 = arith.constant dense<0.000000e+00> : vector<64xf32>
    %17 = vector.multi_reduction <add>, %16, %cst_13 [1] : vector<64x128xf32> to vector<64xf32>
    %18 = vector.shape_cast %17 : vector<64xf32> to vector<64x1xf32>
    %cst_14 = arith.constant 1.280000e+02 : f32
    %19 = vector.broadcast %cst_14 : f32 to vector<64x1xf32>
    %20 = arith.divf %18, %19 : vector<64x1xf32>
    %21 = vector.broadcast %13 : vector<64x1xf32> to vector<64x128xf32>
    %22 = arith.subf %7, %21 : vector<64x128xf32>
    %cst_15 = arith.constant 9.99999974E-6 : f32
    %23 = vector.broadcast %cst_15 : f32 to vector<64x1xf32>
    %24 = arith.addf %20, %23 : vector<64x1xf32>
    %25 = math.rsqrt %24 : vector<64x1xf32>
    %26 = vector.broadcast %25 : vector<64x1xf32> to vector<64x128xf32>
    %27 = arith.mulf %22, %26 : vector<64x128xf32>
    %28 = vector.broadcast %8 : vector<1x128xf32> to vector<64x128xf32>
    %29 = arith.mulf %27, %28 : vector<64x128xf32>
    %30 = vector.broadcast %9 : vector<1x128xf32> to vector<64x128xf32>
    %31 = arith.addf %29, %30 : vector<64x128xf32>
    %c0_16 = arith.constant 0 : index
    %c0_17 = arith.constant 0 : index
    %32 = vector.load %arg7[%c0_16, %c0_17] : memref<128x256xf32, #tpu.memory_space<vmem>>, vector<128x256xf32>
    %cst_18 = arith.constant dense<0.000000e+00> : vector<64x256xf32>
    %33 = tpu.matmul %31, %32, %cst_18 {dimension_numbers = #tpu.dot_dimension_numbers<[1], [0], [0], [1], [0, 0, 1, 1], [], []>} : vector<64x128xf32>, vector<128x256xf32>, vector<64x256xf32> -> vector<64x256xf32>
    %c0_19 = arith.constant 0 : index
    %c0_20 = arith.constant 0 : index
    %34 = vector.load %arg8[%c0_19, %c0_20] : memref<1x256xf32, #tpu.memory_space<vmem>>, vector<1x256xf32>
    %35 = vector.broadcast %34 : vector<1x256xf32> to vector<64x256xf32>
    %36 = arith.addf %33, %35 : vector<64x256xf32>
    %cst_21 = arith.constant 0.000000e+00 : f32
    %37 = vector.broadcast %cst_21 : f32 to vector<64x256xf32>
    %38 = arith.maximumf %36, %37 : vector<64x256xf32>
    %c0_22 = arith.constant 0 : index
    %c0_23 = arith.constant 0 : index
    %39 = vector.load %arg9[%c0_22, %c0_23] : memref<256x128xf32, #tpu.memory_space<vmem>>, vector<256x128xf32>
    %cst_24 = arith.constant dense<0.000000e+00> : vector<64x128xf32>
    %40 = tpu.matmul %38, %39, %cst_24 {dimension_numbers = #tpu.dot_dimension_numbers<[1], [0], [0], [1], [0, 0, 1, 1], [], []>} : vector<64x256xf32>, vector<256x128xf32>, vector<64x128xf32> -> vector<64x128xf32>
    %c0_25 = arith.constant 0 : index
    %c0_26 = arith.constant 0 : index
    %41 = vector.load %arg10[%c0_25, %c0_26] : memref<1x128xf32, #tpu.memory_space<vmem>>, vector<1x128xf32>
    %42 = vector.broadcast %41 : vector<1x128xf32> to vector<64x128xf32>
    %43 = arith.addf %40, %42 : vector<64x128xf32>
    %44 = arith.addf %43, %31 : vector<64x128xf32>
    %c0_27 = arith.constant 0 : index
    %c0_28 = arith.constant 0 : index
    %45 = vector.load %arg11[%c0_27, %c0_28] : memref<1x128xf32, #tpu.memory_space<vmem>>, vector<1x128xf32>
    %c0_29 = arith.constant 0 : index
    %c0_30 = arith.constant 0 : index
    %46 = vector.load %arg12[%c0_29, %c0_30] : memref<1x128xf32, #tpu.memory_space<vmem>>, vector<1x128xf32>
    %cst_31 = arith.constant dense<0.000000e+00> : vector<64xf32>
    %47 = vector.multi_reduction <add>, %44, %cst_31 [1] : vector<64x128xf32> to vector<64xf32>
    %48 = vector.shape_cast %47 : vector<64xf32> to vector<64x1xf32>
    %cst_32 = arith.constant 1.280000e+02 : f32
    %49 = vector.broadcast %cst_32 : f32 to vector<64x1xf32>
    %50 = arith.divf %48, %49 : vector<64x1xf32>
    %51 = vector.broadcast %50 : vector<64x1xf32> to vector<64x128xf32>
    %52 = arith.subf %44, %51 : vector<64x128xf32>
    %53 = arith.mulf %52, %52 : vector<64x128xf32>
    %cst_33 = arith.constant dense<0.000000e+00> : vector<64xf32>
    %54 = vector.multi_reduction <add>, %53, %cst_33 [1] : vector<64x128xf32> to vector<64xf32>
    %55 = vector.shape_cast %54 : vector<64xf32> to vector<64x1xf32>
    %cst_34 = arith.constant 1.280000e+02 : f32
    %56 = vector.broadcast %cst_34 : f32 to vector<64x1xf32>
    %57 = arith.divf %55, %56 : vector<64x1xf32>
    %58 = vector.broadcast %50 : vector<64x1xf32> to vector<64x128xf32>
    %59 = arith.subf %44, %58 : vector<64x128xf32>
    %cst_35 = arith.constant 9.99999974E-6 : f32
    %60 = vector.broadcast %cst_35 : f32 to vector<64x1xf32>
    %61 = arith.addf %57, %60 : vector<64x1xf32>
    %62 = math.rsqrt %61 : vector<64x1xf32>
    %63 = vector.broadcast %62 : vector<64x1xf32> to vector<64x128xf32>
    %64 = arith.mulf %59, %63 : vector<64x128xf32>
    %65 = vector.broadcast %45 : vector<1x128xf32> to vector<64x128xf32>
    %66 = arith.mulf %64, %65 : vector<64x128xf32>
    %67 = vector.broadcast %46 : vector<1x128xf32> to vector<64x128xf32>
    %68 = arith.addf %66, %67 : vector<64x128xf32>
    %c0_36 = arith.constant 0 : index
    %c0_37 = arith.constant 0 : index
    %69 = vector.load %arg13[%c0_36, %c0_37] : memref<64x128xf32, #tpu.memory_space<vmem>>, vector<64x128xf32>
    tpu.vector_store %arg13[%c0_36, %c0_37], %68 {strides = array<i32>} : memref<64x128xf32, #tpu.memory_space<vmem>>, vector<64x128xf32>,
    return
  }
  func.func @transform_0(%arg0: i32) -> (i32, i32) {
    %c0_i32 = arith.constant 0 : i32
    %c0_i32_0 = arith.constant 0 : i32
    return %arg0, %c0_i32 : i32, i32
  }
  func.func @transform_1(%arg0: i32) -> (i32, i32) {
    %c0_i32 = arith.constant 0 : i32
    %c0_i32_0 = arith.constant 0 : i32
    return %arg0, %c0_i32 : i32, i32
  }
  func.func @transform_2(%arg0: i32) -> (i32, i32) {
    %c0_i32 = arith.constant 0 : i32
    %c0_i32_0 = arith.constant 0 : i32
    %c0_i32_1 = arith.constant 0 : i32
    return %c0_i32, %c0_i32_0 : i32, i32
  }
  func.func @transform_3(%arg0: i32) -> (i32, i32) {
    %c0_i32 = arith.constant 0 : i32
    %c0_i32_0 = arith.constant 0 : i32
    %c0_i32_1 = arith.constant 0 : i32
    return %c0_i32, %c0_i32_0 : i32, i32
  }
  func.func @transform_4(%arg0: i32) -> (i32, i32) {
    %c0_i32 = arith.constant 0 : i32
    %c0_i32_0 = arith.constant 0 : i32
    %c0_i32_1 = arith.constant 0 : i32
    return %c0_i32, %c0_i32_0 : i32, i32
  }
  func.func @transform_5(%arg0: i32) -> (i32, i32) {
    %c0_i32 = arith.constant 0 : i32
    %c0_i32_0 = arith.constant 0 : i32
    %c0_i32_1 = arith.constant 0 : i32
    return %c0_i32, %c0_i32_0 : i32, i32
  }
  func.func @transform_6(%arg0: i32) -> (i32, i32) {
    %c0_i32 = arith.constant 0 : i32
    %c0_i32_0 = arith.constant 0 : i32
    %c0_i32_1 = arith.constant 0 : i32
    return %c0_i32, %c0_i32_0 : i32, i32
  }
  func.func @transform_7(%arg0: i32) -> (i32, i32) {
    %c0_i32 = arith.constant 0 : i32
    %c0_i32_0 = arith.constant 0 : i32
    %c0_i32_1 = arith.constant 0 : i32
    return %c0_i32, %c0_i32_0 : i32, i32
  }
  func.func @transform_8(%arg0: i32) -> (i32, i32) {
    %c0_i32 = arith.constant 0 : i32
    %c0_i32_0 = arith.constant 0 : i32
    %c0_i32_1 = arith.constant 0 : i32
    return %c0_i32, %c0_i32_0 : i32, i32
  }
  func.func @transform_9(%arg0: i32) -> (i32, i32) {
    %c0_i32 = arith.constant 0 : i32
    %c0_i32_0 = arith.constant 0 : i32
    %c0_i32_1 = arith.constant 0 : i32
    return %c0_i32, %c0_i32_0 : i32, i32
  }
  func.func @transform_10(%arg0: i32) -> (i32, i32) {
    %c0_i32 = arith.constant 0 : i32
    %c0_i32_0 = arith.constant 0 : i32
    %c0_i32_1 = arith.constant 0 : i32
    return %c0_i32, %c0_i32_0 : i32, i32
  }
  func.func @transform_11(%arg0: i32) -> (i32, i32) {
    %c0_i32 = arith.constant 0 : i32
    %c0_i32_0 = arith.constant 0 : i32
    %c0_i32_1 = arith.constant 0 : i32
    return %c0_i32, %c0_i32_0 : i32, i32
  }
  func.func @transform_12(%arg0: i32) -> (i32, i32) {
    %c0_i32 = arith.constant 0 : i32
    %c0_i32_0 = arith.constant 0 : i32
    return %arg0, %c0_i32 : i32, i32
  }
}

module attributes {stable_mosaic.version = 11 : i64} {
  func.func @post_attn_kernel(%arg0: i32, %arg1: memref<64x128xf32, #tpu.memory_space<vmem>>, %arg2: memref<64x128xf32, #tpu.memory_space<vmem>>, %arg3: memref<128x128xf32, #tpu.memory_space<vmem>>, %arg4: memref<1x128xf32, #tpu.memory_space<vmem>>, %arg5: memref<1x128xf32, #tpu.memory_space<vmem>>, %arg6: memref<1x128xf32, #tpu.memory_space<vmem>>, %arg7: memref<128x256xf32, #tpu.memory_space<vmem>>, %arg8: memref<1x256xf32, #tpu.memory_space<vmem>>, %arg9: memref<256x128xf32, #tpu.memory_space<vmem>>, %arg10: memref<1x128xf32, #tpu.memory_space<vmem>>, %arg11: memref<1x128xf32, #tpu.memory_space<vmem>>, %arg12: memref<1x128xf32, #tpu.memory_space<vmem>>, %arg13: memref<64x128xf32, #tpu.memory_space<vmem>>) attributes {dimension_semantics = [#tpu.dimension_semantics<parallel>], iteration_bounds = array<i64: 2>, scalar_prefetch = 0 : i64, scratch_operands = 0 : i64, tpu.core_type = #tpu.core_type<tc>, window_params = [{transform_indices = @transform_0, window_bounds = array<i64: 64, 128>}, {transform_indices = @transform_1, window_bounds = array<i64: 64, 128>}, {pipeline_mode = #tpu.pipeline_mode<synchronous>, transform_indices = @transform_2, window_bounds = array<i64: 128, 128>}, {pipeline_mode = #tpu.pipeline_mode<synchronous>, transform_indices = @transform_3, window_bounds = array<i64: 1, 128>}, {pipeline_mode = #tpu.pipeline_mode<synchronous>, transform_indices = @transform_4, window_bounds = array<i64: 1, 128>}, {pipeline_mode = #tpu.pipeline_mode<synchronous>, transform_indices = @transform_5, window_bounds = array<i64: 1, 128>}, {pipeline_mode = #tpu.pipeline_mode<synchronous>, transform_indices = @transform_6, window_bounds = array<i64: 128, 256>}, {pipeline_mode = #tpu.pipeline_mode<synchronous>, transform_indices = @transform_7, window_bounds = array<i64: 1, 256>}, {pipeline_mode = #tpu.pipeline_mode<synchronous>, transform_indices = @transform_8, window_bounds = array<i64: 256, 128>}, {pipeline_mode = #tpu.pipeline_mode<synchronous>, transform_indices = @transform_9, window_bounds = array<i64: 1, 128>}, {pipeline_mode = #tpu.pipeline_mode<synchronous>, transform_indices = @transform_10, window_bounds = array<i64: 1, 128>}, {pipeline_mode = #tpu.pipeline_mode<synchronous>, transform_indices = @transform_11, window_bounds = array<i64: 1, 128>}, {transform_indices = @transform_12, window_bounds = array<i64: 64, 128>}]} {
    %c0 = arith.constant 0 : index
    %c0_0 = arith.constant 0 : index
    %0 = vector.load %arg2[%c0, %c0_0] : memref<64x128xf32, #tpu.memory_space<vmem>>, vector<64x128xf32>
    %c0_1 = arith.constant 0 : index
    %c0_2 = arith.constant 0 : index
    %1 = vector.load %arg1[%c0_1, %c0_2] : memref<64x128xf32, #tpu.memory_space<vmem>>, vector<64x128xf32>
    %c0_3 = arith.constant 0 : index
    %c0_4 = arith.constant 0 : index
    %2 = vector.load %arg3[%c0_3, %c0_4] : memref<128x128xf32, #tpu.memory_space<vmem>>, vector<128x128xf32>
    %cst = arith.constant dense<0.000000e+00> : vector<64x128xf32>
    %3 = tpu.matmul %1, %2, %cst {dimension_numbers = #tpu.dot_dimension_numbers<[1], [0], [0], [1], [0, 0, 1, 1], [], []>} : vector<64x128xf32>, vector<128x128xf32>, vector<64x128xf32> -> vector<64x128xf32>
    %c0_5 = arith.constant 0 : index
    %c0_6 = arith.constant 0 : index
    %4 = vector.load %arg4[%c0_5, %c0_6] : memref<1x128xf32, #tpu.memory_space<vmem>>, vector<1x128xf32>
    %5 = vector.broadcast %4 : vector<1x128xf32> to vector<64x128xf32>
    %6 = arith.addf %3, %5 : vector<64x128xf32>
    %7 = arith.addf %6, %0 : vector<64x128xf32>
    %c0_7 = arith.constant 0 : index
    %c0_8 = arith.constant 0 : index
    %8 = vector.load %arg5[%c0_7, %c0_8] : memref<1x128xf32, #tpu.memory_space<vmem>>, vector<1x128xf32>
    %c0_9 = arith.constant 0 : index
    %c0_10 = arith.constant 0 : index
    %9 = vector.load %arg6[%c0_9, %c0_10] : memref<1x128xf32, #tpu.memory_space<vmem>>, vector<1x128xf32>
    %cst_11 = arith.constant dense<0.000000e+00> : vector<64xf32>
    %10 = vector.multi_reduction <add>, %7, %cst_11 [1] : vector<64x128xf32> to vector<64xf32>
    %11 = vector.shape_cast %10 : vector<64xf32> to vector<64x1xf32>
    %cst_12 = arith.constant 1.280000e+02 : f32
    %12 = vector.broadcast %cst_12 : f32 to vector<64x1xf32>
    %13 = arith.divf %11, %12 : vector<64x1xf32>
    %14 = vector.broadcast %13 : vector<64x1xf32> to vector<64x128xf32>
    %15 = arith.subf %7, %14 : vector<64x128xf32>
    %16 = arith.mulf %15, %15 : vector<64x128xf32>
    %cst_13 = arith.constant dense<0.000000e+00> : vector<64xf32>
    %17 = vector.multi_reduction <add>, %16, %cst_13 [1] : vector<64x128xf32> to vector<64xf32>
    %18 = vector.shape_cast %17 : vector<64xf32> to vector<64x1xf32>
    %cst_14 = arith.constant 1.280000e+02 : f32
    %19 = vector.broadcast %cst_14 : f32 to vector<64x1xf32>
    %20 = arith.divf %18, %19 : vector<64x1xf32>
    %21 = vector.broadcast %13 : vector<64x1xf32> to vector<64x128xf32>
    %22 = arith.subf %7, %21 : vector<64x128xf32>
    %cst_15 = arith.constant 9.99999974E-6 : f32
    %23 = vector.broadcast %cst_15 : f32 to vector<64x1xf32>
    %24 = arith.addf %20, %23 : vector<64x1xf32>
    %25 = math.rsqrt %24 : vector<64x1xf32>
    %26 = vector.broadcast %25 : vector<64x1xf32> to vector<64x128xf32>
    %27 = arith.mulf %22, %26 : vector<64x128xf32>
    %28 = vector.broadcast %8 : vector<1x128xf32> to vector<64x128xf32>
    %29 = arith.mulf %27, %28 : vector<64x128xf32>
    %30 = vector.broadcast %9 : vector<1x128xf32> to vector<64x128xf32>
    %31 = arith.addf %29, %30 : vector<64x128xf32>
    %c0_16 = arith.constant 0 : index
    %c0_17 = arith.constant 0 : index
    %32 = vector.load %arg7[%c0_16, %c0_17] : memref<128x256xf32, #tpu.memory_space<vmem>>, vector<128x256xf32>
    %cst_18 = arith.constant dense<0.000000e+00> : vector<64x256xf32>
    %33 = tpu.matmul %31, %32, %cst_18 {dimension_numbers = #tpu.dot_dimension_numbers<[1], [0], [0], [1], [0, 0, 1, 1], [], []>} : vector<64x128xf32>, vector<128x256xf32>, vector<64x256xf32> -> vector<64x256xf32>
    %c0_19 = arith.constant 0 : index
    %c0_20 = arith.constant 0 : index
    %34 = vector.load %arg8[%c0_19, %c0_20] : memref<1x256xf32, #tpu.memory_space<vmem>>, vector<1x256xf32>
    %35 = vector.broadcast %34 : vector<1x256xf32> to vector<64x256xf32>
    %36 = arith.addf %33, %35 : vector<64x256xf32>
    %cst_21 = arith.constant 0.000000e+00 : f32
    %37 = vector.broadcast %cst_21 : f32 to vector<64x256xf32>
    %38 = arith.maximumf %36, %37 : vector<64x256xf32>
    %c0_22 = arith.constant 0 : index
    %c0_23 = arith.constant 0 : index
    %39 = vector.load %arg9[%c0_22, %c0_23] : memref<256x128xf32, #tpu.memory_space<vmem>>, vector<256x128xf32>
    %cst_24 = arith.constant dense<0.000000e+00> : vector<64x128xf32>
    %40 = tpu.matmul %38, %39, %cst_24 {dimension_numbers = #tpu.dot_dimension_numbers<[1], [0], [0], [1], [0, 0, 1, 1], [], []>} : vector<64x256xf32>, vector<256x128xf32>, vector<64x128xf32> -> vector<64x128xf32>
    %c0_25 = arith.constant 0 : index
    %c0_26 = arith.constant 0 : index
    %41 = vector.load %arg10[%c0_25, %c0_26] : memref<1x128xf32, #tpu.memory_space<vmem>>, vector<1x128xf32>
    %42 = vector.broadcast %41 : vector<1x128xf32> to vector<64x128xf32>
    %43 = arith.addf %40, %42 : vector<64x128xf32>
    %44 = arith.addf %43, %31 : vector<64x128xf32>
    %c0_27 = arith.constant 0 : index
    %c0_28 = arith.constant 0 : index
    %45 = vector.load %arg11[%c0_27, %c0_28] : memref<1x128xf32, #tpu.memory_space<vmem>>, vector<1x128xf32>
    %c0_29 = arith.constant 0 : index
    %c0_30 = arith.constant 0 : index
    %46 = vector.load %arg12[%c0_29, %c0_30] : memref<1x128xf32, #tpu.memory_space<vmem>>, vector<1x128xf32>
    %cst_31 = arith.constant dense<0.000000e+00> : vector<64xf32>
    %47 = vector.multi_reduction <add>, %44, %cst_31 [1] : vector<64x128xf32> to vector<64xf32>
    %48 = vector.shape_cast %47 : vector<64xf32> to vector<64x1xf32>
    %cst_32 = arith.constant 1.280000e+02 : f32
    %49 = vector.broadcast %cst_32 : f32 to vector<64x1xf32>
    %50 = arith.divf %48, %49 : vector<64x1xf32>
    %51 = vector.broadcast %50 : vector<64x1xf32> to vector<64x128xf32>
    %52 = arith.subf %44, %51 : vector<64x128xf32>
    %53 = arith.mulf %52, %52 : vector<64x128xf32>
    %cst_33 = arith.constant dense<0.000000e+00> : vector<64xf32>
    %54 = vector.multi_reduction <add>, %53, %cst_33 [1] : vector<64x128xf32> to vector<64xf32>
    %55 = vector.shape_cast %54 : vector<64xf32> to vector<64x1xf32>
    %cst_34 = arith.constant 1.280000e+02 : f32
    %56 = vector.broadcast %cst_34 : f32 to vector<64x1xf32>
    %57 = arith.divf %55, %56 : vector<64x1xf32>
    %58 = vector.broadcast %50 : vector<64x1xf32> to vector<64x128xf32>
    %59 = arith.subf %44, %58 : vector<64x128xf32>
    %cst_35 = arith.constant 9.99999974E-6 : f32
    %60 = vector.broadcast %cst_35 : f32 to vector<64x1xf32>
    %61 = arith.addf %57, %60 : vector<64x1xf32>
    %62 = math.rsqrt %61 : vector<64x1xf32>
    %63 = vector.broadcast %62 : vector<64x1xf32> to vector<64x128xf32>
    %64 = arith.mulf %59, %63 : vector<64x128xf32>
    %65 = vector.broadcast %45 : vector<1x128xf32> to vector<64x128xf32>
    %66 = arith.mulf %64, %65 : vector<64x128xf32>
    %67 = vector.broadcast %46 : vector<1x128xf32> to vector<64x128xf32>
    %68 = arith.addf %66, %67 : vector<64x128xf32>
    %c0_36 = arith.constant 0 : index
    %c0_37 = arith.constant 0 : index
    %69 = vector.load %arg13[%c0_36, %c0_37] : memref<64x128xf32, #tpu.memory_space<vmem>>, vector<64x128xf32>
    tpu.vector_store %arg13[%c0_36, %c0_37], %68 {strides = array<i32>} : memref<64x128xf32, #tpu.memory_space<vmem>>, vector<64x128xf32>,
    return
  }
  func.func @transform_0(%arg0: i32) -> (i32, i32) {
    %c0_i32 = arith.constant 0 : i32
    %c0_i32_0 = arith.constant 0 : i32
    return %arg0, %c0_i32 : i32, i32
  }
  func.func @transform_1(%arg0: i32) -> (i32, i32) {
    %c0_i32 = arith.constant 0 : i32
    %c0_i32_0 = arith.constant 0 : i32
    return %arg0, %c0_i32 : i32, i32
  }
  func.func @transform_2(%arg0: i32) -> (i32, i32) {
    %c0_i32 = arith.constant 0 : i32
    %c0_i32_0 = arith.constant 0 : i32
    %c0_i32_1 = arith.constant 0 : i32
    return %c0_i32, %c0_i32_0 : i32, i32
  }
  func.func @transform_3(%arg0: i32) -> (i32, i32) {
    %c0_i32 = arith.constant 0 : i32
    %c0_i32_0 = arith.constant 0 : i32
    %c0_i32_1 = arith.constant 0 : i32
    return %c0_i32, %c0_i32_0 : i32, i32
  }
  func.func @transform_4(%arg0: i32) -> (i32, i32) {
    %c0_i32 = arith.constant 0 : i32
    %c0_i32_0 = arith.constant 0 : i32
    %c0_i32_1 = arith.constant 0 : i32
    return %c0_i32, %c0_i32_0 : i32, i32
  }
  func.func @transform_5(%arg0: i32) -> (i32, i32) {
    %c0_i32 = arith.constant 0 : i32
    %c0_i32_0 = arith.constant 0 : i32
    %c0_i32_1 = arith.constant 0 : i32
    return %c0_i32, %c0_i32_0 : i32, i32
  }
  func.func @transform_6(%arg0: i32) -> (i32, i32) {
    %c0_i32 = arith.constant 0 : i32
    %c0_i32_0 = arith.constant 0 : i32
    %c0_i32_1 = arith.constant 0 : i32
    return %c0_i32, %c0_i32_0 : i32, i32
  }
  func.func @transform_7(%arg0: i32) -> (i32, i32) {
    %c0_i32 = arith.constant 0 : i32
    %c0_i32_0 = arith.constant 0 : i32
    %c0_i32_1 = arith.constant 0 : i32
    return %c0_i32, %c0_i32_0 : i32, i32
  }
  func.func @transform_8(%arg0: i32) -> (i32, i32) {
    %c0_i32 = arith.constant 0 : i32
    %c0_i32_0 = arith.constant 0 : i32
    %c0_i32_1 = arith.constant 0 : i32
    return %c0_i32, %c0_i32_0 : i32, i32
  }
  func.func @transform_9(%arg0: i32) -> (i32, i32) {
    %c0_i32 = arith.constant 0 : i32
    %c0_i32_0 = arith.constant 0 : i32
    %c0_i32_1 = arith.constant 0 : i32
    return %c0_i32, %c0_i32_0 : i32, i32
  }
  func.func @transform_10(%arg0: i32) -> (i32, i32) {
    %c0_i32 = arith.constant 0 : i32
    %c0_i32_0 = arith.constant 0 : i32
    %c0_i32_1 = arith.constant 0 : i32
    return %c0_i32, %c0_i32_0 : i32, i32
  }
  func.func @transform_11(%arg0: i32) -> (i32, i32) {
    %c0_i32 = arith.constant 0 : i32
    %c0_i32_0 = arith.constant 0 : i32
    %c0_i32_1 = arith.constant 0 : i32
    return %c0_i32, %c0_i32_0 : i32, i32
  }
  func.func @transform_12(%arg0: i32) -> (i32, i32) {
    %c0_i32 = arith.constant 0 : i32
    %c0_i32_0 = arith.constant 0 : i32
    return %arg0, %c0_i32 : i32, i32
  }
}

</mosaic_0001>

<bundles_post_ra>
// kernel: image_encoder_forward.7
= control target key start
LH: loop header
LB: loop body
LE: loop exit
PB: predicated region body
PF: predicated region fallthrough
CT: control target
= control target key end

     0   :  { %s814_s18 = smov 0   ;;  %s1012_s0 = inlined_call_operand.vmem [shape: f32[128,48], index: 0, kind: input, shape index: {}]   ;;  %s1013_s1 = inlined_call_operand.vmem [shape: f32[48,256], index: 1, kind: input, shape index: {}]   ;;  %s1014_s2 = inlined_call_operand.vmem [shape: f32[1,256], index: 2, kind: input, shape index: {}]   ;;  %s1015_s3 = inlined_call_operand.vmem [shape: f32[256,128], index: 3, kind: input, shape index: {}]   ;;  %s1016_s4 = inlined_call_operand.vmem [shape: f32[1,128], index: 4, kind: input, shape index: {}]   ;;  %s1017_s5 = inlined_call_operand.vmem [shape: f32[128,128], index: 5, kind: output, shape index: {}]  }
   0x1 LB: > { %s630_s19 = sadd.s32 4294967295, %s781_s18   ;;  %p634_p0 = scmp.ge.s32.totalorder %s781_s18, 1  ;;  %s781_s18 = sphi %s814_s18, %s15_s18  }
   0x2   : > { %p188_p1 = scmp.lt.s32.totalorder %s781_s18, 3 }
   0x4   : > { %p189_p2 = pnand %p634_p0, %p188_p1 }
   0x5   : > { %v237_v0 = vld [vmem:[%s1013_s1 + $0x8] sm:$0xff] (!%p189_p2)  ;;  %v239_v1 = vld [vmem:[%s1013_s1 + $0x18] sm:$0xff] (!%p189_p2)  ;;  %v236_v2 = vld [vmem:[%s1013_s1] sm:$0xff] (!%p189_p2)  ;;  %s635_s26 = sshll.u32 (!%p189_p2), %s630_s19, 3  ;;  %v783_v7 = vmov (!%p189_p2), 0.0   ;;  %vm260_vm0 = vcmask (!%p189_p2), 392192  }
   0x6   : > { %192 = sbr.rel (%p189_p2) target bundleno = 486 (0x1e6), region = 40  ;;  %v706_v3 = vpack.c.bf16 (!%p189_p2), %v239_v1, %v237_v0  ;;  %v238_v4 = vld [vmem:[%s1013_s1 + $0x10] sm:$0xff] (!%p189_p2)  ;;  %v241_v5 = vld [vmem:[%s1013_s1 + $0x28] sm:$0xff] (!%p189_p2)  ;;  %v243_v6 = vld [vmem:[%s1013_s1 + $0x38] sm:$0xff] (!%p189_p2)  ;;  %349 = vmatprep.mubr.f32.mxu0 (!%p189_p2), %v783_v7  ;;  %p217_p3 = scmp.lt.s32.totalorder (!%p189_p2), %s635_s26, 15 }
   0x7   : > { %v708_v8 = vpack.c.bf16 (!%p189_p2), %v238_v4, %v236_v2  ;;  %v710_v9 = vpack.c.bf16 (!%p189_p2), %v243_v6, %v241_v5  ;;  %v240_v10 = vld [vmem:[%s1013_s1 + $0x20] sm:$0xff] (!%p189_p2)  ;;  %v242_v11 = vld [vmem:[%s1013_s1 + $0x30] sm:$0xff] (!%p189_p2)  ;;  %v245_v12 = vld [vmem:[%s1013_s1 + $0x48] sm:$0xff] (!%p189_p2) }
   0x8   : > { %707 = vmatprep.subr.bf16.mxu0 (!%p189_p2), %v706_v3  ;;  %v247_v13 = vld [vmem:[%s1013_s1 + $0x58] sm:$0xff] (!%p189_p2)  ;;  %v244_v14 = vld [vmem:[%s1013_s1 + $0x40] sm:$0xff] (!%p189_p2)  ;;  %v246_v15 = vld [vmem:[%s1013_s1 + $0x50] sm:$0xff] (!%p189_p2)  ;;  %v712_v16 = vpack.c.bf16 (!%p189_p2), %v242_v11, %v240_v10  ;;  %v250_v11 = vlaneseq (!%p189_p2) }
   0x9   : > { %709 = vmatpush1.bf16.msra.mxu0 (!%p189_p2), %v708_v8  ;;  %v430_v17 = vld [vmem:[%s1015_s3 + $0x80] sm:$0xff] (!%p189_p2)  ;;  %v431_v18 = vld [vmem:[%s1015_s3 + $0x88] sm:$0xff] (!%p189_p2)  ;;  %v714_v20 = vpack.c.bf16 (!%p189_p2), %v247_v13, %v245_v12  ;;  %v432_v23 = vld [vmem:[%s1015_s3 + $0x90] sm:$0xff] (!%p189_p2)  ;;  %v716_v29 = vpack.c.bf16 (!%p189_p2), %v246_v15, %v244_v14 }
   0xa   : > { %v414_v19 = vld [vmem:[%s1015_s3] sm:$0xff] (!%p189_p2)  ;;  %711 = vmatprep.subr.bf16.mxu0 (!%p189_p2), %v710_v9  ;;  %v718_v21 = vpack.c.bf16 (!%p189_p2), %v431_v18, %v430_v17  ;;  %v415_v22 = vld [vmem:[%s1015_s3 + $0x8] sm:$0xff] (!%p189_p2)  ;;  %v433_v24 = vld [vmem:[%s1015_s3 + $0x98] sm:$0xff] (!%p189_p2)  ;;  %v251_v12 = vshrl.u32 (!%p189_p2), %v250_v11, 7 }
   0xb   : > { %v720_v25 = vpack.c.bf16 (!%p189_p2), %v415_v22, %v414_v19  ;;  %v722_v26 = vpack.c.bf16 (!%p189_p2), %v433_v24, %v432_v23  ;;  %v416_v27 = vld [vmem:[%s1015_s3 + $0x10] sm:$0xff] (!%p189_p2)  ;;  %v417_v28 = vld [vmem:[%s1015_s3 + $0x18] sm:$0xff] (!%p189_p2)  ;;  %v434_v30 = vld [vmem:[%s1015_s3 + $0xa0] sm:$0xff] (!%p189_p2) }
   0xc   : > { %750 = vmatprep.subr.bf16.mxu1 (!%p189_p2), %v718_v21  ;;  %v435_v31 = vld [vmem:[%s1015_s3 + $0xa8] sm:$0xff] (!%p189_p2)  ;;  %v724_v32 = vpack.c.bf16 (!%p189_p2), %v417_v28, %v416_v27  ;;  %v418_v35 = vld [vmem:[%s1015_s3 + $0x20] sm:$0xff] (!%p189_p2)  ;;  %v436_v37 = vld [vmem:[%s1015_s3 + $0xb0] sm:$0xff] (!%p189_p2)  ;;  %v252_v13 = vsub.s32 (!%p189_p2), 0, %v251_v12  ;;  %v256_v15 = vsub.s32 (!%p189_p2), 1, %v251_v12 }
   0xd   : > { %s1019_s26 = smov (!%p217_p3, %s635_s26), 15  ;;  %713 = vmatpush1.bf16.msra.mxu0 %v712_v16  ;;  %758 = vmatpush3.bf16.msra.mxu1 %v720_v25  ;;  %v726_v33 = vpack.c.bf16 %v435_v31, %v434_v30  ;;  %v419_v36 = vld [vmem:[%s1015_s3 + $0x28] sm:$0xff]  ;;  %v437_v38 = vld [vmem:[%s1015_s3 + $0xb8] sm:$0xff]  ;;  %v420_v42 = vld [vmem:[%s1015_s3 + $0x30] sm:$0xff] }
   0xe   : > { %s636_s9 = sshll.u32 %s1019_s26, 3  ;;  %715 = vmatprep.subr.bf16.mxu0 %v714_v20  ;;  %751 = vmatprep.subr.bf16.mxu1 %v722_v26  ;;  %v728_v39 = vpack.c.bf16 %v419_v36, %v418_v35  ;;  %v730_v41 = vpack.c.bf16 %v437_v38, %v436_v37  ;;  %v421_v43 = vld [vmem:[%s1015_s3 + $0x38] sm:$0xff]  ;;  %v438_v44 = vld [vmem:[%s1015_s3 + $0xc0] sm:$0xff]  ;;  %v439_v45 = vld [vmem:[%s1015_s3 + $0xc8] sm:$0xff] }
   0xf   : > { %s894_s19 = scalar_lea.vmem %s1012_s0, %s636_s9  ;;  %v732_v46 = vpack.c.bf16 %v421_v43, %v420_v42  ;;  %v734_v48 = vpack.c.bf16 %v439_v45, %v438_v44  ;;  %v422_v49 = vld [vmem:[%s1015_s3 + $0x40] sm:$0xff]  ;;  %v423_v50 = vld [vmem:[%s1015_s3 + $0x48] sm:$0xff]  ;;  %v440_v51 = vld [vmem:[%s1015_s3 + $0xd0] sm:$0xff]  ;;  %s999_s30 = scalar_lea.vmem %s1017_s5, %s636_s9 }
  0x10   : > { %v228_v34 = vld [vmem:[%s894_s19] sm:$0xff]  ;;  %v229_v40 = vld [vmem:[%s894_s19 + $0x8] sm:$0xff]  ;;  %v230_v47 = vld [vmem:[%s894_s19 + $0x10] sm:$0xff]  ;;  %v736_v53 = vpack.c.bf16 %v423_v50, %v422_v49 }
  0x11   : > { %717 = vmatpush1.bf16.msra.mxu0 %v716_v29  ;;  %759 = vmatpush3.bf16.msra.mxu1 %v724_v32  ;;  %v441_v52 = vld [vmem:[%s1015_s3 + $0xd8] sm:$0xff]  ;;  %v424_v56 = vld [vmem:[%s1015_s3 + $0x50] sm:$0xff]  ;;  %v442_v58 = vld [vmem:[%s1015_s3 + $0xe0] sm:$0xff] }
  0x12   : > { %719 = vmatprep.subr.bf16.mxu0 %v718_v21  ;;  %752 = vmatprep.subr.bf16.mxu1 %v726_v33  ;;  %v231_v54 = vld [vmem:[%s894_s19 + $0x18] sm:$0xff]  ;;  %v738_v55 = vpack.c.bf16 %v441_v52, %v440_v51  ;;  %v443_v59 = vld [vmem:[%s1015_s3 + $0xe8] sm:$0xff]  ;;  %v232_v61 = vld [vmem:[%s894_s19 + $0x20] sm:$0xff] }
  0x13   : > { %v425_v57 = vld [vmem:[%s1015_s3 + $0x58] sm:$0xff]  ;;  %v742_v62 = vpack.c.bf16 %v443_v59, %v442_v58  ;;  %v233_v63 = vld [vmem:[%s894_s19 + $0x28] sm:$0xff]  ;;  %v234_v0 = vld [vmem:[%s894_s19 + $0x30] sm:$0xff] }
  0x14   : > { %639 = vmatmul.mubr.msk.f32.vlgmr.msra.gmra.mrb[0].mxu0 %vm260_vm0, %v228_v34  ;;  %v740_v60 = vpack.c.bf16 %v425_v57, %v424_v56  ;;  %v235_v1 = vld [vmem:[%s894_s19 + $0x38] sm:$0xff]  ;;  %v426_v2 = vld [vmem:[%s1015_s3 + $0x60] sm:$0xff]  ;;  %v427_v3 = vld [vmem:[%s1015_s3 + $0x68] sm:$0xff] }
  0x15   : > { %355 = vmatprep.mubr.f32.mxu0 %v783_v7  ;;  %721 = vmatpush3.bf16.msra.mxu0 %v720_v25  ;;  %v744_v4 = vpack.c.bf16 %v427_v3, %v426_v2  ;;  %v444_v5 = vld [vmem:[%s1015_s3 + $0xf0] sm:$0xff]  ;;  %v445_v6 = vld [vmem:[%s1015_s3 + $0xf8] sm:$0xff]  ;;  %v248_v14 = vld [vmem:[%s1014_s2] sm:$0x3] }
  0x16   : > { %723 = vmatprep.subr.bf16.mxu0 %v722_v26  ;;  %760 = vmatpush3.bf16.msra.mxu1 %v728_v39  ;;  %v428_v8 = vld [vmem:[%s1015_s3 + $0x70] sm:$0xff]  ;;  %v429_v9 = vld [vmem:[%s1015_s3 + $0x78] sm:$0xff]  ;;  %v253_v16 = vrot.slane %v248_v14, %v252_v13  ;;  %v257_v17 = vrot.slane %v248_v14, %v256_v15  ;;  %v647_v3 = vld [vmem:[%s1016_s4] ss:$0 sm:$0xff] }
  0x17   : > { %753 = vmatprep.subr.bf16.mxu1 %v730_v41  ;;  %v748_v10 = vpack.c.bf16 %v429_v9, %v428_v8 }
  0x18   : > { %640 = vmatmul.mubr.msk.f32.gmra.mrb[2].mxu0 %vm260_vm0, %v229_v40 }
  0x19   : > { %361 = vmatprep.mubr.f32.mxu0 %v783_v7  ;;  %725 = vmatpush3.bf16.msra.mxu0 %v724_v32 }
  0x1a   : > { %727 = vmatprep.subr.bf16.mxu0 %v726_v33  ;;  %761 = vmatpush3.bf16.msra.mxu1 %v732_v46 }
  0x1b   : > { %754 = vmatprep.subr.bf16.mxu1 %v734_v48 }
  0x1c   : > { %641 = vmatmul.mubr.msk.f32.gmra.mrb[4].mxu0 %vm260_vm0, %v230_v47 }
  0x1d   : > { %367 = vmatprep.mubr.f32.mxu0 %v783_v7  ;;  %729 = vmatpush3.bf16.msra.mxu0 %v728_v39 }
  0x1e   : > { %731 = vmatprep.subr.bf16.mxu0 %v730_v41  ;;  %762 = vmatpush3.bf16.msra.mxu1 %v736_v53 }
  0x1f   : > { %755 = vmatprep.subr.bf16.mxu1 %v738_v55 }
  0x20   : > { %642 = vmatmul.mubr.msk.f32.gmra.mrb[6].mxu0 %vm260_vm0, %v231_v54 }
  0x21   : > { %373 = vmatprep.mubr.f32.mxu0 %v783_v7  ;;  %733 = vmatpush3.bf16.msra.mxu0 %v732_v46 }
  0x22   : > { %735 = vmatprep.subr.bf16.mxu0 %v734_v48  ;;  %763 = vmatpush3.bf16.msra.mxu1 %v740_v60 }
  0x23   : > { %756 = vmatprep.subr.bf16.mxu1 %v742_v62 }
  0x24   : > { %643 = vmatmul.mubr.msk.f32.gmra.mrb[8].mxu0 %vm260_vm0, %v232_v61 }
  0x25   : > { %379 = vmatprep.mubr.f32.mxu0 %v783_v7  ;;  %737 = vmatpush3.bf16.msra.mxu0 %v736_v53 }
  0x26   : > { %739 = vmatprep.subr.bf16.mxu0 %v738_v55  ;;  %764 = vmatpush3.bf16.msra.mxu1 %v744_v4 }
  0x28   : > { %644 = vmatmul.mubr.msk.f32.gmra.mrb[10].mxu0 %vm260_vm0, %v233_v63 }
  0x29   : > { %385 = vmatprep.mubr.f32.mxu0 %v783_v7  ;;  %741 = vmatpush3.bf16.msra.mxu0 %v740_v60 }
  0x2a   : > { %743 = vmatprep.subr.bf16.mxu0 %v742_v62 }
  0x2c   : > { %645 = vmatmul.mubr.msk.f32.gmra.mrb[12].mxu0 %vm260_vm0, %v234_v0 }
  0x2d   : > { %391 = vmatprep.mubr.f32.mxu0 %v783_v7  ;;  %745 = vmatpush3.bf16.msra.mxu0 %v744_v4  ;;  %v746_v7 = vpack.c.bf16 %v445_v6, %v444_v5 }
  0x2f   : > { %747 = vmatprep.subr.bf16.mxu0 %v746_v7  ;;  %757 = vmatprep.subr.bf16.mxu1 %v746_v7 }
  0x30   : > { %646 = vmatmul.mubr.msk.f32.gmra.mrb[14].mxu0 %vm260_vm0, %v235_v1  ;;  %765 = vmatpush3.bf16.msra.mxu1 %v748_v10 }
  0x31   : > { %749 = vmatpush3.bf16.msra.mxu0 %v748_v10 }
  0xe7   : > { %v351_v18 = vpop.f32.mrb[0].mxu0 }
  0xe8   : > { %v352_v19 = vadd.f32 %v351_v18, %v253_v16  ;;  %v353_v20 = vpop.f32.mrb[1].mxu0 }
  0xe9   : > { %v354_v21 = vadd.f32 %v353_v20, %v257_v17 }
  0xea   : > { %v398_v24 = vmax.f32 %v352_v19, 0.0 }
  0xeb   : > { %v399_v22 = vmax.f32 %v354_v21, 0.0  ;;  %v357_v23 = vpop.f32.mrb[2].mxu0 }
  0xec   : > { %v358_v25 = vadd.f32 %v357_v23, %v253_v16  ;;  %v359_v26 = vpop.f32.mrb[3].mxu0 }
  0xed   : > { %v360_v27 = vadd.f32 %v359_v26, %v257_v17  ;;  %517 = vmatprep.mubr.f32.mxu0 %v399_v22 }
  0xee   : > { %518 = vmatmul.mubr.f32.vlgmr.msra.gmra.mrb[16].mxu0 %v398_v24  ;;  %v400_v30 = vmax.f32 %v358_v25, 0.0 }
  0xef   : > { %v401_v28 = vmax.f32 %v360_v27, 0.0  ;;  %v363_v29 = vpop.f32.mrb[4].mxu0 }
  0xf0   : > { %v364_v31 = vadd.f32 %v363_v29, %v253_v16  ;;  %v365_v32 = vpop.f32.mrb[5].mxu0 }
  0xf1   : > { %522 = vmatprep.mubr.f32.mxu0 %v401_v28  ;;  %v366_v33 = vadd.f32 %v365_v32, %v257_v17 }
  0xf2   : > { %523 = vmatmul.mubr.f32.gmra.mrb[18].mxu0 %v400_v30  ;;  %v402_v36 = vmax.f32 %v364_v31, 0.0 }
  0xf3   : > { %v369_v34 = vpop.f32.mrb[6].mxu0  ;;  %v403_v35 = vmax.f32 %v366_v33, 0.0 }
  0xf4   : > { %v370_v37 = vadd.f32 %v369_v34, %v253_v16  ;;  %v371_v38 = vpop.f32.mrb[7].mxu0 }
  0xf5   : > { %v372_v39 = vadd.f32 %v371_v38, %v257_v17  ;;  %527 = vmatprep.mubr.f32.mxu1 %v403_v35 }
  0xf6   : > { %528 = vmatmul.mubr.f32.vlgmr.msra.gmra.mrb[0].mxu1 %v402_v36  ;;  %v404_v42 = vmax.f32 %v370_v37, 0.0 }
  0xf7   : > { %v405_v40 = vmax.f32 %v372_v39, 0.0  ;;  %v375_v41 = vpop.f32.mrb[8].mxu0 }
  0xf8   : > { %v376_v43 = vadd.f32 %v375_v41, %v253_v16  ;;  %v377_v44 = vpop.f32.mrb[9].mxu0 }
  0xf9   : > { %v378_v45 = vadd.f32 %v377_v44, %v257_v17  ;;  %532 = vmatprep.mubr.f32.mxu1 %v405_v40 }
  0xfa   : > { %533 = vmatmul.mubr.f32.gmra.mrb[2].mxu1 %v404_v42  ;;  %v406_v48 = vmax.f32 %v376_v43, 0.0 }
  0xfb   : > { %v407_v46 = vmax.f32 %v378_v45, 0.0  ;;  %v381_v47 = vpop.f32.mrb[10].mxu0 }
  0xfc   : > { %v382_v49 = vadd.f32 %v381_v47, %v253_v16  ;;  %v383_v50 = vpop.f32.mrb[11].mxu0 }
  0xfd   : > { %v384_v51 = vadd.f32 %v383_v50, %v257_v17  ;;  %537 = vmatprep.mubr.f32.mxu1 %v407_v46 }
  0xfe   : > { %538 = vmatmul.mubr.f32.gmra.mrb[4].mxu1 %v406_v48  ;;  %v408_v54 = vmax.f32 %v382_v49, 0.0 }
  0xff   : > { %v409_v52 = vmax.f32 %v384_v51, 0.0  ;;  %v387_v53 = vpop.f32.mrb[12].mxu0 }
 0x100   : > { %v388_v55 = vadd.f32 %v387_v53, %v253_v16  ;;  %v389_v56 = vpop.f32.mrb[13].mxu0 }
 0x101   : > { %v390_v57 = vadd.f32 %v389_v56, %v257_v17  ;;  %542 = vmatprep.mubr.f32.mxu1 %v409_v52 }
 0x102   : > { %543 = vmatmul.mubr.f32.gmra.mrb[6].mxu1 %v408_v54  ;;  %v410_v60 = vmax.f32 %v388_v55, 0.0 }
 0x103   : > { %v411_v58 = vmax.f32 %v390_v57, 0.0  ;;  %v393_v59 = vpop.f32.mrb[14].mxu0 }
 0x104   : > { %v394_v61 = vadd.f32 %v393_v59, %v253_v16  ;;  %v395_v62 = vpop.f32.mrb[15].mxu0 }
 0x105   : > { %v396_v63 = vadd.f32 %v395_v62, %v257_v17  ;;  %547 = vmatprep.mubr.f32.mxu1 %v411_v58 }
 0x106   : > { %548 = vmatmul.mubr.f32.gmra.mrb[8].mxu1 %v410_v60  ;;  %v412_v1 = vmax.f32 %v394_v61, 0.0 }
 0x107   : > { %v413_v0 = vmax.f32 %v396_v63, 0.0 }
 0x109   : > { %552 = vmatprep.mubr.f32.mxu1 %v413_v0 }
 0x10a   : > { %553 = vmatmul.mubr.f32.gmra.mrb[10].mxu1 %v412_v1 }
 0x1c1   : > { %v682_v2 = vpop.f32.mrb[16].mxu0 }
 0x1c2   : > { %v683_v4 = vpop.f32.mrb[17].mxu0 }
 0x1c3   : > { %v684_v5 = vadd.f32 %v683_v4, %v682_v2 }
 0x1c5   : > { %v520_v6 = vadd.f32 %v684_v5, %v647_v3  ;;  %v685_v7 = vpop.f32.mrb[18].mxu0 }
 0x1c6   : > { %v686_v8 = vpop.f32.mrb[19].mxu0 }
 0x1c7   : > { %v558_v9 = vmax.f32 %v520_v6, 0.0  ;;  %v687_v10 = vadd.f32 %v686_v8, %v685_v7 }
 0x1c9   : > { %566 = vst [vmem:[%s999_s30] sm:$0xff] %v558_v9  ;;  %v525_v11 = vadd.f32 %v687_v10, %v647_v3  ;;  %v688_v12 = vpop.f32.mrb[0].mxu1 }
 0x1ca   : > { %v689_v13 = vpop.f32.mrb[1].mxu1 }
 0x1cb   : > { %v559_v14 = vmax.f32 %v525_v11, 0.0  ;;  %v690_v15 = vadd.f32 %v689_v13, %v688_v12 }
 0x1cd   : > { %567 = vst [vmem:[%s999_s30 + $0x8] sm:$0xff] %v559_v14  ;;  %v530_v16 = vadd.f32 %v690_v15, %v647_v3  ;;  %v691_v17 = vpop.f32.mrb[2].mxu1 }
 0x1ce   : > { %v692_v18 = vpop.f32.mrb[3].mxu1 }
 0x1cf   : > { %v560_v19 = vmax.f32 %v530_v16, 0.0  ;;  %v693_v20 = vadd.f32 %v692_v18, %v691_v17 }
 0x1d1   : > { %568 = vst [vmem:[%s999_s30 + $0x10] sm:$0xff] %v560_v19  ;;  %v535_v21 = vadd.f32 %v693_v20, %v647_v3  ;;  %v694_v22 = vpop.f32.mrb[4].mxu1 }
 0x1d2   : > { %v695_v23 = vpop.f32.mrb[5].mxu1 }
 0x1d3   : > { %v561_v24 = vmax.f32 %v535_v21, 0.0  ;;  %v696_v25 = vadd.f32 %v695_v23, %v694_v22 }
 0x1d5   : > { %569 = vst [vmem:[%s999_s30 + $0x18] sm:$0xff] %v561_v24  ;;  %v540_v26 = vadd.f32 %v696_v25, %v647_v3  ;;  %v697_v27 = vpop.f32.mrb[6].mxu1 }
 0x1d6   : > { %v698_v28 = vpop.f32.mrb[7].mxu1 }
 0x1d7   : > { %v562_v29 = vmax.f32 %v540_v26, 0.0  ;;  %v699_v30 = vadd.f32 %v698_v28, %v697_v27 }
 0x1d9   : > { %570 = vst [vmem:[%s999_s30 + $0x20] sm:$0xff] %v562_v29  ;;  %v545_v31 = vadd.f32 %v699_v30, %v647_v3  ;;  %v700_v32 = vpop.f32.mrb[8].mxu1 }
 0x1da   : > { %v701_v33 = vpop.f32.mrb[9].mxu1 }
 0x1db   : > { %v563_v34 = vmax.f32 %v545_v31, 0.0  ;;  %v702_v35 = vadd.f32 %v701_v33, %v700_v32 }
 0x1dd   : > { %571 = vst [vmem:[%s999_s30 + $0x28] sm:$0xff] %v563_v34  ;;  %v550_v36 = vadd.f32 %v702_v35, %v647_v3  ;;  %v703_v37 = vpop.f32.mrb[10].mxu1 }
 0x1de   : > { %v704_v38 = vpop.f32.mrb[11].mxu1 }
 0x1df   : > { %v564_v39 = vmax.f32 %v550_v36, 0.0  ;;  %v705_v40 = vadd.f32 %v704_v38, %v703_v37 }
 0x1e1   : > { %572 = vst [vmem:[%s999_s30 + $0x30] sm:$0xff] %v564_v39  ;;  %v555_v41 = vadd.f32 %v705_v40, %v647_v3 }
 0x1e3   : > { %v565_v42 = vmax.f32 %v555_v41, 0.0 }
 0x1e5   : > { %573 = vst [vmem:[%s999_s30 + $0x38] sm:$0xff] %v565_v42 }
 0x1e6 PF: > { %s15_s18 = sadd.s32 1, %s781_s18  }
 0x1e7   : > { %p12_p4 = scmp.ge.s32.totalorder %s15_s18, 4  }
 0x1e9   :  { %14 = sbr.rel (!%p12_p4) target bundleno = 1 (0x1), region = 70 }

// kernel: image_encoder_forward.8
= control target key start
LH: loop header
LB: loop body
LE: loop exit
PB: predicated region body
PF: predicated region fallthrough
CT: control target
= control target key end

     0   :  { %s731_s12 = smov 0   ;;  %s963_s0 = inlined_call_operand.vmem [shape: f32[128,128], index: 0, kind: input, shape index: {}]   ;;  %s964_s1 = inlined_call_operand.vmem [shape: f32[128,384], index: 1, kind: input, shape index: {}]   ;;  %s965_s2 = inlined_call_operand.vmem [shape: f32[1,384], index: 2, kind: input, shape index: {}]   ;;  %s966_s3 = inlined_call_operand.vmem [shape: f32[128,384], index: 3, kind: output, shape index: {}]  }
   0x1 LB: > { %s549_s13 = sadd.s32 4294967295, %s708_s12   ;;  %p553_p0 = scmp.ge.s32.totalorder %s708_s12, 1  ;;  %s708_s12 = sphi %s731_s12, %s13_s12  }
   0x2   : > { %p138_p1 = scmp.lt.s32.totalorder %s708_s12, 3 }
   0x4   : > { %p139_p2 = pnand %p553_p0, %p138_p1 }
   0x5   : > { %v185_v0 = vld [vmem:[%s964_s1 + $0x8] sm:$0xff] (!%p139_p2)  ;;  %v188_v1 = vld [vmem:[%s964_s1 + $0x20] sm:$0xff] (!%p139_p2)  ;;  %s554_s20 = sshll.u32 (!%p139_p2), %s549_s13, 3  ;;  %v187_v4 = vld [vmem:[%s964_s1 + $0x18] sm:$0xff] (!%p139_p2)  ;;  %v710_v7 = vmov (!%p139_p2), 0.0  }
   0x6   : > { %142 = sbr.rel (%p139_p2) target bundleno = 284 (0x11c), region = 32  ;;  %v184_v2 = vld [vmem:[%s964_s1] sm:$0xff] (!%p139_p2)  ;;  %v628_v3 = vpack.c.bf16 (!%p139_p2), %v188_v1, %v185_v0  ;;  %v191_v5 = vld [vmem:[%s964_s1 + $0x38] sm:$0xff] (!%p139_p2)  ;;  %v194_v6 = vld [vmem:[%s964_s1 + $0x50] sm:$0xff] (!%p139_p2)  ;;  %313 = vmatprep.mubr.f32.mxu0 (!%p139_p2), %v710_v7  ;;  %p164_p3 = scmp.lt.s32.totalorder (!%p139_p2), %s554_s20, 15 }
   0x7   : > { %v630_v8 = vpack.c.bf16 (!%p139_p2), %v187_v4, %v184_v2  ;;  %v632_v9 = vpack.c.bf16 (!%p139_p2), %v194_v6, %v191_v5  ;;  %v190_v10 = vld [vmem:[%s964_s1 + $0x30] sm:$0xff] (!%p139_p2)  ;;  %v193_v11 = vld [vmem:[%s964_s1 + $0x48] sm:$0xff] (!%p139_p2)  ;;  %v200_v13 = vld [vmem:[%s964_s1 + $0x80] sm:$0xff] (!%p139_p2) }
   0x8   : > { %v197_v12 = vld [vmem:[%s964_s1 + $0x68] sm:$0xff] (!%p139_p2)  ;;  %629 = vmatprep.subr.bf16.mxu0 (!%p139_p2), %v628_v3  ;;  %v634_v14 = vpack.c.bf16 (!%p139_p2), %v193_v11, %v190_v10  ;;  %v196_v15 = vld [vmem:[%s964_s1 + $0x60] sm:$0xff] (!%p139_p2)  ;;  %v199_v17 = vld [vmem:[%s964_s1 + $0x78] sm:$0xff] (!%p139_p2) }
   0x9   : > { %631 = vmatpush1.bf16.msra.mxu0 (!%p139_p2), %v630_v8  ;;  %v636_v16 = vpack.c.bf16 (!%p139_p2), %v200_v13, %v197_v12  ;;  %v186_v18 = vld [vmem:[%s964_s1 + $0x10] sm:$0xff] (!%p139_p2)  ;;  %v189_v19 = vld [vmem:[%s964_s1 + $0x28] sm:$0xff] (!%p139_p2)  ;;  %v203_v20 = vld [vmem:[%s964_s1 + $0x98] sm:$0xff] (!%p139_p2)  ;;  %v638_v25 = vpack.c.bf16 (!%p139_p2), %v199_v17, %v196_v15 }
   0xa   : > { %633 = vmatprep.subr.bf16.mxu0 (!%p139_p2), %v632_v9  ;;  %v206_v21 = vld [vmem:[%s964_s1 + $0xb0] sm:$0xff] (!%p139_p2)  ;;  %v660_v22 = vpack.c.bf16 (!%p139_p2), %v189_v19, %v186_v18  ;;  %v192_v23 = vld [vmem:[%s964_s1 + $0x40] sm:$0xff] (!%p139_p2)  ;;  %v195_v24 = vld [vmem:[%s964_s1 + $0x58] sm:$0xff] (!%p139_p2)  ;;  %v234_v18 = vlaneseq (!%p139_p2) }
   0xb   : > { %v202_v26 = vld [vmem:[%s964_s1 + $0x90] sm:$0xff] (!%p139_p2)  ;;  %v664_v27 = vpack.c.bf16 (!%p139_p2), %v195_v24, %v192_v23  ;;  %v640_v28 = vpack.c.bf16 (!%p139_p2), %v206_v21, %v203_v20  ;;  %v205_v29 = vld [vmem:[%s964_s1 + $0xa8] sm:$0xff] (!%p139_p2)  ;;  %v212_v33 = vld [vmem:[%s964_s1 + $0xe0] sm:$0xff] (!%p139_p2) }
   0xc   : > { %661 = vmatprep.subr.bf16.mxu1 (!%p139_p2), %v660_v22  ;;  %v198_v30 = vld [vmem:[%s964_s1 + $0x70] sm:$0xff] (!%p139_p2)  ;;  %v201_v31 = vld [vmem:[%s964_s1 + $0x88] sm:$0xff] (!%p139_p2)  ;;  %v204_v35 = vld [vmem:[%s964_s1 + $0xa0] sm:$0xff] (!%p139_p2)  ;;  %v642_v37 = vpack.c.bf16 (!%p139_p2), %v205_v29, %v202_v26  ;;  %v235_v19 = vshrl.u32 (!%p139_p2), %v234_v18, 7 }
   0xd   : > { %s968_s20 = smov (!%p164_p3, %s554_s20), 15  ;;  %635 = vmatpush1.bf16.msra.mxu0 %v634_v14  ;;  %663 = vmatpush3.bf16.msra.mxu1 %v660_v22  ;;  %v209_v32 = vld [vmem:[%s964_s1 + $0xc8] sm:$0xff]  ;;  %v668_v34 = vpack.c.bf16 %v201_v31, %v198_v30  ;;  %v207_v36 = vld [vmem:[%s964_s1 + $0xb8] sm:$0xff]  ;;  %v208_v39 = vld [vmem:[%s964_s1 + $0xc0] sm:$0xff] }
   0xe   : > { %s555_s28 = sshll.u32 %s968_s20, 3  ;;  %637 = vmatprep.subr.bf16.mxu0 %v636_v16  ;;  %665 = vmatprep.subr.bf16.mxu1 %v664_v27  ;;  %v644_v38 = vpack.c.bf16 %v212_v33, %v209_v32  ;;  %v211_v40 = vld [vmem:[%s964_s1 + $0xd8] sm:$0xff]  ;;  %v218_v42 = vld [vmem:[%s964_s1 + $0x110] sm:$0xff]  ;;  %v672_v43 = vpack.c.bf16 %v207_v36, %v204_v35  ;;  %v213_v46 = vld [vmem:[%s964_s1 + $0xe8] sm:$0xff]  ;;  %v236_v20 = vsub.s32 0, %v235_v19  ;;  %v240_v22 = vsub.s32 1, %v235_v19 }
   0xf   : > { %s824_s19 = scalar_lea.vmem %s963_s0, %s555_s28  ;;  %v215_v41 = vld [vmem:[%s964_s1 + $0xf8] sm:$0xff]  ;;  %v210_v45 = vld [vmem:[%s964_s1 + $0xd0] sm:$0xff]  ;;  %v646_v47 = vpack.c.bf16 %v211_v40, %v208_v39  ;;  %v217_v50 = vld [vmem:[%s964_s1 + $0x108] sm:$0xff] }
  0x10   : > { %v176_v44 = vld [vmem:[%s824_s19] sm:$0xff]  ;;  %v648_v48 = vpack.c.bf16 %v218_v42, %v215_v41  ;;  %v214_v49 = vld [vmem:[%s964_s1 + $0xf0] sm:$0xff]  ;;  %v221_v51 = vld [vmem:[%s964_s1 + $0x128] sm:$0xff]  ;;  %v676_v53 = vpack.c.bf16 %v213_v46, %v210_v45 }
  0x11   : > { %639 = vmatpush1.bf16.msra.mxu0 %v638_v25  ;;  %667 = vmatpush3.bf16.msra.mxu1 %v664_v27  ;;  %v224_v52 = vld [vmem:[%s964_s1 + $0x140] sm:$0xff]  ;;  %v219_v55 = vld [vmem:[%s964_s1 + $0x118] sm:$0xff]  ;;  %v650_v56 = vpack.c.bf16 %v217_v50, %v214_v49  ;;  %v230_v61 = vld [vmem:[%s964_s1 + $0x170] sm:$0xff]  ;;  %v244_v25 = vsub.s32 2, %v235_v19 }
  0x12   : > { %641 = vmatprep.subr.bf16.mxu0 %v640_v28  ;;  %669 = vmatprep.subr.bf16.mxu1 %v668_v34  ;;  %v216_v54 = vld [vmem:[%s964_s1 + $0x100] sm:$0xff]  ;;  %v652_v57 = vpack.c.bf16 %v224_v52, %v221_v51  ;;  %v223_v59 = vld [vmem:[%s964_s1 + $0x138] sm:$0xff]  ;;  %v222_v63 = vld [vmem:[%s964_s1 + $0x130] sm:$0xff] }
  0x13   : > { %616 = vmatprep.mubr.f32.mxu1 %v176_v44  ;;  %v220_v58 = vld [vmem:[%s964_s1 + $0x120] sm:$0xff]  ;;  %v227_v60 = vld [vmem:[%s964_s1 + $0x158] sm:$0xff]  ;;  %v680_v62 = vpack.c.bf16 %v219_v55, %v216_v54  ;;  %v225_v0 = vld [vmem:[%s964_s1 + $0x148] sm:$0xff] }
  0x14   : > { %v654_v1 = vpack.c.bf16 %v223_v59, %v220_v58  ;;  %v656_v2 = vpack.c.bf16 %v230_v61, %v227_v60  ;;  %v226_v3 = vld [vmem:[%s964_s1 + $0x150] sm:$0xff]  ;;  %v229_v4 = vld [vmem:[%s964_s1 + $0x168] sm:$0xff]  ;;  %v684_v5 = vpack.c.bf16 %v225_v0, %v222_v63  ;;  %v228_v6 = vld [vmem:[%s964_s1 + $0x160] sm:$0xff] }
  0x15   : > { %643 = vmatpush1.bf16.msra.mxu0 %v642_v37  ;;  %671 = vmatpush3.bf16.msra.mxu1 %v668_v34  ;;  %v231_v8 = vld [vmem:[%s964_s1 + $0x178] sm:$0xff]  ;;  %v658_v9 = vpack.c.bf16 %v229_v4, %v226_v3  ;;  %v177_v11 = vld [vmem:[%s824_s19 + $0x8] sm:$0xff]  ;;  %v178_v12 = vld [vmem:[%s824_s19 + $0x10] sm:$0xff] }
  0x16   : > { %645 = vmatprep.subr.bf16.mxu0 %v644_v38  ;;  %673 = vmatprep.subr.bf16.mxu1 %v672_v43  ;;  %v688_v10 = vpack.c.bf16 %v231_v8, %v228_v6  ;;  %v179_v13 = vld [vmem:[%s824_s19 + $0x18] sm:$0xff]  ;;  %v180_v14 = vld [vmem:[%s824_s19 + $0x20] sm:$0xff]  ;;  %v181_v15 = vld [vmem:[%s824_s19 + $0x28] sm:$0xff] }
  0x17   : > { %v182_v16 = vld [vmem:[%s824_s19 + $0x30] sm:$0xff]  ;;  %v183_v17 = vld [vmem:[%s824_s19 + $0x38] sm:$0xff]  ;;  %v232_v21 = vld [vmem:[%s965_s2] sm:$0x7]  ;;  %s692_s19 = smul.u32 24, %s968_s20 }
  0x18   : > { %v911_v23 = vrot.slane %v232_v21, %v236_v20  ;;  %v913_v24 = vrot.slane %v232_v21, %v240_v22  ;;  %v245_v29 = vrot.slane %v232_v21, %v244_v25 }
  0x19   : > { %647 = vmatpush1.bf16.msra.mxu0 %v646_v47  ;;  %675 = vmatpush3.bf16.msra.mxu1 %v672_v43  ;;  %s918_s21 = scalar_lea.vmem %s966_s3, %s692_s19 }
  0x1a   : > { %649 = vmatprep.subr.bf16.mxu0 %v648_v48  ;;  %677 = vmatprep.subr.bf16.mxu1 %v676_v53 }
  0x1d   : > { %651 = vmatpush1.bf16.msra.mxu0 %v650_v56  ;;  %679 = vmatpush3.bf16.msra.mxu1 %v676_v53 }
  0x1e   : > { %653 = vmatprep.subr.bf16.mxu0 %v652_v57  ;;  %681 = vmatprep.subr.bf16.mxu1 %v680_v62 }
  0x21   : > { %655 = vmatpush1.bf16.msra.mxu0 %v654_v1  ;;  %683 = vmatpush3.bf16.msra.mxu1 %v680_v62 }
  0x22   : > { %657 = vmatprep.subr.bf16.mxu0 %v656_v2  ;;  %685 = vmatprep.subr.bf16.mxu1 %v684_v5 }
  0x25   : > { %659 = vmatpush1.bf16.msra.mxu0 %v658_v9  ;;  %687 = vmatpush3.bf16.msra.mxu1 %v684_v5 }
  0x26   : > { %689 = vmatprep.subr.bf16.mxu1 %v688_v10 }
  0x28   : > { %314 = vmatmul.mubr.f32.vlgmr.msra.gmra.mrb[0].mxu0 %v176_v44 }
  0x29   : > { %319 = vmatprep.mubr.f32.mxu0 %v710_v7  ;;  %691 = vmatpush3.bf16.msra.mxu1 %v688_v10 }
  0x2c   : > { %320 = vmatmul.mubr.f32.gmra.mrb[2].mxu0 %v177_v11  ;;  %617 = vmatmul.mubr.f32.vlgmr.msra.gmra.mrb[0].mxu1 %v177_v11 }
  0x2d   : > { %325 = vmatprep.mubr.f32.mxu0 %v710_v7  ;;  %619 = vmatprep.mubr.f32.mxu1 %v178_v12 }
  0x30   : > { %326 = vmatmul.mubr.f32.gmra.mrb[4].mxu0 %v178_v12  ;;  %620 = vmatmul.mubr.f32.gmra.mrb[2].mxu1 %v179_v13 }
  0x31   : > { %331 = vmatprep.mubr.f32.mxu0 %v710_v7  ;;  %622 = vmatprep.mubr.f32.mxu1 %v180_v14 }
  0x34   : > { %332 = vmatmul.mubr.f32.gmra.mrb[6].mxu0 %v179_v13  ;;  %623 = vmatmul.mubr.f32.gmra.mrb[4].mxu1 %v181_v15 }
  0x35   : > { %337 = vmatprep.mubr.f32.mxu0 %v710_v7  ;;  %625 = vmatprep.mubr.f32.mxu1 %v182_v16 }
  0x38   : > { %338 = vmatmul.mubr.f32.gmra.mrb[8].mxu0 %v180_v14  ;;  %626 = vmatmul.mubr.f32.gmra.mrb[6].mxu1 %v183_v17 }
  0x39   : > { %343 = vmatprep.mubr.f32.mxu0 %v710_v7 }
  0x3c   : > { %344 = vmatmul.mubr.f32.gmra.mrb[10].mxu0 %v181_v15 }
  0x3d   : > { %349 = vmatprep.mubr.f32.mxu0 %v710_v7 }
  0x40   : > { %350 = vmatmul.mubr.f32.gmra.mrb[12].mxu0 %v182_v16 }
  0x41   : > { %355 = vmatprep.mubr.f32.mxu0 %v710_v7 }
  0x44   : > { %356 = vmatmul.mubr.f32.gmra.mrb[14].mxu0 %v183_v17 }
  0xfb   : > { %v315_v7 = vpop.f32.mrb[0].mxu0 }
  0xfc   : > { %v316_v26 = vadd.f32 %v315_v7, %v911_v23  ;;  %v317_v27 = vpop.f32.mrb[1].mxu0 }
  0xfd   : > { %v318_v28 = vadd.f32 %v317_v27, %v913_v24 }
  0xfe   : > { %467 = vst [vmem:[%s918_s21] sm:$0xff] %v316_v26 }
  0xff   : > { %468 = vst [vmem:[%s918_s21 + $0x8] sm:$0xff] %v318_v28  ;;  %v321_v30 = vpop.f32.mrb[2].mxu0  ;;  %v618_v33 = vpop.f32.mrb[0].mxu1 }
 0x100   : > { %v322_v31 = vadd.f32 %v321_v30, %v911_v23  ;;  %v323_v32 = vpop.f32.mrb[3].mxu0  ;;  %v434_v35 = vadd.f32 %v618_v33, %v245_v29  ;;  %v428_v36 = vpop.f32.mrb[1].mxu1 }
 0x101   : > { %v324_v34 = vadd.f32 %v323_v32, %v913_v24  ;;  %v429_v37 = vadd.f32 %v428_v36, %v245_v29 }
 0x102   : > { %470 = vst [vmem:[%s918_s21 + $0x18] sm:$0xff] %v322_v31  ;;  %472 = vst [vmem:[%s918_s21 + $0x28] sm:$0xff] %v434_v35 }
 0x103   : > { %471 = vst [vmem:[%s918_s21 + $0x20] sm:$0xff] %v324_v34  ;;  %v327_v38 = vpop.f32.mrb[4].mxu0  ;;  %469 = vst [vmem:[%s918_s21 + $0x10] sm:$0xff] %v429_v37  ;;  %v621_v41 = vpop.f32.mrb[2].mxu1 }
 0x104   : > { %v328_v39 = vadd.f32 %v327_v38, %v911_v23  ;;  %v329_v40 = vpop.f32.mrb[5].mxu0  ;;  %v444_v43 = vadd.f32 %v621_v41, %v245_v29  ;;  %v438_v44 = vpop.f32.mrb[3].mxu1 }
 0x105   : > { %v330_v42 = vadd.f32 %v329_v40, %v913_v24  ;;  %v439_v45 = vadd.f32 %v438_v44, %v245_v29 }
 0x106   : > { %473 = vst [vmem:[%s918_s21 + $0x30] sm:$0xff] %v328_v39  ;;  %478 = vst [vmem:[%s918_s21 + $0x58] sm:$0xff] %v444_v43 }
 0x107   : > { %474 = vst [vmem:[%s918_s21 + $0x38] sm:$0xff] %v330_v42  ;;  %v333_v46 = vpop.f32.mrb[6].mxu0  ;;  %475 = vst [vmem:[%s918_s21 + $0x40] sm:$0xff] %v439_v45  ;;  %v624_v49 = vpop.f32.mrb[4].mxu1 }
 0x108   : > { %v334_v47 = vadd.f32 %v333_v46, %v911_v23  ;;  %v335_v48 = vpop.f32.mrb[7].mxu0  ;;  %v454_v51 = vadd.f32 %v624_v49, %v245_v29  ;;  %v448_v52 = vpop.f32.mrb[5].mxu1 }
 0x109   : > { %v336_v50 = vadd.f32 %v335_v48, %v913_v24  ;;  %v449_v53 = vadd.f32 %v448_v52, %v245_v29 }
 0x10a   : > { %476 = vst [vmem:[%s918_s21 + $0x48] sm:$0xff] %v334_v47  ;;  %484 = vst [vmem:[%s918_s21 + $0x88] sm:$0xff] %v454_v51 }
 0x10b   : > { %477 = vst [vmem:[%s918_s21 + $0x50] sm:$0xff] %v336_v50  ;;  %v339_v54 = vpop.f32.mrb[8].mxu0  ;;  %481 = vst [vmem:[%s918_s21 + $0x70] sm:$0xff] %v449_v53  ;;  %v627_v57 = vpop.f32.mrb[6].mxu1 }
 0x10c   : > { %v340_v55 = vadd.f32 %v339_v54, %v911_v23  ;;  %v341_v56 = vpop.f32.mrb[9].mxu0  ;;  %v464_v59 = vadd.f32 %v627_v57, %v245_v29  ;;  %v458_v60 = vpop.f32.mrb[7].mxu1 }
 0x10d   : > { %v342_v58 = vadd.f32 %v341_v56, %v913_v24  ;;  %v459_v61 = vadd.f32 %v458_v60, %v245_v29 }
 0x10e   : > { %479 = vst [vmem:[%s918_s21 + $0x60] sm:$0xff] %v340_v55  ;;  %490 = vst [vmem:[%s918_s21 + $0xb8] sm:$0xff] %v464_v59 }
 0x10f   : > { %480 = vst [vmem:[%s918_s21 + $0x68] sm:$0xff] %v342_v58  ;;  %v345_v62 = vpop.f32.mrb[10].mxu0  ;;  %487 = vst [vmem:[%s918_s21 + $0xa0] sm:$0xff] %v459_v61 }
 0x110   : > { %v346_v63 = vadd.f32 %v345_v62, %v911_v23  ;;  %v347_v0 = vpop.f32.mrb[11].mxu0 }
 0x111   : > { %v348_v1 = vadd.f32 %v347_v0, %v913_v24 }
 0x112   : > { %482 = vst [vmem:[%s918_s21 + $0x78] sm:$0xff] %v346_v63 }
 0x113   : > { %483 = vst [vmem:[%s918_s21 + $0x80] sm:$0xff] %v348_v1  ;;  %v351_v2 = vpop.f32.mrb[12].mxu0 }
 0x114   : > { %v352_v3 = vadd.f32 %v351_v2, %v911_v23  ;;  %v353_v4 = vpop.f32.mrb[13].mxu0 }
 0x115   : > { %v354_v5 = vadd.f32 %v353_v4, %v913_v24 }
 0x116   : > { %485 = vst [vmem:[%s918_s21 + $0x90] sm:$0xff] %v352_v3 }
 0x117   : > { %486 = vst [vmem:[%s918_s21 + $0x98] sm:$0xff] %v354_v5  ;;  %v357_v6 = vpop.f32.mrb[14].mxu0 }
 0x118   : > { %v358_v8 = vadd.f32 %v357_v6, %v911_v23  ;;  %v359_v9 = vpop.f32.mrb[15].mxu0 }
 0x119   : > { %v360_v10 = vadd.f32 %v359_v9, %v913_v24 }
 0x11a   : > { %488 = vst [vmem:[%s918_s21 + $0xa8] sm:$0xff] %v358_v8 }
 0x11b   : > { %489 = vst [vmem:[%s918_s21 + $0xb0] sm:$0xff] %v360_v10 }
 0x11c PF: > { %s13_s12 = sadd.s32 1, %s708_s12  }
 0x11d   : > { %p10_p4 = scmp.ge.s32.totalorder %s13_s12, 4  }
 0x11f   :  { %12 = sbr.rel (!%p10_p4) target bundleno = 1 (0x1), region = 62 }

// kernel: image_encoder_forward.9
= control target key start
LH: loop header
LB: loop body
LE: loop exit
PB: predicated region body
PF: predicated region fallthrough
CT: control target
= control target key end

     0   :  { %s2723_s12 = smov 0   ;;  %s3382_s0 = inlined_call_operand.vmem [shape: f32[2,4,64,32], index: 0, kind: input, shape index: {}]   ;;  %s3383_s1 = inlined_call_operand.vmem [shape: f32[2,4,64,32], index: 1, kind: input, shape index: {}]   ;;  %s3384_s2 = inlined_call_operand.vmem [shape: f32[2,4,64,32], index: 2, kind: input, shape index: {}]   ;;  %s3385_s3 = inlined_call_operand.vmem [shape: f32[2,4,64,32], index: 3, kind: output, shape index: {}]  }
   0x1 LB: > { %s1932_s13 = sadd.s32 4294967295, %s2701_s12   ;;  %p1936_p0 = scmp.ge.s32.totalorder %s2701_s12, 1  ;;  %s2701_s12 = sphi %s2723_s12, %s13_s12  }
   0x2   : > { %p157_p1 = scmp.lt.s32.totalorder %s2701_s12, 3 }
   0x4   : > { %p158_p2 = pnand %p1936_p0, %p157_p1 }
   0x5   : > { %p191_p3 = scmp.lt.s32.totalorder (!%p158_p2), %s1932_s13, 1  ;;  %vm307_vm0 = vcmask (!%p158_p2), 261120   ;;  %vm952_vm2 = vcmask (!%p158_p2), 523264  }
   0x6   : > { %161 = sbr.rel (%p158_p2) target bundleno = 857 (0x359), region = 32  ;;  %vm2741_vm1 = vmpackc.low (!%p158_p2), %vm307_vm0, %vm307_vm0 }
   0xd   : > { %s3389_s13 = smov (!%p191_p3, %s1932_s13), 1 }
   0xe   : > { %s2731_s14 = sshll.u32 %s3389_s13, 8 }
   0xf   : > { %s2737_s17 = scalar_lea.vmem %s3383_s1, %s2731_s14  ;;  %s2757_s20 = scalar_lea.vmem %s3382_s0, %s2731_s14 }
  0x10   : > { %v243_v1 = vld [vmem:[%s2737_s17] sm:$0xff]  ;;  %v244_v2 = vld [vmem:[%s2737_s17 + $0x8] sm:$0xff]  ;;  %v245_v6 = vld [vmem:[%s2737_s17 + $0x10] sm:$0xff]  ;;  %s3089_s23 = scalar_lea.vmem %s3384_s2, %s2731_s14  ;;  %s3313_s26 = scalar_lea.vmem %s3385_s3, %s2731_s14 }
  0x11   : > { %v251_v3 = vld [vmem:[%s2737_s17 + $0x40] sm:$0xff]  ;;  %v2399_v4 = vpack.c.bf16 %v244_v2, %v243_v1  ;;  %v252_v5 = vld [vmem:[%s2737_s17 + $0x48] sm:$0xff]  ;;  %v246_v7 = vld [vmem:[%s2737_s17 + $0x18] sm:$0xff] }
  0x12   : > { %v2423_v8 = vpack.c.bf16 %v252_v5, %v251_v3  ;;  %v2405_v9 = vpack.c.bf16 %v246_v7, %v245_v6  ;;  %v253_v10 = vld [vmem:[%s2737_s17 + $0x50] sm:$0xff]  ;;  %v254_v11 = vld [vmem:[%s2737_s17 + $0x58] sm:$0xff]  ;;  %v211_v13 = vld [vmem:[%s2757_s20] sm:$0xff] }
  0x13   : > { %2401 = vmatprep.subr.msk.bf16.mxu0 %vm2741_vm1, %v2399_v4  ;;  %v2429_v12 = vpack.c.bf16 %v254_v11, %v253_v10  ;;  %v247_v14 = vld [vmem:[%s2737_s17 + $0x20] sm:$0xff]  ;;  %v248_v15 = vld [vmem:[%s2737_s17 + $0x28] sm:$0xff]  ;;  %2191 = vmatprep.mubr.msk.f32.mxu0 %vm307_vm0, %v211_v13  ;;  %v249_v21 = vld [vmem:[%s2737_s17 + $0x30] sm:$0xff] }
  0x14   : > { %2425 = vmatprep.subr.msk.bf16.mxu1 %vm2741_vm1, %v2423_v8  ;;  %2404 = vmatpush3.bf16.xpose.msk.msra.mxu0 %vm2741_vm1, %v2399_v4  ;;  %v219_v16 = vld [vmem:[%s2757_s20 + $0x40] sm:$0xff]  ;;  %v256_v18 = vld [vmem:[%s2737_s17 + $0x68] sm:$0xff]  ;;  %v2411_v19 = vpack.c.bf16 %v248_v15, %v247_v14  ;;  %v250_v22 = vld [vmem:[%s2737_s17 + $0x38] sm:$0xff] }
  0x15   : > { %2428 = vmatpush3.bf16.xpose.msk.msra.mxu1 %vm2741_vm1, %v2423_v8  ;;  %2407 = vmatprep.subr.msk.bf16.mxu0 %vm2741_vm1, %v2405_v9  ;;  %v255_v17 = vld [vmem:[%s2737_s17 + $0x60] sm:$0xff]  ;;  %v257_v23 = vld [vmem:[%s2737_s17 + $0x70] sm:$0xff]  ;;  %v258_v24 = vld [vmem:[%s2737_s17 + $0x78] sm:$0xff]  ;;  %v2417_v25 = vpack.c.bf16 %v250_v22, %v249_v21 }
  0x16   : > { %2431 = vmatprep.subr.msk.bf16.mxu1 %vm2741_vm1, %v2429_v12  ;;  %2219 = vmatprep.mubr.msk.f32.mxu1 %vm307_vm0, %v219_v16  ;;  %v2435_v20 = vpack.c.bf16 %v256_v18, %v255_v17  ;;  %v2441_v26 = vpack.c.bf16 %v258_v24, %v257_v23  ;;  %v259_v27 = vld [vmem:[%s2737_s17 + $0x80] sm:$0xff]  ;;  %v260_v28 = vld [vmem:[%s2737_s17 + $0x88] sm:$0xff]  ;;  %v269_v33 = vld [vmem:[%s2737_s17 + $0xd0] sm:$0xff] }
  0x17   : > { %v267_v29 = vld [vmem:[%s2737_s17 + $0xc0] sm:$0xff]  ;;  %v268_v30 = vld [vmem:[%s2737_s17 + $0xc8] sm:$0xff]  ;;  %v2447_v31 = vpack.c.bf16 %v260_v28, %v259_v27  ;;  %v270_v34 = vld [vmem:[%s2737_s17 + $0xd8] sm:$0xff] }
  0x18   : > { %v2471_v32 = vpack.c.bf16 %v268_v30, %v267_v29  ;;  %v212_v35 = vld [vmem:[%s2757_s20 + $0x8] sm:$0xff]  ;;  %v261_v36 = vld [vmem:[%s2737_s17 + $0x90] sm:$0xff]  ;;  %v262_v37 = vld [vmem:[%s2737_s17 + $0x98] sm:$0xff]  ;;  %v2477_v40 = vpack.c.bf16 %v270_v34, %v269_v33 }
  0x19   : > { %v220_v38 = vld [vmem:[%s2757_s20 + $0x48] sm:$0xff]  ;;  %v221_v39 = vld [vmem:[%s2757_s20 + $0x50] sm:$0xff]  ;;  %v2453_v42 = vpack.c.bf16 %v262_v37, %v261_v36  ;;  %v214_v43 = vld [vmem:[%s2757_s20 + $0x18] sm:$0xff] }
  0x1a   : > { %v213_v41 = vld [vmem:[%s2757_s20 + $0x10] sm:$0xff]  ;;  %v222_v44 = vld [vmem:[%s2757_s20 + $0x58] sm:$0xff]  ;;  %v215_v45 = vld [vmem:[%s2757_s20 + $0x20] sm:$0xff] }
  0x1b   : > { %v223_v46 = vld [vmem:[%s2757_s20 + $0x60] sm:$0xff]  ;;  %v264_v48 = vld [vmem:[%s2737_s17 + $0xa8] sm:$0xff]  ;;  %v225_v55 = vld [vmem:[%s2757_s20 + $0x70] sm:$0xff] }
  0x1c   : > { %2410 = vmatpush3.bf16.xpose.msk.msra.mxu0 %vm2741_vm1, %v2405_v9  ;;  %v263_v47 = vld [vmem:[%s2737_s17 + $0xa0] sm:$0xff]  ;;  %v272_v50 = vld [vmem:[%s2737_s17 + $0xe8] sm:$0xff]  ;;  %v217_v56 = vld [vmem:[%s2757_s20 + $0x30] sm:$0xff] }
  0x1d   : > { %2434 = vmatpush3.bf16.xpose.msk.msra.mxu1 %vm2741_vm1, %v2429_v12  ;;  %2413 = vmatprep.subr.msk.bf16.mxu0 %vm2741_vm1, %v2411_v19  ;;  %v271_v49 = vld [vmem:[%s2737_s17 + $0xe0] sm:$0xff]  ;;  %v216_v51 = vld [vmem:[%s2757_s20 + $0x28] sm:$0xff]  ;;  %v2459_v53 = vpack.c.bf16 %v264_v48, %v263_v47  ;;  %v226_v57 = vld [vmem:[%s2757_s20 + $0x78] sm:$0xff] }
  0x1e   : > { %2437 = vmatprep.subr.msk.bf16.mxu1 %vm2741_vm1, %v2435_v20  ;;  %v224_v52 = vld [vmem:[%s2757_s20 + $0x68] sm:$0xff]  ;;  %v2483_v54 = vpack.c.bf16 %v272_v50, %v271_v49  ;;  %v218_v58 = vld [vmem:[%s2757_s20 + $0x38] sm:$0xff]  ;;  %v265_v59 = vld [vmem:[%s2737_s17 + $0xb0] sm:$0xff] }
  0x1f   : > { %v266_v60 = vld [vmem:[%s2737_s17 + $0xb8] sm:$0xff]  ;;  %v235_v61 = vld [vmem:[%s2757_s20 + $0xc0] sm:$0xff]  ;;  %v273_v63 = vld [vmem:[%s2737_s17 + $0xf0] sm:$0xff] }
  0x20   : > { %v227_v62 = vld [vmem:[%s2757_s20 + $0x80] sm:$0xff]  ;;  %v274_v1 = vld [vmem:[%s2737_s17 + $0xf8] sm:$0xff]  ;;  %v2465_v2 = vpack.c.bf16 %v266_v60, %v265_v59  ;;  %v228_v4 = vld [vmem:[%s2757_s20 + $0x88] sm:$0xff] }
  0x21   : > { %v2489_v3 = vpack.c.bf16 %v274_v1, %v273_v63  ;;  %v236_v5 = vld [vmem:[%s2757_s20 + $0xc8] sm:$0xff]  ;;  %v229_v6 = vld [vmem:[%s2757_s20 + $0x90] sm:$0xff]  ;;  %v230_v8 = vld [vmem:[%s2757_s20 + $0x98] sm:$0xff] }
  0x22   : > { %v237_v7 = vld [vmem:[%s2757_s20 + $0xd0] sm:$0xff]  ;;  %v238_v0 = vld [vmem:[%s2757_s20 + $0xd8] sm:$0xff]  ;;  %v231_v9 = vld [vmem:[%s2757_s20 + $0xa0] sm:$0xff] }
  0x23   : > { %v239_v10 = vld [vmem:[%s2757_s20 + $0xe0] sm:$0xff]  ;;  %v232_v11 = vld [vmem:[%s2757_s20 + $0xa8] sm:$0xff]  ;;  %v233_v13 = vld [vmem:[%s2757_s20 + $0xb0] sm:$0xff] }
  0x24   : > { %2416 = vmatpush3.bf16.xpose.msk.msra.mxu0 %vm2741_vm1, %v2411_v19  ;;  %v240_v12 = vld [vmem:[%s2757_s20 + $0xe8] sm:$0xff]  ;;  %v241_v14 = vld [vmem:[%s2757_s20 + $0xf0] sm:$0xff]  ;;  %v234_v15 = vld [vmem:[%s2757_s20 + $0xb8] sm:$0xff] }
  0x25   : > { %2440 = vmatpush3.bf16.xpose.msk.msra.mxu1 %vm2741_vm1, %v2435_v20  ;;  %2419 = vmatprep.subr.msk.bf16.mxu0 %vm2741_vm1, %v2417_v25  ;;  %v242_v16 = vld [vmem:[%s2757_s20 + $0xf8] sm:$0xff] }
  0x26   : > { %2443 = vmatprep.subr.msk.bf16.mxu1 %vm2741_vm1, %v2441_v26 }
  0x2c   : > { %2422 = vmatpush3.bf16.xpose.msk.msra.mxu0 %vm2741_vm1, %v2417_v25 }
  0x2d   : > { %2446 = vmatpush3.bf16.xpose.msk.msra.mxu1 %vm2741_vm1, %v2441_v26  ;;  %2449 = vmatprep.subr.msk.bf16.mxu0 %vm2741_vm1, %v2447_v31 }
  0x2e   : > { %2473 = vmatprep.subr.msk.bf16.mxu1 %vm2741_vm1, %v2471_v32 }
  0x33   : > { %2192 = vmatmul.mubr.msk.f32.vlgmr.msra.gmra.mrb[0].mxu0 %vm307_vm0, %v212_v35 }
  0x34   : > { %2220 = vmatmul.mubr.msk.f32.vlgmr.msra.gmra.mrb[0].mxu1 %vm307_vm0, %v220_v38  ;;  %2452 = vmatpush3.bf16.xpose.msk.msra.mxu0 %vm2741_vm1, %v2447_v31 }
  0x35   : > { %2476 = vmatpush3.bf16.xpose.msk.msra.mxu1 %vm2741_vm1, %v2471_v32  ;;  %2222 = vmatprep.mubr.msk.f32.mxu1 %vm307_vm0, %v221_v39 }
  0x36   : > { %2194 = vmatprep.mubr.msk.f32.mxu0 %vm307_vm0, %v213_v41  ;;  %2479 = vmatprep.subr.msk.bf16.mxu1 %vm2741_vm1, %v2477_v40 }
  0x37   : > { %2195 = vmatmul.mubr.msk.f32.gmra.mrb[2].mxu0 %vm307_vm0, %v214_v43  ;;  %2455 = vmatprep.subr.msk.bf16.mxu0 %vm2741_vm1, %v2453_v42 }
  0x38   : > { %2223 = vmatmul.mubr.msk.f32.gmra.mrb[2].mxu1 %vm307_vm0, %v222_v44  ;;  %2197 = vmatprep.mubr.msk.f32.mxu0 %vm307_vm0, %v215_v45 }
  0x39   : > { %2225 = vmatprep.mubr.msk.f32.mxu1 %vm307_vm0, %v223_v46 }
  0x3b   : > { %2198 = vmatmul.mubr.msk.f32.gmra.mrb[4].mxu0 %vm307_vm0, %v216_v51 }
  0x3c   : > { %2458 = vmatpush3.bf16.xpose.msk.msra.mxu0 %vm2741_vm1, %v2453_v42  ;;  %2226 = vmatmul.mubr.msk.f32.gmra.mrb[4].mxu1 %vm307_vm0, %v224_v52 }
  0x3d   : > { %2482 = vmatpush3.bf16.xpose.msk.msra.mxu1 %vm2741_vm1, %v2477_v40  ;;  %2461 = vmatprep.subr.msk.bf16.mxu0 %vm2741_vm1, %v2459_v53 }
  0x3e   : > { %2485 = vmatprep.subr.msk.bf16.mxu1 %vm2741_vm1, %v2483_v54  ;;  %2228 = vmatprep.mubr.msk.f32.mxu1 %vm307_vm0, %v225_v55 }
  0x3f   : > { %2200 = vmatprep.mubr.msk.f32.mxu0 %vm307_vm0, %v217_v56 }
  0x40   : > { %2229 = vmatmul.mubr.msk.f32.gmra.mrb[6].mxu1 %vm307_vm0, %v226_v57  ;;  %2201 = vmatmul.mubr.msk.f32.gmra.mrb[6].mxu0 %vm307_vm0, %v218_v58 }
  0x41   : > { %2275 = vmatprep.mubr.msk.f32.mxu1 %vm307_vm0, %v235_v61  ;;  %2247 = vmatprep.mubr.msk.f32.mxu0 %vm307_vm0, %v227_v62 }
  0x44   : > { %2464 = vmatpush3.bf16.xpose.msk.msra.mxu0 %vm2741_vm1, %v2459_v53 }
  0x45   : > { %2488 = vmatpush3.bf16.xpose.msk.msra.mxu1 %vm2741_vm1, %v2483_v54  ;;  %2467 = vmatprep.subr.msk.bf16.mxu0 %vm2741_vm1, %v2465_v2 }
  0x46   : > { %2491 = vmatprep.subr.msk.bf16.mxu1 %vm2741_vm1, %v2489_v3 }
  0x4c   : > { %2470 = vmatpush3.bf16.xpose.msk.msra.mxu0 %vm2741_vm1, %v2465_v2 }
  0x4d   : > { %2494 = vmatpush3.bf16.xpose.msk.msra.mxu1 %vm2741_vm1, %v2489_v3 }
  0x53   : > { %2248 = vmatmul.mubr.msk.f32.vlgmr.msra.gmra.mrb[8].mxu0 %vm307_vm0, %v228_v4 }
  0x54   : > { %2276 = vmatmul.mubr.msk.f32.vlgmr.msra.gmra.mrb[8].mxu1 %vm307_vm0, %v236_v5  ;;  %2250 = vmatprep.mubr.msk.f32.mxu0 %vm307_vm0, %v229_v6 }
  0x55   : > { %2278 = vmatprep.mubr.msk.f32.mxu1 %vm307_vm0, %v237_v7 }
  0x57   : > { %2251 = vmatmul.mubr.msk.f32.gmra.mrb[10].mxu0 %vm307_vm0, %v230_v8 }
  0x58   : > { %2279 = vmatmul.mubr.msk.f32.gmra.mrb[10].mxu1 %vm307_vm0, %v238_v0  ;;  %2253 = vmatprep.mubr.msk.f32.mxu0 %vm307_vm0, %v231_v9 }
  0x59   : > { %2281 = vmatprep.mubr.msk.f32.mxu1 %vm307_vm0, %v239_v10 }
  0x5b   : > { %2254 = vmatmul.mubr.msk.f32.gmra.mrb[12].mxu0 %vm307_vm0, %v232_v11 }
  0x5c   : > { %2282 = vmatmul.mubr.msk.f32.gmra.mrb[12].mxu1 %vm307_vm0, %v240_v12  ;;  %2256 = vmatprep.mubr.msk.f32.mxu0 %vm307_vm0, %v233_v13 }
  0x5d   : > { %2284 = vmatprep.mubr.msk.f32.mxu1 %vm307_vm0, %v241_v14 }
  0x5f   : > { %2257 = vmatmul.mubr.msk.f32.gmra.mrb[14].mxu0 %vm307_vm0, %v234_v15 }
  0x60   : > { %2285 = vmatmul.mubr.msk.f32.gmra.mrb[14].mxu1 %vm307_vm0, %v242_v16 }
 0x106   : > { %v2193_v17 = vpop.f32.mrb[0].mxu0 }
 0x107   : > { %v2911_v18 = vmul.f32 0.17677669, %v2193_v17  ;;  %v422_v19 = vpop.f32.mrb[1].mxu0  ;;  %v2221_v20 = vpop.f32.mrb[0].mxu1 }
 0x108   : > { %v2913_v21 = vmul.f32 0.17677669, %v422_v19  ;;  %v2915_v22 = vmul.f32 0.17677669, %v2221_v20  ;;  %v575_v23 = vpop.f32.mrb[1].mxu1 }
 0x109   : > { %v2917_v24 = vmul.f32 0.17677669, %v575_v23  ;;  %v956_v25 = vsel %vm952_vm2, %v2911_v18, -inf }
 0x10a   : > { %957 = vmax.xlane.f32.xlu1 %v956_v25  ;;  %v953_v26 = vsel %vm952_vm2, %v2913_v21, -inf  ;;  %v2196_v27 = vpop.f32.mrb[2].mxu0  ;;  %v980_v29 = vsel %vm952_vm2, %v2915_v22, -inf }
 0x10b   : > { %954 = vmax.xlane.f32.xlu0 %v953_v26  ;;  %v2224_v28 = vpop.f32.mrb[2].mxu1  ;;  %v432_v30 = vpop.f32.mrb[3].mxu0  ;;  %v977_v32 = vsel %vm952_vm2, %v2917_v24, -inf  ;;  %v2929_v33 = vmul.f32 0.17677669, %v2196_v27 }
 0x10c   : > { %v2925_v31 = vmul.f32 0.17677669, %v2224_v28  ;;  %v585_v34 = vpop.f32.mrb[3].mxu1  ;;  %v2935_v40 = vmul.f32 0.17677669, %v432_v30 }
 0x10d   : > { %v2931_v36 = vmul.f32 0.17677669, %v585_v34  ;;  %v962_v41 = vsel %vm952_vm2, %v2929_v33, -inf }
 0x10e   : > { %981 = vmax.xlane.f32.xlu1 %v980_v29  ;;  %v2199_v35 = vpop.f32.mrb[4].mxu0  ;;  %v986_v37 = vsel %vm952_vm2, %v2925_v31, -inf  ;;  %v959_v47 = vsel %vm952_vm2, %v2935_v40, -inf }
 0x10f   : > { %978 = vmax.xlane.f32.xlu0 %v977_v32  ;;  %v2227_v38 = vpop.f32.mrb[4].mxu1  ;;  %v442_v39 = vpop.f32.mrb[5].mxu0  ;;  %v983_v44 = vsel %vm952_vm2, %v2931_v36, -inf  ;;  %v2945_v48 = vmul.f32 0.17677669, %v2199_v35 }
 0x110   : > { %v595_v42 = vpop.f32.mrb[5].mxu1  ;;  %v2939_v43 = vmul.f32 0.17677669, %v2227_v38  ;;  %v2951_v53 = vmul.f32 0.17677669, %v442_v39 }
 0x111   : > { %v2947_v51 = vmul.f32 0.17677669, %v595_v42  ;;  %v968_v54 = vsel %vm952_vm2, %v2945_v48, -inf }
 0x112   : > { %987 = vmax.xlane.f32.xlu1 %v986_v37  ;;  %v992_v52 = vsel %vm952_vm2, %v2939_v43, -inf  ;;  %v965_v57 = vsel %vm952_vm2, %v2951_v53, -inf }
 0x113   : > { %963 = vmax.xlane.f32.xlu0 %v962_v41  ;;  %v2230_v45 = vpop.f32.mrb[6].mxu1  ;;  %v2202_v46 = vpop.f32.mrb[6].mxu0  ;;  %v989_v56 = vsel %vm952_vm2, %v2947_v51, -inf }
 0x114   : > { %v605_v49 = vpop.f32.mrb[7].mxu1  ;;  %v452_v50 = vpop.f32.mrb[7].mxu0  ;;  %v2955_v55 = vmul.f32 0.17677669, %v2230_v45  ;;  %v2961_v58 = vmul.f32 0.17677669, %v2202_v46 }
 0x115   : > { %v2963_v59 = vmul.f32 0.17677669, %v605_v49  ;;  %v2967_v61 = vmul.f32 0.17677669, %v452_v50 }
 0x116   : > { %984 = vmax.xlane.f32.xlu1 %v983_v44  ;;  %v998_v60 = vsel %vm952_vm2, %v2955_v55, -inf  ;;  %v974_v62 = vsel %vm952_vm2, %v2961_v58, -inf }
 0x117   : > { %960 = vmax.xlane.f32.xlu0 %v959_v47  ;;  %v995_v63 = vsel %vm952_vm2, %v2963_v59, -inf  ;;  %v971_v1 = vsel %vm952_vm2, %v2967_v61, -inf }
 0x11a   : > { %993 = vmax.xlane.f32.xlu1 %v992_v52 }
 0x11b   : > { %969 = vmax.xlane.f32.xlu0 %v968_v54 }
 0x11e   : > { %990 = vmax.xlane.f32.xlu1 %v989_v56 }
 0x11f   : > { %966 = vmax.xlane.f32.xlu0 %v965_v57 }
 0x122   : > { %999 = vmax.xlane.f32.xlu1 %v998_v60 }
 0x123   : > { %975 = vmax.xlane.f32.xlu0 %v974_v62 }
 0x126   : > { %996 = vmax.xlane.f32.xlu1 %v995_v63  ;;  %v2249_v2 = vpop.f32.mrb[8].mxu0 }
 0x127   : > { %v2277_v3 = vpop.f32.mrb[8].mxu1  ;;  %972 = vmax.xlane.f32.xlu0 %v971_v1  ;;  %v2975_v4 = vmul.f32 0.17677669, %v2249_v2  ;;  %v728_v5 = vpop.f32.mrb[9].mxu0 }
 0x128   : > { %v2977_v6 = vmul.f32 0.17677669, %v2277_v3  ;;  %v881_v7 = vpop.f32.mrb[9].mxu1  ;;  %v2979_v8 = vmul.f32 0.17677669, %v728_v5 }
 0x129   : > { %v2981_v0 = vmul.f32 0.17677669, %v881_v7  ;;  %v1004_v9 = vsel %vm952_vm2, %v2975_v4, -inf }
 0x12a   : > { %v1028_v10 = vsel %vm952_vm2, %v2977_v6, -inf  ;;  %v2252_v11 = vpop.f32.mrb[10].mxu0  ;;  %v1001_v13 = vsel %vm952_vm2, %v2979_v8, -inf }
 0x12b   : > { %1029 = vmax.xlane.f32.xlu1 %v1028_v10  ;;  %1005 = vmax.xlane.f32.xlu0 %v1004_v9  ;;  %v2280_v12 = vpop.f32.mrb[10].mxu1  ;;  %v738_v14 = vpop.f32.mrb[11].mxu0  ;;  %v1025_v16 = vsel %vm952_vm2, %v2981_v0, -inf  ;;  %v2993_v17 = vmul.f32 0.17677669, %v2252_v11 }
 0x12c   : > { %v2989_v15 = vmul.f32 0.17677669, %v2280_v12  ;;  %v891_v19 = vpop.f32.mrb[11].mxu1  ;;  %v2995_v23 = vmul.f32 0.17677669, %v738_v14 }
 0x12d   : > { %v2997_v27 = vmul.f32 0.17677669, %v891_v19  ;;  %v1010_v29 = vsel %vm952_vm2, %v2993_v17, -inf }
 0x12e   : > { %v2255_v20 = vpop.f32.mrb[12].mxu0  ;;  %v1034_v28 = vsel %vm952_vm2, %v2989_v15, -inf  ;;  %v1007_v34 = vsel %vm952_vm2, %v2995_v23, -inf }
 0x12f   : > { %1026 = vmax.xlane.f32.xlu1 %v1025_v16  ;;  %1002 = vmax.xlane.f32.xlu0 %v1001_v13  ;;  %v2283_v25 = vpop.f32.mrb[12].mxu1  ;;  %v748_v26 = vpop.f32.mrb[13].mxu0  ;;  %v1031_v39 = vsel %vm952_vm2, %v2997_v27, -inf  ;;  %v3009_v41 = vmul.f32 0.17677669, %v2255_v20 }
 0x130   : > { %v901_v30 = vpop.f32.mrb[13].mxu1  ;;  %v3005_v38 = vmul.f32 0.17677669, %v2283_v25  ;;  %v3015_v46 = vmul.f32 0.17677669, %v748_v26 }
 0x131   : > { %v3011_v44 = vmul.f32 0.17677669, %v901_v30  ;;  %v1016_v47 = vsel %vm952_vm2, %v3009_v41, -inf }
 0x132   : > { %v2258_v32 = vpop.f32.mrb[14].mxu0  ;;  %v1040_v45 = vsel %vm952_vm2, %v3005_v38, -inf  ;;  %v1013_v52 = vsel %vm952_vm2, %v3015_v46, -inf }
 0x133   : > { %1035 = vmax.xlane.f32.xlu1 %v1034_v28  ;;  %1011 = vmax.xlane.f32.xlu0 %v1010_v29  ;;  %v2286_v35 = vpop.f32.mrb[14].mxu1  ;;  %v758_v37 = vpop.f32.mrb[15].mxu0  ;;  %v1037_v50 = vsel %vm952_vm2, %v3011_v44, -inf  ;;  %v3033_v62 = vmul.f32 0.17677669, %v2258_v32 }
 0x134   : > { %v911_v42 = vpop.f32.mrb[15].mxu1  ;;  %v3025_v54 = vmul.f32 0.17677669, %v758_v37  ;;  %v3027_v56 = vmul.f32 0.17677669, %v2286_v35 }
 0x135   : > { %v3019_v49 = vmul.f32 0.17677669, %v911_v42  ;;  %v1022_v1 = vsel %vm952_vm2, %v3033_v62, -inf }
 0x136   : > { %v1019_v60 = vsel %vm952_vm2, %v3025_v54, -inf  ;;  %v1046_v63 = vsel %vm952_vm2, %v3027_v56, -inf }
 0x137   : > { %1032 = vmax.xlane.f32.xlu1 %v1031_v39  ;;  %1008 = vmax.xlane.f32.xlu0 %v1007_v34  ;;  %v1043_v57 = vsel %vm952_vm2, %v3019_v49, -inf }
 0x13b   : > { %1041 = vmax.xlane.f32.xlu1 %v1040_v45  ;;  %1017 = vmax.xlane.f32.xlu0 %v1016_v47 }
 0x13f   : > { %1038 = vmax.xlane.f32.xlu1 %v1037_v50  ;;  %1014 = vmax.xlane.f32.xlu0 %v1013_v52 }
 0x143   : > { %1044 = vmax.xlane.f32.xlu1 %v1043_v57  ;;  %1020 = vmax.xlane.f32.xlu0 %v1019_v60 }
 0x147   : > { %1047 = vmax.xlane.f32.xlu1 %v1046_v63  ;;  %1023 = vmax.xlane.f32.xlu0 %v1022_v1 }
 0x197   : > { %v958_v2 = vpop.xlane.xlu1 %957 }
 0x198   : > { %v1050_v3 = vsub.f32 %v2911_v18, %v958_v2  ;;  %v955_v5 = vpop.xlane.xlu0 %954 }
 0x199   : > { %v1049_v7 = vsub.f32 %v2913_v21, %v955_v5 }
 0x19a   : > { %v1083_v9 = vmul.f32 1.442695, %v1050_v3 }
 0x19b   : > { %v1081_v10 = vmul.f32 1.442695, %v1049_v7  ;;  %v982_v11 = vpop.xlane.xlu1 %981 }
 0x19c   : > { %2567 = vpow2.f32 %v1083_v9  ;;  %v1058_v12 = vsub.f32 %v2915_v22, %v982_v11  ;;  %v979_v13 = vpop.xlane.xlu0 %978 }
 0x19d   : > { %v1057_v14 = vsub.f32 %v2917_v24, %v979_v13  ;;  %2569 = vpow2.f32 %v1081_v10 }
 0x19e   : > { %v1099_v16 = vmul.f32 1.442695, %v1058_v12 }
 0x19f   : > { %v1097_v19 = vmul.f32 1.442695, %v1057_v14  ;;  %v988_v20 = vpop.xlane.xlu1 %987 }
 0x1a0   : > { %2571 = vpow2.f32 %v1099_v16  ;;  %v1060_v25 = vsub.f32 %v2925_v31, %v988_v20  ;;  %v964_v18 = vpop.xlane.xlu0 %963 }
 0x1a1   : > { %v1052_v26 = vsub.f32 %v2929_v33, %v964_v18  ;;  %2573 = vpow2.f32 %v1097_v19 }
 0x1a2   : > { %v1103_v21 = vmul.f32 1.442695, %v1060_v25 }
 0x1a3   : > { %v1087_v28 = vmul.f32 1.442695, %v1052_v26  ;;  %v985_v29 = vpop.xlane.xlu1 %984 }
 0x1a4   : > { %v1059_v30 = vsub.f32 %v2931_v36, %v985_v29  ;;  %v961_v22 = vpop.xlane.xlu0 %960 }
 0x1a5   : > { %2575 = vpow2.f32 %v1087_v28  ;;  %v1051_v24 = vsub.f32 %v2935_v40, %v961_v22 }
 0x1a6   : > { %v3047_v32 = vpop.eup %2567  ;;  %2577 = vpow2.f32 %v1103_v21  ;;  %v1101_v34 = vmul.f32 1.442695, %v1059_v30  ;;  %v275_v21 = vld [vmem:[%s3089_s23] sm:$0xff] }
 0x1a7   : > { %v1085_v35 = vmul.f32 1.442695, %v1051_v24  ;;  %v994_v37 = vpop.xlane.xlu1 %993  ;;  %v1148_v31 = vsel %vm952_vm2, %v3047_v32, 0.0  ;;  %v3051_v33 = vpop.eup %2569 }
 0x1a8   : > { %v1062_v39 = vsub.f32 %v2939_v43, %v994_v37  ;;  %v970_v42 = vpop.xlane.xlu0 %969  ;;  %1149 = vadd.xlane.f32.xlu0 %v1148_v31  ;;  %v1145_v57 = vsel %vm952_vm2, %v3051_v33, 0.0 }
 0x1a9   : > { %2579 = vpow2.f32 %v1085_v35  ;;  %v1054_v36 = vsub.f32 %v2945_v48, %v970_v42  ;;  %v278_v42 = vld [vmem:[%s3089_s23 + $0x18] sm:$0xff] }
 0x1aa   : > { %v3055_v45 = vpop.eup %2571  ;;  %2581 = vpow2.f32 %v1101_v34  ;;  %v1107_v40 = vmul.f32 1.442695, %v1062_v39  ;;  %v277_v39 = vld [vmem:[%s3089_s23 + $0x10] sm:$0xff] }
 0x1ab   : > { %v1091_v47 = vmul.f32 1.442695, %v1054_v36  ;;  %v991_v50 = vpop.xlane.xlu1 %990  ;;  %v1172_v52 = vsel %vm952_vm2, %v3055_v45, 0.0  ;;  %v3061_v60 = vpop.eup %2573  ;;  %v283_v36 = vld [vmem:[%s3089_s23 + $0x40] sm:$0xff] }
 0x1ac   : > { %v1061_v43 = vsub.f32 %v2947_v51, %v991_v50  ;;  %1173 = vadd.xlane.f32.xlu1 %v1172_v52  ;;  %v967_v63 = vpop.xlane.xlu0 %966  ;;  %1146 = vadd.xlane.f32.xlu0 %v1145_v57  ;;  %v1169_v7 = vsel %vm952_vm2, %v3061_v60, 0.0  ;;  %v2499_v57 = vpack.c.bf16 %v278_v42, %v277_v39 }
 0x1ad   : > { %2583 = vpow2.f32 %v1091_v47  ;;  %v1053_v48 = vsub.f32 %v2951_v53, %v967_v63 }
 0x1ae   : > { %2585 = vpow2.f32 %v1107_v40  ;;  %v1105_v1 = vmul.f32 1.442695, %v1061_v43  ;;  %v284_v43 = vld [vmem:[%s3089_s23 + $0x48] sm:$0xff] }
 0x1af   : > { %v3065_v2 = vpop.eup %2575  ;;  %v1089_v3 = vmul.f32 1.442695, %v1053_v48  ;;  %v1000_v5 = vpop.xlane.xlu1 %999 }
 0x1b0   : > { %v3069_v9 = vpop.eup %2577  ;;  %v1064_v10 = vsub.f32 %v2955_v55, %v1000_v5  ;;  %1170 = vadd.xlane.f32.xlu1 %v1169_v7  ;;  %v976_v51 = vpop.xlane.xlu0 %975  ;;  %v1154_v11 = vsel %vm952_vm2, %v3065_v2, 0.0  ;;  %v279_v7 = vld [vmem:[%s3089_s23 + $0x20] sm:$0xff] }
 0x1b1   : > { %2587 = vpow2.f32 %v1089_v3  ;;  %v1056_v53 = vsub.f32 %v2961_v58, %v976_v51  ;;  %1155 = vadd.xlane.f32.xlu0 %v1154_v11  ;;  %v1178_v19 = vsel %vm952_vm2, %v3069_v9, 0.0  ;;  %v285_v51 = vld [vmem:[%s3089_s23 + $0x50] sm:$0xff] }
 0x1b2   : > { %2589 = vpow2.f32 %v1105_v1  ;;  %v1111_v12 = vmul.f32 1.442695, %v1064_v10  ;;  %v2511_v1 = vpack.c.bf16 %v284_v43, %v283_v36  ;;  %v280_v10 = vld [vmem:[%s3089_s23 + $0x28] sm:$0xff] }
 0x1b3   : > { %v3075_v13 = vpop.eup %2579  ;;  %v1095_v14 = vmul.f32 1.442695, %v1056_v53  ;;  %v997_v16 = vpop.xlane.xlu1 %996 }
 0x1b4   : > { %v3079_v55 = vpop.eup %2581  ;;  %v1063_v20 = vsub.f32 %v2963_v59, %v997_v16  ;;  %1179 = vadd.xlane.f32.xlu1 %v1178_v19  ;;  %v973_v25 = vpop.xlane.xlu0 %972  ;;  %v1151_v58 = vsel %vm952_vm2, %v3075_v13, 0.0  ;;  %v276_v59 = vld [vmem:[%s3089_s23 + $0x8] sm:$0xff]  ;;  %2512 = vmatprep.subr.bf16.mxu1 %v2511_v1  ;;  %v286_v16 = vld [vmem:[%s3089_s23 + $0x58] sm:$0xff] }
 0x1b5   : > { %2591 = vpow2.f32 %v1095_v14  ;;  %v1055_v18 = vsub.f32 %v2967_v61, %v973_v25  ;;  %1152 = vadd.xlane.f32.xlu0 %v1151_v58  ;;  %v1175_v61 = vsel %vm952_vm2, %v3079_v55, 0.0  ;;  %v2495_v30 = vpack.c.bf16 %v276_v59, %v275_v21  ;;  %2514 = vmatpush3.bf16.msra.mxu1 %v2511_v1  ;;  %v281_v21 = vld [vmem:[%s3089_s23 + $0x30] sm:$0xff]  ;;  %v282_v59 = vld [vmem:[%s3089_s23 + $0x38] sm:$0xff] }
 0x1b6   : > { %2593 = vpow2.f32 %v1111_v12  ;;  %v1109_v26 = vmul.f32 1.442695, %v1063_v20  ;;  %v2515_v58 = vpack.c.bf16 %v286_v16, %v285_v51 }
 0x1b7   : > { %v3093_v28 = vpop.eup %2583  ;;  %v1093_v29 = vmul.f32 1.442695, %v1055_v18  ;;  %2496 = vmatprep.subr.bf16.mxu0 %v2495_v30 }
 0x1b8   : > { %v3097_v22 = vpop.eup %2585  ;;  %v1030_v24 = vpop.xlane.xlu1 %1029  ;;  %1176 = vadd.xlane.f32.xlu1 %v1175_v61  ;;  %v1160_v35 = vsel %vm952_vm2, %v3093_v28, 0.0  ;;  %2498 = vmatpush3.bf16.msra.mxu0 %v2495_v30 }
 0x1b9   : > { %v1006_v34 = vpop.xlane.xlu0 %1005  ;;  %2595 = vpow2.f32 %v1093_v29  ;;  %v1074_v37 = vsub.f32 %v2977_v6, %v1030_v24  ;;  %1161 = vadd.xlane.f32.xlu0 %v1160_v35  ;;  %v1184_v52 = vsel %vm952_vm2, %v3097_v22, 0.0  ;;  %2500 = vmatprep.subr.bf16.mxu0 %v2499_v57  ;;  %v287_v29 = vld [vmem:[%s3089_s23 + $0x60] sm:$0xff]  ;;  %v288_v35 = vld [vmem:[%s3089_s23 + $0x68] sm:$0xff] }
 0x1ba   : > { %v1066_v31 = vsub.f32 %v2975_v4, %v1006_v34  ;;  %2597 = vpow2.f32 %v1109_v26  ;;  %2516 = vmatprep.subr.bf16.mxu1 %v2515_v58  ;;  %v2519_v42 = vpack.c.bf16 %v288_v35, %v287_v29 }
 0x1bb   : > { %v3106_v40 = vpop.eup %2587  ;;  %v1131_v47 = vmul.f32 1.442695, %v1074_v37  ;;  %2518 = vmatpush3.bf16.msra.mxu1 %v2515_v58 }
 0x1bc   : > { %v1115_v50 = vmul.f32 1.442695, %v1066_v31  ;;  %v3111_v6 = vpop.eup %2589  ;;  %v1027_v4 = vpop.xlane.xlu1 %1026  ;;  %1185 = vadd.xlane.f32.xlu1 %v1184_v52  ;;  %v1157_v48 = vsel %vm952_vm2, %v3106_v40, 0.0  ;;  %2502 = vmatpush3.bf16.msra.mxu0 %v2499_v57  ;;  %v290_v52 = vld [vmem:[%s3089_s23 + $0x78] sm:$0xff] }
 0x1bd   : > { %v1003_v63 = vpop.xlane.xlu0 %1002  ;;  %2599 = vpow2.f32 %v1131_v47  ;;  %v1073_v3 = vsub.f32 %v2981_v0, %v1027_v4  ;;  %1158 = vadd.xlane.f32.xlu0 %v1157_v48  ;;  %v1181_v14 = vsel %vm952_vm2, %v3111_v6, 0.0  ;;  %v2503_v0 = vpack.c.bf16 %v280_v10, %v279_v7  ;;  %2520 = vmatprep.subr.bf16.mxu1 %v2519_v42 }
 0x1be   : > { %v1065_v5 = vsub.f32 %v2979_v8, %v1003_v63  ;;  %2601 = vpow2.f32 %v1115_v50  ;;  %v289_v50 = vld [vmem:[%s3089_s23 + $0x70] sm:$0xff] }
 0x1bf   : > { %v3120_v11 = vpop.eup %2591  ;;  %v1129_v53 = vmul.f32 1.442695, %v1073_v3  ;;  %2504 = vmatprep.subr.bf16.mxu0 %v2503_v0  ;;  %2522 = vmatpush3.bf16.msra.mxu1 %v2519_v42  ;;  %v2523_v48 = vpack.c.bf16 %v290_v52, %v289_v50  ;;  %v291_v52 = vld [vmem:[%s3089_s23 + $0x80] sm:$0xff] }
 0x1c0   : > { %v1113_v12 = vmul.f32 1.442695, %v1065_v5  ;;  %v3125_v8 = vpop.eup %2593  ;;  %v1036_v19 = vpop.xlane.xlu1 %1035  ;;  %1182 = vadd.xlane.f32.xlu1 %v1181_v14  ;;  %v1166_v25 = vsel %vm952_vm2, %v3120_v11, 0.0  ;;  %2506 = vmatpush3.bf16.msra.mxu0 %v2503_v0 }
 0x1c1   : > { %v1012_v20 = vpop.xlane.xlu0 %1011  ;;  %2603 = vpow2.f32 %v1129_v53  ;;  %v1076_v18 = vsub.f32 %v2989_v15, %v1036_v19  ;;  %1167 = vadd.xlane.f32.xlu0 %v1166_v25  ;;  %v1190_v34 = vsel %vm952_vm2, %v3125_v8, 0.0  ;;  %v2507_v15 = vpack.c.bf16 %v282_v59, %v281_v21  ;;  %2524 = vmatprep.subr.bf16.mxu1 %v2523_v48 }
 0x1c2   : > { %v1068_v26 = vsub.f32 %v2993_v17, %v1012_v20  ;;  %2605 = vpow2.f32 %v1113_v12 }
 0x1c3   : > { %v3134_v61 = vpop.eup %2595  ;;  %v1135_v30 = vmul.f32 1.442695, %v1076_v18  ;;  %2508 = vmatprep.subr.bf16.mxu0 %v2507_v15  ;;  %2526 = vmatpush3.bf16.msra.mxu1 %v2523_v48  ;;  %v300_v48 = vld [vmem:[%s3089_s23 + $0xc8] sm:$0xff] }
 0x1c4   : > { %v1119_v24 = vmul.f32 1.442695, %v1068_v26  ;;  %v3139_v17 = vpop.eup %2597  ;;  %v1033_v37 = vpop.xlane.xlu1 %1032  ;;  %1191 = vadd.xlane.f32.xlu1 %v1190_v34  ;;  %v1163_v39 = vsel %vm952_vm2, %v3134_v61, 0.0  ;;  %2510 = vmatpush3.bf16.msra.mxu0 %v2507_v15 }
 0x1c5   : > { %v1009_v31 = vpop.xlane.xlu0 %1008  ;;  %2607 = vpow2.f32 %v1135_v30  ;;  %v1075_v36 = vsub.f32 %v2997_v27, %v1033_v37  ;;  %1164 = vadd.xlane.f32.xlu0 %v1163_v39  ;;  %v1187_v63 = vsel %vm952_vm2, %v3139_v17, 0.0 }
 0x1c6   : > { %v1067_v47 = vsub.f32 %v2995_v23, %v1009_v31  ;;  %2609 = vpow2.f32 %v1119_v24 }
 0x1c7   : > { %v3147_v57 = vpop.eup %2599  ;;  %v1133_v43 = vmul.f32 1.442695, %v1075_v36 }
 0x1c8   : > { %v1117_v4 = vmul.f32 1.442695, %v1067_v47  ;;  %v3151_v1 = vpop.eup %2601  ;;  %v1042_v27 = vpop.xlane.xlu1 %1041  ;;  %1188 = vadd.xlane.f32.xlu1 %v1187_v63  ;;  %v1220_v12 = vsel %vm952_vm2, %v3147_v57, 0.0  ;;  %v299_v63 = vld [vmem:[%s3089_s23 + $0xc0] sm:$0xff] }
 0x1c9   : > { %v1018_v23 = vpop.xlane.xlu0 %1017  ;;  %2611 = vpow2.f32 %v1133_v43  ;;  %v1078_v3 = vsub.f32 %v3005_v38, %v1042_v27  ;;  %v1196_v7 = vsel %vm952_vm2, %v3151_v1, 0.0  ;;  %v292_v43 = vld [vmem:[%s3089_s23 + $0x88] sm:$0xff] }
 0x1ca   : > { %v1070_v5 = vsub.f32 %v3009_v41, %v1018_v23  ;;  %2613 = vpow2.f32 %v1117_v4  ;;  %1197 = vadd.xlane.f32.xlu0 %v1196_v7 }
 0x1cb   : > { %v3157_v10 = vpop.eup %2603  ;;  %v1139_v51 = vmul.f32 1.442695, %v1078_v3  ;;  %v3206_v3 = vpack.c.bf16 %v300_v48, %v299_v63  ;;  %v296_v63 = vld [vmem:[%s3089_s23 + $0xa8] sm:$0xff] }
 0x1cc   : > { %v1123_v53 = vmul.f32 1.442695, %v1070_v5  ;;  %v3161_v14 = vpop.eup %2605  ;;  %v1039_v0 = vpop.xlane.xlu1 %1038  ;;  %1221 = vadd.xlane.f32.xlu1 %v1220_v12  ;;  %v1217_v18 = vsel %vm952_vm2, %v3157_v10, 0.0 }
 0x1cd   : > { %v1015_v38 = vpop.xlane.xlu0 %1014  ;;  %2615 = vpow2.f32 %v1139_v51  ;;  %v1077_v41 = vsub.f32 %v3011_v44, %v1039_v0  ;;  %v1193_v19 = vsel %vm952_vm2, %v3161_v14, 0.0  ;;  %2544 = vmatprep.subr.bf16.mxu1 %v3206_v3 }
 0x1ce   : > { %v1069_v16 = vsub.f32 %v3015_v46, %v1015_v38  ;;  %2617 = vpow2.f32 %v1123_v53  ;;  %1194 = vadd.xlane.f32.xlu0 %v1193_v19 }
 0x1cf   : > { %v3167_v20 = vpop.eup %2607  ;;  %v1137_v25 = vmul.f32 1.442695, %v1077_v41 }
 0x1d0   : > { %v1121_v58 = vmul.f32 1.442695, %v1069_v16  ;;  %v3171_v26 = vpop.eup %2609  ;;  %v1045_v21 = vpop.xlane.xlu1 %1044  ;;  %1218 = vadd.xlane.f32.xlu1 %v1217_v18  ;;  %v1226_v15 = vsel %vm952_vm2, %v3167_v20, 0.0 }
 0x1d1   : > { %v1021_v59 = vpop.xlane.xlu0 %1020  ;;  %2619 = vpow2.f32 %v1137_v25  ;;  %v1079_v44 = vsub.f32 %v3019_v49, %v1045_v21  ;;  %v1202_v29 = vsel %vm952_vm2, %v3171_v26, 0.0 }
 0x1d2   : > { %v1071_v46 = vsub.f32 %v3025_v54, %v1021_v59  ;;  %2621 = vpow2.f32 %v1121_v58  ;;  %1203 = vadd.xlane.f32.xlu0 %v1202_v29 }
 0x1d3   : > { %v3177_v30 = vpop.eup %2611  ;;  %v1141_v24 = vmul.f32 1.442695, %v1079_v44 }
 0x1d4   : > { %v1125_v34 = vmul.f32 1.442695, %v1071_v46  ;;  %v3181_v35 = vpop.eup %2613  ;;  %v1048_v37 = vpop.xlane.xlu1 %1047  ;;  %1227 = vadd.xlane.f32.xlu1 %v1226_v15  ;;  %v1223_v42 = vsel %vm952_vm2, %v3177_v30, 0.0  ;;  %v294_v15 = vld [vmem:[%s3089_s23 + $0x98] sm:$0xff] }
 0x1d5   : > { %v1024_v49 = vpop.xlane.xlu0 %1023  ;;  %2623 = vpow2.f32 %v1141_v24  ;;  %v1080_v54 = vsub.f32 %v3027_v56, %v1048_v37  ;;  %v1199_v39 = vsel %vm952_vm2, %v3181_v35, 0.0  ;;  %v3195_v56 = vpack.c.bf16 %v292_v43, %v291_v52  ;;  %v302_v52 = vld [vmem:[%s3089_s23 + $0xd8] sm:$0xff] }
 0x1d6   : > { %v1072_v31 = vsub.f32 %v3033_v62, %v1024_v49  ;;  %2625 = vpow2.f32 %v1125_v34  ;;  %1200 = vadd.xlane.f32.xlu0 %v1199_v39  ;;  %v293_v34 = vld [vmem:[%s3089_s23 + $0x90] sm:$0xff] }
 0x1d7   : > { %v3189_v36 = vpop.eup %2615  ;;  %v1143_v47 = vmul.f32 1.442695, %v1080_v54  ;;  %2528 = vmatprep.subr.bf16.mxu0 %v3195_v56 }
 0x1d8   : > { %v1127_v50 = vmul.f32 1.442695, %v1072_v31  ;;  %v3193_v4 = vpop.eup %2617  ;;  %1224 = vadd.xlane.f32.xlu1 %v1223_v42  ;;  %v1232_v23 = vsel %vm952_vm2, %v3189_v36, 0.0 }
 0x1d9   : > { %2627 = vpow2.f32 %v1143_v47  ;;  %v1208_v62 = vsel %vm952_vm2, %v3193_v4, 0.0  ;;  %v2531_v47 = vpack.c.bf16 %v294_v15, %v293_v34 }
 0x1da   : > { %2629 = vpow2.f32 %v1127_v50  ;;  %1209 = vadd.xlane.f32.xlu0 %v1208_v62  ;;  %v301_v50 = vld [vmem:[%s3089_s23 + $0xd0] sm:$0xff]  ;;  %v295_v62 = vld [vmem:[%s3089_s23 + $0xa0] sm:$0xff] }
 0x1db   : > { %v3202_v27 = vpop.eup %2619 }
 0x1dc   : > { %v3208_v5 = vpop.eup %2621  ;;  %1233 = vadd.xlane.f32.xlu1 %v1232_v23  ;;  %v1229_v53 = vsel %vm952_vm2, %v3202_v27, 0.0 }
 0x1dd   : > { %v1205_v7 = vsel %vm952_vm2, %v3208_v5, 0.0 }
 0x1de   : > { %1206 = vadd.xlane.f32.xlu0 %v1205_v7  ;;  %v2547_v7 = vpack.c.bf16 %v302_v52, %v301_v50 }
 0x1df   : > { %v3213_v51 = vpop.eup %2623 }
 0x1e0   : > { %v3217_v12 = vpop.eup %2625  ;;  %1230 = vadd.xlane.f32.xlu1 %v1229_v53  ;;  %v1235_v41 = vsel %vm952_vm2, %v3213_v51, 0.0  ;;  %v2535_v53 = vpack.c.bf16 %v296_v63, %v295_v62 }
 0x1e1   : > { %v1211_v0 = vsel %vm952_vm2, %v3217_v12, 0.0 }
 0x1e2   : > { %1212 = vadd.xlane.f32.xlu0 %v1211_v0  ;;  %v303_v0 = vld [vmem:[%s3089_s23 + $0xe0] sm:$0xff] }
 0x1e3   : > { %v3221_v38 = vpop.eup %2627 }
 0x1e4   : > { %v3225_v16 = vpop.eup %2629  ;;  %1236 = vadd.xlane.f32.xlu1 %v1235_v41  ;;  %v1238_v25 = vsel %vm952_vm2, %v3221_v38, 0.0  ;;  %v304_v41 = vld [vmem:[%s3089_s23 + $0xe8] sm:$0xff] }
 0x1e5   : > { %v1214_v19 = vsel %vm952_vm2, %v3225_v16, 0.0 }
 0x1e6   : > { %1215 = vadd.xlane.f32.xlu0 %v1214_v19 }
 0x1e8   : > { %1239 = vadd.xlane.f32.xlu1 %v1238_v25  ;;  %v297_v25 = vld [vmem:[%s3089_s23 + $0xb0] sm:$0xff] }
 0x235   : > { %v1150_v58 = vpop.xlane.xlu0 %1149 }
 0x236   : > { %2631 = vrcp.f32 %v1150_v58 }
 0x239   : > { %v1174_v18 = vpop.xlane.xlu1 %1173  ;;  %v1147_v21 = vpop.xlane.xlu0 %1146 }
 0x23a   : > { %2633 = vrcp.f32 %v1147_v21  ;;  %v2551_v21 = vpack.c.bf16 %v304_v41, %v303_v0 }
 0x23b   : > { %2635 = vrcp.f32 %v1174_v18 }
 0x23d   : > { %v1171_v59 = vpop.xlane.xlu1 %1170 }
 0x23e   : > { %2637 = vrcp.f32 %v1171_v59  ;;  %v1156_v44 = vpop.xlane.xlu0 %1155 }
 0x23f   : > { %2639 = vrcp.f32 %v1156_v44 }
 0x240   : > { %v2632_v24 = vpop.eup %2631 }
 0x241   : > { %v1180_v46 = vpop.xlane.xlu1 %1179  ;;  %v1244_v42 = vmul.f32 %v2632_v24, %v3047_v32  ;;  %v306_v24 = vld [vmem:[%s3089_s23 + $0xf8] sm:$0xff] }
 0x242   : > { %v1153_v29 = vpop.xlane.xlu0 %1152 }
 0x243   : > { %2641 = vrcp.f32 %v1153_v29  ;;  %v305_v29 = vld [vmem:[%s3089_s23 + $0xf0] sm:$0xff] }
 0x244   : > { %v2634_v37 = vpop.eup %2633  ;;  %2643 = vrcp.f32 %v1180_v46 }
 0x245   : > { %v1177_v49 = vpop.xlane.xlu1 %1176  ;;  %v1242_v31 = vmul.f32 %v2634_v37, %v3051_v33  ;;  %v2636_v39 = vpop.eup %2635 }
 0x246   : > { %2645 = vrcp.f32 %v1177_v49  ;;  %v1162_v54 = vpop.xlane.xlu0 %1161  ;;  %v1260_v23 = vmul.f32 %v2636_v39, %v3055_v45 }
 0x247   : > { %2303 = vmatprep.mubr.msk.f32.mxu0 %vm952_vm2, %v1242_v31  ;;  %2647 = vrcp.f32 %v1162_v54 }
 0x248   : > { %v2638_v43 = vpop.eup %2637  ;;  %2304 = vmatmul.mubr.msk.f32.vlgmr.msra.gmra.mrb[16].mxu0 %vm952_vm2, %v1244_v42 }
 0x249   : > { %v1186_v48 = vpop.xlane.xlu1 %1185  ;;  %v1258_v33 = vmul.f32 %v2638_v43, %v3061_v60  ;;  %2530 = vmatpush3.bf16.msra.mxu0 %v3195_v56  ;;  %v2640_v19 = vpop.eup %2639  ;;  %v298_v60 = vld [vmem:[%s3089_s23 + $0xb8] sm:$0xff] }
 0x24a   : > { %v1159_v32 = vpop.xlane.xlu0 %1158  ;;  %2532 = vmatprep.subr.bf16.mxu0 %v2531_v47  ;;  %v1248_v44 = vmul.f32 %v2640_v19, %v3065_v2  ;;  %v2539_v46 = vpack.c.bf16 %v298_v60, %v297_v25  ;;  %v2555_v2 = vpack.c.bf16 %v306_v24, %v305_v29 }
 0x24b   : > { %2649 = vrcp.f32 %v1159_v32  ;;  %2331 = vmatprep.mubr.msk.f32.mxu1 %vm952_vm2, %v1258_v33 }
 0x24c   : > { %2332 = vmatmul.mubr.msk.f32.vlgmr.msra.gmra.mrb[16].mxu1 %vm952_vm2, %v1260_v23  ;;  %2651 = vrcp.f32 %v1186_v48 }
 0x24d   : > { %v2642_v45 = vpop.eup %2641  ;;  %v1183_v58 = vpop.xlane.xlu1 %1182  ;;  %2546 = vmatpush3.bf16.msra.mxu1 %v3206_v3  ;;  %2534 = vmatpush3.bf16.msra.mxu0 %v2531_v47 }
 0x24e   : > { %2653 = vrcp.f32 %v1183_v58  ;;  %v1168_v56 = vpop.xlane.xlu0 %1167  ;;  %v1246_v18 = vmul.f32 %v2642_v45, %v3075_v13  ;;  %2548 = vmatprep.subr.bf16.mxu1 %v2547_v7  ;;  %v2644_v59 = vpop.eup %2643  ;;  %2536 = vmatprep.subr.bf16.mxu0 %v2535_v53 }
 0x24f   : > { %2655 = vrcp.f32 %v1168_v56  ;;  %v1264_v37 = vmul.f32 %v2644_v59, %v3069_v9 }
 0x250   : > { %v2646_v34 = vpop.eup %2645  ;;  %2306 = vmatprep.mubr.msk.f32.mxu0 %vm952_vm2, %v1246_v18 }
 0x251   : > { %v1192_v15 = vpop.xlane.xlu1 %1191  ;;  %2307 = vmatmul.mubr.msk.f32.gmra.mrb[18].mxu0 %vm952_vm2, %v1248_v44  ;;  %v1262_v3 = vmul.f32 %v2646_v34, %v3079_v55  ;;  %2550 = vmatpush3.bf16.msra.mxu1 %v2547_v7  ;;  %v2648_v49 = vpop.eup %2647 }
 0x252   : > { %v1165_v13 = vpop.xlane.xlu0 %1164  ;;  %2538 = vmatpush3.bf16.msra.mxu0 %v2535_v53  ;;  %2552 = vmatprep.subr.bf16.mxu1 %v2551_v21  ;;  %v1252_v42 = vmul.f32 %v2648_v49, %v3093_v28 }
 0x253   : > { %2657 = vrcp.f32 %v1165_v13  ;;  %2334 = vmatprep.mubr.msk.f32.mxu1 %vm952_vm2, %v1262_v3  ;;  %2540 = vmatprep.subr.bf16.mxu0 %v2539_v46 }
 0x254   : > { %2335 = vmatmul.mubr.msk.f32.gmra.mrb[18].mxu1 %vm952_vm2, %v1264_v37  ;;  %2659 = vrcp.f32 %v1192_v15 }
 0x255   : > { %v2650_v54 = vpop.eup %2649  ;;  %v1189_v31 = vpop.xlane.xlu1 %1188  ;;  %2554 = vmatpush3.bf16.msra.mxu1 %v2551_v21 }
 0x256   : > { %2661 = vrcp.f32 %v1189_v31  ;;  %v1250_v55 = vmul.f32 %v2650_v54, %v3106_v40  ;;  %2542 = vmatpush3.bf16.msra.mxu0 %v2539_v46  ;;  %2556 = vmatprep.subr.bf16.mxu1 %v2555_v2  ;;  %v2652_v9 = vpop.eup %2651 }
 0x257   : > { %v1198_v39 = vpop.xlane.xlu0 %1197  ;;  %v1268_v43 = vmul.f32 %v2652_v9, %v3097_v22 }
 0x258   : > { %v2654_v47 = vpop.eup %2653  ;;  %2309 = vmatprep.mubr.msk.f32.mxu0 %vm952_vm2, %v1250_v55  ;;  %2663 = vrcp.f32 %v1198_v39 }
 0x259   : > { %v1222_v50 = vpop.xlane.xlu1 %1221  ;;  %2310 = vmatmul.mubr.msk.f32.gmra.mrb[20].mxu0 %vm952_vm2, %v1252_v42  ;;  %v1266_v52 = vmul.f32 %v2654_v47, %v3111_v6  ;;  %2558 = vmatpush3.bf16.msra.mxu1 %v2555_v2  ;;  %v2656_v40 = vpop.eup %2655 }
 0x25a   : > { %v1256_v6 = vmul.f32 %v2656_v40, %v3120_v11 }
 0x25b   : > { %v1195_v62 = vpop.xlane.xlu0 %1194  ;;  %2337 = vmatprep.mubr.msk.f32.mxu1 %vm952_vm2, %v1266_v52 }
 0x25c   : > { %2665 = vrcp.f32 %v1195_v62  ;;  %2338 = vmatmul.mubr.msk.f32.gmra.mrb[20].mxu1 %vm952_vm2, %v1268_v43 }
 0x25d   : > { %v2658_v28 = vpop.eup %2657  ;;  %2667 = vrcp.f32 %v1222_v50  ;;  %v1219_v63 = vpop.xlane.xlu1 %1218 }
 0x25e   : > { %2669 = vrcp.f32 %v1219_v63  ;;  %v1254_v48 = vmul.f32 %v2658_v28, %v3134_v61  ;;  %v2660_v33 = vpop.eup %2659 }
 0x25f   : > { %v1204_v23 = vpop.xlane.xlu0 %1203  ;;  %v1272_v53 = vmul.f32 %v2660_v33, %v3125_v8 }
 0x260   : > { %v2662_v32 = vpop.eup %2661  ;;  %2312 = vmatprep.mubr.msk.f32.mxu0 %vm952_vm2, %v1254_v48  ;;  %2671 = vrcp.f32 %v1204_v23 }
 0x261   : > { %v1228_v22 = vpop.xlane.xlu1 %1227  ;;  %2313 = vmatmul.mubr.msk.f32.gmra.mrb[22].mxu0 %vm952_vm2, %v1256_v6  ;;  %v1270_v7 = vmul.f32 %v2662_v32, %v3139_v17 }
 0x262   : > { %v2664_v61 = vpop.eup %2663 }
 0x263   : > { %v1201_v0 = vpop.xlane.xlu0 %1200  ;;  %2340 = vmatprep.mubr.msk.f32.mxu1 %vm952_vm2, %v1270_v7  ;;  %v1276_v17 = vmul.f32 %v2664_v61, %v3151_v1 }
 0x264   : > { %2673 = vrcp.f32 %v1201_v0  ;;  %2341 = vmatmul.mubr.msk.f32.gmra.mrb[22].mxu1 %vm952_vm2, %v1272_v53 }
 0x265   : > { %2675 = vrcp.f32 %v1228_v22  ;;  %v1225_v11 = vpop.xlane.xlu1 %1224 }
 0x266   : > { %v2666_v41 = vpop.eup %2665  ;;  %2677 = vrcp.f32 %v1225_v11 }
 0x267   : > { %v2668_v19 = vpop.eup %2667  ;;  %v1210_v25 = vpop.xlane.xlu0 %1209  ;;  %v1274_v60 = vmul.f32 %v2666_v41, %v3161_v14 }
 0x268   : > { %v2670_v45 = vpop.eup %2669  ;;  %v1292_v56 = vmul.f32 %v2668_v19, %v3147_v57  ;;  %2679 = vrcp.f32 %v1210_v25 }
 0x269   : > { %2359 = vmatprep.mubr.msk.f32.mxu0 %vm952_vm2, %v1274_v60  ;;  %v1234_v8 = vpop.xlane.xlu1 %1233  ;;  %v1290_v58 = vmul.f32 %v2670_v45, %v3157_v10 }
 0x26a   : > { %2360 = vmatmul.mubr.msk.f32.vlgmr.msra.gmra.mrb[24].mxu0 %vm952_vm2, %v1276_v17  ;;  %v2672_v14 = vpop.eup %2671 }
 0x26b   : > { %v1207_v18 = vpop.xlane.xlu0 %1206  ;;  %2387 = vmatprep.mubr.msk.f32.mxu1 %vm952_vm2, %v1290_v58  ;;  %v1280_v57 = vmul.f32 %v2672_v14, %v3171_v26 }
 0x26c   : > { %2681 = vrcp.f32 %v1207_v18  ;;  %2388 = vmatmul.mubr.msk.f32.vlgmr.msra.gmra.mrb[24].mxu1 %vm952_vm2, %v1292_v56 }
 0x26d   : > { %2683 = vrcp.f32 %v1234_v8  ;;  %v1231_v21 = vpop.xlane.xlu1 %1230 }
 0x26e   : > { %v2674_v1 = vpop.eup %2673  ;;  %2685 = vrcp.f32 %v1231_v21 }
 0x26f   : > { %v2676_v59 = vpop.eup %2675  ;;  %v1213_v44 = vpop.xlane.xlu0 %1212  ;;  %v1278_v10 = vmul.f32 %v2674_v1, %v3181_v35 }
 0x270   : > { %v2678_v46 = vpop.eup %2677  ;;  %2687 = vrcp.f32 %v1213_v44  ;;  %v1296_v34 = vmul.f32 %v2676_v59, %v3167_v20 }
 0x271   : > { %2362 = vmatprep.mubr.msk.f32.mxu0 %vm952_vm2, %v1278_v10  ;;  %v1237_v29 = vpop.xlane.xlu1 %1236  ;;  %v1294_v24 = vmul.f32 %v2678_v46, %v3177_v30 }
 0x272   : > { %2689 = vrcp.f32 %v1237_v29  ;;  %2363 = vmatmul.mubr.msk.f32.gmra.mrb[26].mxu0 %vm952_vm2, %v1280_v57  ;;  %v2680_v35 = vpop.eup %2679 }
 0x273   : > { %v1216_v15 = vpop.xlane.xlu0 %1215  ;;  %2390 = vmatprep.mubr.msk.f32.mxu1 %vm952_vm2, %v1294_v24  ;;  %v1284_v30 = vmul.f32 %v2680_v35, %v3193_v4 }
 0x274   : > { %2691 = vrcp.f32 %v1216_v15  ;;  %2391 = vmatmul.mubr.msk.f32.gmra.mrb[26].mxu1 %vm952_vm2, %v1296_v34 }
 0x275   : > { %v1240_v3 = vpop.xlane.xlu1 %1239 }
 0x276   : > { %v2682_v13 = vpop.eup %2681  ;;  %2693 = vrcp.f32 %v1240_v3 }
 0x277   : > { %v2684_v26 = vpop.eup %2683  ;;  %v1282_v37 = vmul.f32 %v2682_v13, %v3208_v5 }
 0x278   : > { %v2686_v2 = vpop.eup %2685  ;;  %v1300_v54 = vmul.f32 %v2684_v26, %v3189_v36 }
 0x279   : > { %2365 = vmatprep.mubr.msk.f32.mxu0 %vm952_vm2, %v1282_v37  ;;  %v1298_v20 = vmul.f32 %v2686_v2, %v3202_v27 }
 0x27a   : > { %v2688_v49 = vpop.eup %2687  ;;  %2366 = vmatmul.mubr.msk.f32.gmra.mrb[28].mxu0 %vm952_vm2, %v1284_v30 }
 0x27b   : > { %2393 = vmatprep.mubr.msk.f32.mxu1 %vm952_vm2, %v1298_v20  ;;  %v1286_v31 = vmul.f32 %v2688_v49, %v3217_v12 }
 0x27c   : > { %v2690_v55 = vpop.eup %2689  ;;  %2394 = vmatmul.mubr.msk.f32.gmra.mrb[28].mxu1 %vm952_vm2, %v1300_v54 }
 0x27d   : > { %2368 = vmatprep.mubr.msk.f32.mxu0 %vm952_vm2, %v1286_v31  ;;  %v1302_v4 = vmul.f32 %v2690_v55, %v3213_v51 }
 0x27e   : > { %v2692_v5 = vpop.eup %2691 }
 0x27f   : > { %2396 = vmatprep.mubr.msk.f32.mxu1 %vm952_vm2, %v1302_v4  ;;  %v1288_v27 = vmul.f32 %v2692_v5, %v3225_v16 }
 0x280   : > { %v2694_v9 = vpop.eup %2693 }
 0x281   : > { %2369 = vmatmul.mubr.msk.f32.gmra.mrb[30].mxu0 %vm952_vm2, %v1288_v27  ;;  %v1304_v36 = vmul.f32 %v2694_v9, %v3221_v38 }
 0x283   : > { %2397 = vmatmul.mubr.msk.f32.gmra.mrb[30].mxu1 %vm952_vm2, %v1304_v36 }
 0x31b   : > { %v2305_v51 = vpop.f32.mrb[16].mxu0 }
 0x31c   : > { %1822 = vst.msk [vmem:[%s3313_s26 + $0x8] sm:$0xff] %vm307_vm0, %v2305_v51  ;;  %v1395_v12 = vpop.f32.mrb[17].mxu0 }
 0x31d   : > { %1821 = vst.msk [vmem:[%s3313_s26] sm:$0xff] %vm307_vm0, %v1395_v12 }
 0x31f   : > { %v2333_v38 = vpop.f32.mrb[16].mxu1 }
 0x320   : > { %1830 = vst.msk [vmem:[%s3313_s26 + $0x48] sm:$0xff] %vm307_vm0, %v2333_v38  ;;  %v1524_v16 = vpop.f32.mrb[17].mxu1 }
 0x321   : > { %1829 = vst.msk [vmem:[%s3313_s26 + $0x40] sm:$0xff] %vm307_vm0, %v1524_v16 }
 0x324   : > { %v2308_v39 = vpop.f32.mrb[18].mxu0 }
 0x325   : > { %1824 = vst.msk [vmem:[%s3313_s26 + $0x18] sm:$0xff] %vm307_vm0, %v2308_v39  ;;  %v1405_v42 = vpop.f32.mrb[19].mxu0 }
 0x326   : > { %1823 = vst.msk [vmem:[%s3313_s26 + $0x10] sm:$0xff] %vm307_vm0, %v1405_v42 }
 0x327   : > { %v2336_v47 = vpop.f32.mrb[18].mxu1 }
 0x328   : > { %1832 = vst.msk [vmem:[%s3313_s26 + $0x58] sm:$0xff] %vm307_vm0, %v2336_v47  ;;  %v1534_v50 = vpop.f32.mrb[19].mxu1 }
 0x329   : > { %1831 = vst.msk [vmem:[%s3313_s26 + $0x50] sm:$0xff] %vm307_vm0, %v1534_v50 }
 0x32c   : > { %v2311_v52 = vpop.f32.mrb[20].mxu0 }
 0x32d   : > { %1826 = vst.msk [vmem:[%s3313_s26 + $0x28] sm:$0xff] %vm307_vm0, %v2311_v52  ;;  %v1415_v43 = vpop.f32.mrb[21].mxu0 }
 0x32e   : > { %1825 = vst.msk [vmem:[%s3313_s26 + $0x20] sm:$0xff] %vm307_vm0, %v1415_v43 }
 0x32f   : > { %v2339_v62 = vpop.f32.mrb[20].mxu1 }
 0x330   : > { %1834 = vst.msk [vmem:[%s3313_s26 + $0x68] sm:$0xff] %vm307_vm0, %v2339_v62  ;;  %v1544_v40 = vpop.f32.mrb[21].mxu1 }
 0x331   : > { %1833 = vst.msk [vmem:[%s3313_s26 + $0x60] sm:$0xff] %vm307_vm0, %v1544_v40 }
 0x334   : > { %v2314_v28 = vpop.f32.mrb[22].mxu0 }
 0x335   : > { %1828 = vst.msk [vmem:[%s3313_s26 + $0x38] sm:$0xff] %vm307_vm0, %v2314_v28  ;;  %v1425_v63 = vpop.f32.mrb[23].mxu0 }
 0x336   : > { %1827 = vst.msk [vmem:[%s3313_s26 + $0x30] sm:$0xff] %vm307_vm0, %v1425_v63 }
 0x337   : > { %v2342_v48 = vpop.f32.mrb[22].mxu1 }
 0x338   : > { %1836 = vst.msk [vmem:[%s3313_s26 + $0x78] sm:$0xff] %vm307_vm0, %v2342_v48  ;;  %v1554_v33 = vpop.f32.mrb[23].mxu1 }
 0x339   : > { %1835 = vst.msk [vmem:[%s3313_s26 + $0x70] sm:$0xff] %vm307_vm0, %v1554_v33 }
 0x33d   : > { %v2361_v23 = vpop.f32.mrb[24].mxu0 }
 0x33e   : > { %1838 = vst.msk [vmem:[%s3313_s26 + $0x88] sm:$0xff] %vm307_vm0, %v2361_v23  ;;  %v1653_v6 = vpop.f32.mrb[25].mxu0 }
 0x33f   : > { %1837 = vst.msk [vmem:[%s3313_s26 + $0x80] sm:$0xff] %vm307_vm0, %v1653_v6  ;;  %v2389_v32 = vpop.f32.mrb[24].mxu1 }
 0x340   : > { %1846 = vst.msk [vmem:[%s3313_s26 + $0xc8] sm:$0xff] %vm307_vm0, %v2389_v32  ;;  %v1782_v22 = vpop.f32.mrb[25].mxu1 }
 0x341   : > { %1845 = vst.msk [vmem:[%s3313_s26 + $0xc0] sm:$0xff] %vm307_vm0, %v1782_v22 }
 0x345   : > { %v2364_v7 = vpop.f32.mrb[26].mxu0 }
 0x346   : > { %1840 = vst.msk [vmem:[%s3313_s26 + $0x98] sm:$0xff] %vm307_vm0, %v2364_v7  ;;  %v1663_v53 = vpop.f32.mrb[27].mxu0 }
 0x347   : > { %1839 = vst.msk [vmem:[%s3313_s26 + $0x90] sm:$0xff] %vm307_vm0, %v1663_v53  ;;  %v2392_v0 = vpop.f32.mrb[26].mxu1 }
 0x348   : > { %1848 = vst.msk [vmem:[%s3313_s26 + $0xd8] sm:$0xff] %vm307_vm0, %v2392_v0  ;;  %v1792_v61 = vpop.f32.mrb[27].mxu1 }
 0x349   : > { %1847 = vst.msk [vmem:[%s3313_s26 + $0xd0] sm:$0xff] %vm307_vm0, %v1792_v61 }
 0x34d   : > { %v2367_v11 = vpop.f32.mrb[28].mxu0 }
 0x34e   : > { %1842 = vst.msk [vmem:[%s3313_s26 + $0xa8] sm:$0xff] %vm307_vm0, %v2367_v11  ;;  %v1673_v41 = vpop.f32.mrb[29].mxu0 }
 0x34f   : > { %1841 = vst.msk [vmem:[%s3313_s26 + $0xa0] sm:$0xff] %vm307_vm0, %v1673_v41  ;;  %v2395_v19 = vpop.f32.mrb[28].mxu1 }
 0x350   : > { %1850 = vst.msk [vmem:[%s3313_s26 + $0xe8] sm:$0xff] %vm307_vm0, %v2395_v19  ;;  %v1802_v25 = vpop.f32.mrb[29].mxu1 }
 0x351   : > { %1849 = vst.msk [vmem:[%s3313_s26 + $0xe0] sm:$0xff] %vm307_vm0, %v1802_v25 }
 0x354   : > { %v2370_v60 = vpop.f32.mrb[30].mxu0 }
 0x355   : > { %1844 = vst.msk [vmem:[%s3313_s26 + $0xb8] sm:$0xff] %vm307_vm0, %v2370_v60  ;;  %v1683_v45 = vpop.f32.mrb[31].mxu0 }
 0x356   : > { %1843 = vst.msk [vmem:[%s3313_s26 + $0xb0] sm:$0xff] %vm307_vm0, %v1683_v45  ;;  %v2398_v17 = vpop.f32.mrb[30].mxu1 }
 0x357   : > { %1852 = vst.msk [vmem:[%s3313_s26 + $0xf8] sm:$0xff] %vm307_vm0, %v2398_v17  ;;  %v1812_v8 = vpop.f32.mrb[31].mxu1 }
 0x358   : > { %1851 = vst.msk [vmem:[%s3313_s26 + $0xf0] sm:$0xff] %vm307_vm0, %v1812_v8 }
 0x359 PF: > { %s13_s12 = sadd.s32 1, %s2701_s12  }
 0x35a   : > { %p10_p4 = scmp.ge.s32.totalorder %s13_s12, 4  }
 0x35c   :  { %12 = sbr.rel (!%p10_p4) target bundleno = 1 (0x1), region = 68 }

// kernel: image_encoder_forward.13
= control target key start
LH: loop header
LB: loop body
LE: loop exit
PB: predicated region body
PF: predicated region fallthrough
CT: control target
= control target key end

     0   :  { %17 = vsyncpa [#allocation3], 0  ;;  %s2293_s0 = inlined_call_operand.vmem [shape: f32[128,128], index: 0, kind: input, shape index: {}]   ;;  %s2294_s1 = inlined_call_operand.vmem [shape: f32[128,128], index: 1, kind: input, shape index: {}]   ;;  %s2295_s2 = inlined_call_operand.vmem [shape: f32[128,128], index: 2, kind: input, shape index: {}]   ;;  %s2296_s3 = inlined_call_operand.vmem [shape: f32[1,128], index: 3, kind: input, shape index: {}]   ;;  %s2297_s4 = inlined_call_operand.vmem [shape: f32[1,128], index: 4, kind: input, shape index: {}]   ;;  %s2298_s5 = inlined_call_operand.vmem [shape: f32[1,128], index: 5, kind: input, shape index: {}]   ;;  %s2299_s6 = inlined_call_operand.vmem [shape: f32[128,256], index: 6, kind: input, shape index: {}]   ;;  %s2300_s7 = inlined_call_operand.vmem [shape: f32[1,256], index: 7, kind: input, shape index: {}]   ;;  %s2301_s8 = inlined_call_operand.vmem [shape: f32[256,128], index: 8, kind: input, shape index: {}]   ;;  %s2302_s9 = inlined_call_operand.vmem [shape: f32[1,128], index: 9, kind: input, shape index: {}]   ;;  %s2303_s10 = inlined_call_operand.vmem [shape: f32[1,128], index: 10, kind: input, shape index: {}]   ;;  %s2304_s11 = inlined_call_operand.vmem [shape: f32[1,128], index: 11, kind: input, shape index: {}]   ;;  %s2305_s12 = inlined_call_operand.hbm [shape: f32[128,128], index: 12, kind: output, shape index: {}]  }
   0x1   :  { %19 = vsyncpa [#allocation3 + $0x1], 0  ;;  %s1711_s21 = smov 0   ;;  %s1713_s22 = smov 0  }
   0x2   :  { %s1715_s23 = smov 0   ;;  %s1717_s24 = smov 0  }
   0x3 LB: > { %2307 = sst [smem:[#allocation5_spill]] %s1636_s23  ;;  %s1732_s25 = sadd.s32 4294967295, %s1640_s24   ;;  %s1640_s24 = sphi %s1717_s24, %s2315_s24   ;;  %s1636_s23 = sphi %s1715_s23, %s2312_s23   ;;  %s1632_s22 = sphi %s1713_s22, %s2314_s22   ;;  %s1628_s21 = sphi %s1711_s21, %s2313_s21  }
   0x4   : > { %s1247_s26 = sadd.s32 4294967294, %s1640_s24   ;;  %s1736_s27 = sadd.s32 1, %s1640_s24  }
   0x5   : > { %s294_s28 = sadd.s32 1, %s1636_s23  ;;  %s291_s29 = ssub.s32 %s1640_s24, %s1736_s27 }
   0x6   : > { %p304_p0 = scmp.ne.s32.totalorder %s1636_s23, %s1632_s22  ;;  %p292_p1 = scmp.eq.s32.totalorder %s291_s29, 0 }
   0x7   : > { %p305_p2 = scmp.eq.s32.totalorder %s1732_s25, 1  ;;  %p310_p3 = scmp.ne.s32.totalorder %s1632_s22, %s1628_s21 }
   0x8   : > { %p311_p4 = scmp.eq.s32.totalorder %s1247_s26, 1  ;;  %p1250_p7 = scmp.ge.s32.totalorder %s1640_s24, 1 }
   0x9   : > { %s1747_s30 = scalar_select %p292_p1, %s1636_s23, %s294_s28  }
   0xa   : > { %p1749_p5 = por %p305_p2, %p304_p0  ;;  %p1753_p6 = por %p311_p4, %p310_p3 }
   0xb   : > { %2308 = sst [smem:[#allocation6_spill]] %s1747_s30  ;;  %p377_p8 = scmp.lt.s32.totalorder %s1640_s24, 3 }
   0xd   : > { %p378_p9 = pnand %p1250_p7, %p377_p8 }
   0xe   : > { %v453_v0 = vld [vmem:[%s2295_s2] sm:$0xff] (!%p378_p9)  ;;  %v454_v1 = vld [vmem:[%s2295_s2 + $0x8] sm:$0xff] (!%p378_p9)  ;;  %v455_v2 = vld [vmem:[%s2295_s2 + $0x10] sm:$0xff] (!%p378_p9)  ;;  %s1252_s26 = sshll.u32 (!%p378_p9), %s1732_s25, 3  ;;  %s421_s23 = sand.u32 (!%p378_p9), 1, %s1632_s22  }
   0xf   : > { %381 = sbr.rel (%p378_p9) target bundleno = 1368 (0x558), region = 68  ;;  %v1392_v3 = vpack.c.bf16 (!%p378_p9), %v454_v1, %v453_v0  ;;  %v456_v4 = vld [vmem:[%s2295_s2 + $0x18] sm:$0xff] (!%p378_p9)  ;;  %p425_p10 = scmp.lt.s32.totalorder (!%p378_p9), %s1252_s26, 15  ;;  %v457_v6 = vld [vmem:[%s2295_s2 + $0x20] sm:$0xff] (!%p378_p9)  ;;  %v458_v7 = vld [vmem:[%s2295_s2 + $0x28] sm:$0xff] (!%p378_p9) }
  0x10   : > { %v1396_v5 = vpack.c.bf16 (!%p378_p9), %v456_v4, %v455_v2  ;;  %v1400_v8 = vpack.c.bf16 (!%p378_p9), %v458_v7, %v457_v6  ;;  %v459_v9 = vld [vmem:[%s2295_s2 + $0x30] sm:$0xff] (!%p378_p9)  ;;  %v460_v10 = vld [vmem:[%s2295_s2 + $0x38] sm:$0xff] (!%p378_p9)  ;;  %v461_v13 = vld [vmem:[%s2295_s2 + $0x40] sm:$0xff] (!%p378_p9)  ;;  %s1251_s16 = sshll.u32 (!%p378_p9), %s421_s23, 6  ;;  %s2252_s15 = scalar_lea.sflag (!%p378_p9), [#allocation3], %s421_s23 }
  0x11   : > { %1393 = vmatprep.subr.bf16.mxu0 (!%p378_p9), %v1392_v3  ;;  %v1404_v12 = vpack.c.bf16 (!%p378_p9), %v460_v10, %v459_v9  ;;  %v462_v14 = vld [vmem:[%s2295_s2 + $0x48] sm:$0xff] (!%p378_p9)  ;;  %v463_v16 = vld [vmem:[%s2295_s2 + $0x50] sm:$0xff] (!%p378_p9)  ;;  %v464_v17 = vld [vmem:[%s2295_s2 + $0x58] sm:$0xff] (!%p378_p9)  ;;  %s2225_s20 = scalar_lea.vmem (!%p378_p9), [#allocation2], %s1251_s16 }
  0x12   : > { %1395 = vmatpush3.bf16.msra.mxu0 (!%p378_p9), %v1392_v3  ;;  %v1408_v15 = vpack.c.bf16 (!%p378_p9), %v462_v14, %v461_v13  ;;  %v1412_v18 = vpack.c.bf16 (!%p378_p9), %v464_v17, %v463_v16  ;;  %v465_v19 = vld [vmem:[%s2295_s2 + $0x60] sm:$0xff] (!%p378_p9)  ;;  %v466_v20 = vld [vmem:[%s2295_s2 + $0x68] sm:$0xff] (!%p378_p9)  ;;  %v467_v22 = vld [vmem:[%s2295_s2 + $0x70] sm:$0xff] (!%p378_p9) }
  0x13   : > { %1397 = vmatprep.subr.bf16.mxu0 (!%p378_p9), %v1396_v5  ;;  %v1416_v21 = vpack.c.bf16 (!%p378_p9), %v466_v20, %v465_v19  ;;  %v468_v23 = vld [vmem:[%s2295_s2 + $0x78] sm:$0xff] (!%p378_p9)  ;;  %v1256_v32 = vld [vmem:[%s2296_s3] ss:$0 sm:$0xff] (!%p378_p9)  ;;  %v709_v1 = vld [vmem:[%s2299_s6 + $0x8] sm:$0xff] (!%p378_p9) }
  0x14   : > { %v1420_v24 = vpack.c.bf16 (!%p378_p9), %v468_v23, %v467_v22  ;;  %v711_v2 = vld [vmem:[%s2299_s6 + $0x18] sm:$0xff] (!%p378_p9)  ;;  %v708_v3 = vld [vmem:[%s2299_s6] sm:$0xff] (!%p378_p9)  ;;  %v713_v6 = vld [vmem:[%s2299_s6 + $0x28] sm:$0xff] (!%p378_p9) }
  0x15   : > { %v1424_v4 = vpack.c.bf16 (!%p378_p9), %v711_v2, %v709_v1  ;;  %v715_v7 = vld [vmem:[%s2299_s6 + $0x38] sm:$0xff] (!%p378_p9)  ;;  %v712_v10 = vld [vmem:[%s2299_s6 + $0x20] sm:$0xff] (!%p378_p9)  ;;  %v718_v17 = vld [vmem:[%s2299_s6 + $0x50] sm:$0xff] (!%p378_p9) }
  0x16   : > { %s2317_s26 = smov (!%p425_p10, %s1252_s26), 15  ;;  %1399 = vmatpush3.bf16.msra.mxu0 %v1396_v5  ;;  %v710_v5 = vld [vmem:[%s2299_s6 + $0x10] sm:$0xff]  ;;  %v1428_v9 = vpack.c.bf16 %v715_v7, %v713_v6  ;;  %v719_v13 = vld [vmem:[%s2299_s6 + $0x58] sm:$0xff]  ;;  %v716_v16 = vld [vmem:[%s2299_s6 + $0x40] sm:$0xff] }
  0x17   : > { %s1253_s17 = sshll.u32 %s2317_s26, 3  ;;  %1401 = vmatprep.subr.bf16.mxu0 %v1400_v8  ;;  %1425 = vmatprep.subr.bf16.mxu1 %v1424_v4  ;;  %v728_v2 = vld [vmem:[%s2299_s6 + $0xa0] sm:$0xff]  ;;  %v735_v6 = vld [vmem:[%s2299_s6 + $0xd8] sm:$0xff]  ;;  %s1267_s26 = sshll.u32 %s1732_s25, 10 }
  0x18   : > { %s1792_s29 = scalar_lea.vmem %s2293_s0, %s1253_s17  ;;  %s1831_s18 = scalar_lea.vmem %s2294_s1, %s1253_s17 }
  0x19   : > { %v445_v11 = vld [vmem:[%s1792_s29] sm:$0xff]  ;;  %v446_v25 = vld [vmem:[%s1792_s29 + $0x8] sm:$0xff]  ;;  %v447_v26 = vld [vmem:[%s1792_s29 + $0x10] sm:$0xff]  ;;  %s1173_s17 = sshll.u32 %s2225_s20, 4  ;;  %s2245_s28 = scalar_lea.hbm %s2305_s12, %s1267_s26  ;;  %s2247_s17 = int_to_ptr.vmem [resolvable:$true] %s1173_s17 }
  0x1a   : > { %1380 = vmatprep.mubr.f32.mxu0 %v445_v11  ;;  %1403 = vmatpush3.bf16.msra.mxu0 %v1400_v8  ;;  %v448_v27 = vld [vmem:[%s1792_s29 + $0x18] sm:$0xff]  ;;  %v449_v28 = vld [vmem:[%s1792_s29 + $0x20] sm:$0xff]  ;;  %v450_v29 = vld [vmem:[%s1792_s29 + $0x28] sm:$0xff]  ;;  %v1426_v8 = vpack.c.bf16 %v710_v5, %v708_v3  ;;  %s1578_s16 = scalar_lea.vmem %s2247_s17, 1024  ;;  %s1643_s25 = smov [#allocation2]  }
  0x1b   : > { %1405 = vmatprep.subr.bf16.mxu0 %v1404_v12  ;;  %v451_v30 = vld [vmem:[%s1792_s29 + $0x30] sm:$0xff]  ;;  %v452_v31 = vld [vmem:[%s1792_s29 + $0x38] sm:$0xff]  ;;  %v438_v34 = vld [vmem:[%s1831_s18 + $0x8] sm:$0xff]  ;;  %p1579_p11 = scmp.ne.s32.totalorder %s2247_s17, %s1578_s16 }
  0x1c   : > { %v437_v37 = vld [vmem:[%s1831_s18] sm:$0xff]  ;;  %v440_v42 = vld [vmem:[%s1831_s18 + $0x18] sm:$0xff]  ;;  %v439_v45 = vld [vmem:[%s1831_s18 + $0x10] sm:$0xff]  ;;  %1427 = vmatpush1.bf16.msra.mxu1 %v1426_v8 }
  0x1d   : > { %v442_v50 = vld [vmem:[%s1831_s18 + $0x28] sm:$0xff]  ;;  %v441_v53 = vld [vmem:[%s1831_s18 + $0x20] sm:$0xff]  ;;  %v444_v58 = vld [vmem:[%s1831_s18 + $0x38] sm:$0xff]  ;;  %1429 = vmatprep.subr.bf16.mxu1 %v1428_v9  ;;  %p1580_p12 = pnand %p1579_p11, %p1749_p5 }
  0x1e   : > { %1407 = vmatpush3.bf16.msra.mxu0 %v1404_v12  ;;  %v443_v61 = vld [vmem:[%s1831_s18 + $0x30] sm:$0xff]  ;;  %v717_v12 = vld [vmem:[%s2299_s6 + $0x48] sm:$0xff]  ;;  %v732_v8 = vld [vmem:[%s2299_s6 + $0xc0] sm:$0xff]  ;;  %s1582_s18 = sshll.u32 %s1643_s25, 4  ;;  %s1583_s18 = int_to_ptr.vmem [resolvable:$false] %s1582_s18 }
  0x1f   : > { %1409 = vmatprep.subr.bf16.mxu0 %v1408_v15  ;;  %v714_v11 = vld [vmem:[%s2299_s6 + $0x30] sm:$0xff]  ;;  %v733_v5 = vld [vmem:[%s2299_s6 + $0xc8] sm:$0xff]  ;;  %p1581_p13 = pneg %p1580_p12  ;;  %s1584_s19 = scalar_lea.vmem %s1583_s18, 2048 }
  0x20   : > { %v1430_v14 = vpack.c.bf16 %v714_v11, %v712_v10  ;;  %v730_v3 = vld [vmem:[%s2299_s6 + $0xb0] sm:$0xff]  ;;  %v1448_v7 = vpack.c.bf16 %v735_v6, %v733_v5  ;;  %v737_v11 = vld [vmem:[%s2299_s6 + $0xe8] sm:$0xff]  ;;  %p1585_p0 = scmp.lt.s32.totalorder %s2247_s17, %s1583_s18  ;;  %p1586_p1 = scmp.lt.s32.totalorder %s1584_s19, %s1578_s16 }
  0x21   : > { %v1446_v4 = vpack.c.bf16 %v730_v3, %v728_v2  ;;  %v734_v9 = vld [vmem:[%s2299_s6 + $0xd0] sm:$0xff] }
  0x22   : > { %1411 = vmatpush3.bf16.msra.mxu0 %v1408_v15  ;;  %v1432_v15 = vpack.c.bf16 %v719_v13, %v717_v12  ;;  %1431 = vmatpush1.bf16.msra.mxu1 %v1430_v14  ;;  %v1450_v10 = vpack.c.bf16 %v734_v9, %v732_v8  ;;  %v739_v12 = vld [vmem:[%s2299_s6 + $0xf8] sm:$0xff]  ;;  %v736_v14 = vld [vmem:[%s2299_s6 + $0xe0] sm:$0xff]  ;;  %p1587_p2 = por %p1586_p1, %p1585_p0 }
  0x23   : > { %1413 = vmatprep.subr.bf16.mxu0 %v1412_v18  ;;  %v1452_v13 = vpack.c.bf16 %v739_v12, %v737_v11 }
  0x24   : > { %1433 = vmatprep.subr.bf16.mxu1 %v1432_v15  ;;  %v738_v15 = vld [vmem:[%s2299_s6 + $0xf0] sm:$0xff]  ;;  %p1588_p3 = pnand %p1587_p2, %p1581_p13 }
  0x26   : > { %1415 = vmatpush3.bf16.msra.mxu0 %v1412_v18  ;;  %v1434_v18 = vpack.c.bf16 %v718_v17, %v716_v16  ;;  %v1454_v16 = vpack.c.bf16 %v738_v15, %v736_v14  ;;  %v1642_v17 = vmov 0.0  }
  0x27   : > { %1417 = vmatprep.subr.bf16.mxu0 %v1416_v21  ;;  %816 = vmatprep.mubr.f32.mxu1 %v1642_v17 }
  0x28   : > { %1435 = vmatpush1.bf16.msra.mxu1 %v1434_v18  ;;  %v897_v18 = vld [vmem:[%s2301_s8 + $0x80] sm:$0xff] }
  0x2a   : > { %1419 = vmatpush3.bf16.msra.mxu0 %v1416_v21 }
  0x2b   : > { %1421 = vmatprep.subr.bf16.mxu0 %v1420_v24 }
  0x2e   : > { %1423 = vmatpush3.bf16.msra.mxu0 %v1420_v24 }
  0x31   : > { %1381 = vmatmul.mubr.f32.vlgmr.msra.gmra.mrb[0].mxu0 %v446_v25 }
  0x32   : > { %1383 = vmatprep.mubr.f32.mxu0 %v447_v26 }
  0x35   : > { %1384 = vmatmul.mubr.f32.gmra.mrb[2].mxu0 %v448_v27 }
  0x36   : > { %1386 = vmatprep.mubr.f32.mxu0 %v449_v28 }
  0x39   : > { %1387 = vmatmul.mubr.f32.gmra.mrb[4].mxu0 %v450_v29 }
  0x3a   : > { %1389 = vmatprep.mubr.f32.mxu0 %v451_v30 }
  0x3d   : > { %1390 = vmatmul.mubr.f32.gmra.mrb[6].mxu0 %v452_v31 }
 0x104   : > { %v1382_v33 = vpop.f32.mrb[0].mxu0 }
 0x105   : > { %v548_v35 = vadd.f32 %v1382_v33, %v1256_v32  ;;  %v542_v36 = vpop.f32.mrb[1].mxu0 }
 0x106   : > { %v543_v38 = vadd.f32 %v1256_v32, %v542_v36 }
 0x107   : > { %v1838_v39 = vadd.f32 %v548_v35, %v438_v34 }
 0x108   : > { %v1385_v40 = vpop.f32.mrb[2].mxu0  ;;  %v581_v41 = vadd.f32 %v543_v38, %v437_v37 }
 0x109   : > { %v558_v43 = vadd.f32 %v1385_v40, %v1256_v32  ;;  %v552_v44 = vpop.f32.mrb[3].mxu0 }
 0x10a   : > { %v553_v46 = vadd.f32 %v1256_v32, %v552_v44  ;;  %591 = vadd.xlane.f32.xlu0 %v581_v41 }
 0x10b   : > { %v1842_v47 = vadd.f32 %v558_v43, %v440_v42 }
 0x10c   : > { %v1388_v48 = vpop.f32.mrb[4].mxu0  ;;  %v583_v49 = vadd.f32 %v553_v46, %v439_v45 }
 0x10d   : > { %v568_v51 = vadd.f32 %v1388_v48, %v1256_v32  ;;  %v562_v52 = vpop.f32.mrb[5].mxu0 }
 0x10e   : > { %v563_v54 = vadd.f32 %v1256_v32, %v562_v52  ;;  %595 = vadd.xlane.f32.xlu1 %v583_v49  ;;  %593 = vadd.xlane.f32.xlu0 %v1838_v39 }
 0x10f   : > { %v1847_v55 = vadd.f32 %v568_v51, %v442_v50  ;;  %v721_v50 = vld [vmem:[%s2299_s6 + $0x68] sm:$0xff]  ;;  %v723_v51 = vld [vmem:[%s2299_s6 + $0x78] sm:$0xff] }
 0x110   : > { %v1391_v56 = vpop.f32.mrb[6].mxu0  ;;  %v585_v57 = vadd.f32 %v563_v54, %v441_v53  ;;  %v1436_v52 = vpack.c.bf16 %v723_v51, %v721_v50  ;;  %v720_v53 = vld [vmem:[%s2299_s6 + $0x60] sm:$0xff]  ;;  %v722_v54 = vld [vmem:[%s2299_s6 + $0x70] sm:$0xff]  ;;  %v906_v50 = vld [vmem:[%s2301_s8 + $0xc8] sm:$0xff] }
 0x111   : > { %v578_v59 = vadd.f32 %v1391_v56, %v1256_v32  ;;  %v572_v60 = vpop.f32.mrb[7].mxu0  ;;  %v1438_v56 = vpack.c.bf16 %v722_v54, %v720_v53  ;;  %v889_v53 = vld [vmem:[%s2301_s8 + $0x40] sm:$0xff]  ;;  %v890_v54 = vld [vmem:[%s2301_s8 + $0x48] sm:$0xff] }
 0x112   : > { %v573_v62 = vadd.f32 %v1256_v32, %v572_v60  ;;  %597 = vadd.xlane.f32.xlu1 %v1842_v47  ;;  %599 = vadd.xlane.f32.xlu0 %v585_v57  ;;  %v724_v60 = vld [vmem:[%s2299_s6 + $0x80] sm:$0xff] }
 0x113   : > { %v1852_v63 = vadd.f32 %v578_v59, %v444_v58  ;;  %1437 = vmatprep.subr.bf16.mxu1 %v1436_v52  ;;  %v727_v58 = vld [vmem:[%s2299_s6 + $0x98] sm:$0xff] }
 0x114   : > { %v587_v0 = vadd.f32 %v573_v62, %v443_v61  ;;  %1439 = vmatpush1.bf16.msra.mxu1 %v1438_v56  ;;  %v726_v61 = vld [vmem:[%s2299_s6 + $0x90] sm:$0xff]  ;;  %v908_v56 = vld [vmem:[%s2301_s8 + $0xd8] sm:$0xff] }
 0x115   : > { %v1442_v62 = vpack.c.bf16 %v726_v61, %v724_v60  ;;  %v892_v60 = vld [vmem:[%s2301_s8 + $0x58] sm:$0xff]  ;;  %v909_v61 = vld [vmem:[%s2301_s8 + $0xe0] sm:$0xff] }
 0x116   : > { %601 = vadd.xlane.f32.xlu1 %v1847_v55  ;;  %603 = vadd.xlane.f32.xlu0 %v587_v0 }
 0x11a   : > { %605 = vadd.xlane.f32.xlu1 %v1852_v63 }
 0x197   : > { %v592_v19 = vpop.xlane.xlu0 %591 }
 0x198   : > { %v608_v20 = vmul.f32 0.0078125, %v592_v19  ;;  %v898_v19 = vld [vmem:[%s2301_s8 + $0x88] sm:$0xff] }
 0x19a   : > { %v1892_v21 = vsub.f32 %v581_v41, %v608_v20  ;;  %v881_v20 = vld [vmem:[%s2301_s8] sm:$0xff] }
 0x19b   : > { %v596_v22 = vpop.xlane.xlu1 %595  ;;  %v594_v23 = vpop.xlane.xlu0 %593 }
 0x19c   : > { %v610_v24 = vmul.f32 0.0078125, %v596_v22  ;;  %v609_v25 = vmul.f32 0.0078125, %v594_v23  ;;  %v624_v26 = vmul.f32 %v1892_v21, %v1892_v21  ;;  %v1456_v22 = vpack.c.bf16 %v898_v19, %v897_v18  ;;  %v882_v23 = vld [vmem:[%s2301_s8 + $0x8] sm:$0xff] }
 0x19e   : > { %v1896_v27 = vsub.f32 %v583_v49, %v610_v24  ;;  %v1899_v28 = vsub.f32 %v1838_v39, %v609_v25  ;;  %632 = vadd.xlane.f32.xlu0 %v624_v26  ;;  %v899_v24 = vld [vmem:[%s2301_s8 + $0x90] sm:$0xff]  ;;  %v900_v25 = vld [vmem:[%s2301_s8 + $0x98] sm:$0xff]  ;;  %v2007_v26 = vpack.c.bf16 %v882_v23, %v881_v20  ;;  %1457 = vmatprep.subr.bf16.mxu0 %v1456_v22 }
 0x19f   : > { %v598_v29 = vpop.xlane.xlu1 %597  ;;  %v600_v30 = vpop.xlane.xlu0 %599 }
 0x1a0   : > { %v611_v31 = vmul.f32 0.0078125, %v598_v29  ;;  %v612_v32 = vmul.f32 0.0078125, %v600_v30  ;;  %v626_v33 = vmul.f32 %v1896_v27, %v1896_v27  ;;  %v625_v34 = vmul.f32 %v1899_v28, %v1899_v28  ;;  %v883_v30 = vld [vmem:[%s2301_s8 + $0x10] sm:$0xff]  ;;  %1459 = vmatpush3.bf16.msra.mxu0 %v2007_v26 }
 0x1a1   : > { %v2009_v29 = vpack.c.bf16 %v900_v25, %v899_v24  ;;  %v1257_v24 = vld [vmem:[%s2297_s4] ss:$0 sm:$0xff] }
 0x1a2   : > { %v1906_v35 = vsub.f32 %v1842_v47, %v611_v31  ;;  %v1908_v36 = vsub.f32 %v585_v57, %v612_v32  ;;  %636 = vadd.xlane.f32.xlu0 %v626_v33  ;;  %634 = vadd.xlane.f32.xlu1 %v625_v34  ;;  %v725_v57 = vld [vmem:[%s2299_s6 + $0x88] sm:$0xff]  ;;  %v884_v31 = vld [vmem:[%s2301_s8 + $0x18] sm:$0xff]  ;;  %v901_v32 = vld [vmem:[%s2301_s8 + $0xa0] sm:$0xff] }
 0x1a3   : > { %v602_v37 = vpop.xlane.xlu1 %601  ;;  %v604_v38 = vpop.xlane.xlu0 %603  ;;  %v1440_v59 = vpack.c.bf16 %v727_v58, %v725_v57  ;;  %v902_v33 = vld [vmem:[%s2301_s8 + $0xa8] sm:$0xff]  ;;  %v2024_v34 = vpack.c.bf16 %v884_v31, %v883_v30  ;;  %1461 = vmatprep.subr.bf16.mxu0 %v2009_v29  ;;  %v2078_v57 = vpack.c.bf16 %v890_v54, %v889_v53  ;;  %v1258_v31 = vld [vmem:[%s2298_s5] ss:$0 sm:$0xff] }
 0x1a4   : > { %v613_v39 = vmul.f32 0.0078125, %v602_v37  ;;  %v614_v40 = vmul.f32 0.0078125, %v604_v38  ;;  %v627_v41 = vmul.f32 %v1906_v35, %v1906_v35  ;;  %v628_v42 = vmul.f32 %v1908_v36, %v1908_v36  ;;  %v885_v38 = vld [vmem:[%s2301_s8 + $0x20] sm:$0xff] }
 0x1a5   : > { %1441 = vmatprep.subr.bf16.mxu1 %v1440_v59  ;;  %v2027_v37 = vpack.c.bf16 %v902_v33, %v901_v32  ;;  %1463 = vmatpush3.bf16.msra.mxu0 %v2024_v34  ;;  %v891_v59 = vld [vmem:[%s2301_s8 + $0x50] sm:$0xff] }
 0x1a6   : > { %v1915_v43 = vsub.f32 %v1847_v55, %v613_v39  ;;  %v1917_v44 = vsub.f32 %v587_v0, %v614_v40  ;;  %638 = vadd.xlane.f32.xlu1 %v627_v41  ;;  %640 = vadd.xlane.f32.xlu0 %v628_v42  ;;  %v731_v0 = vld [vmem:[%s2299_s6 + $0xb8] sm:$0xff]  ;;  %v886_v39 = vld [vmem:[%s2301_s8 + $0x28] sm:$0xff]  ;;  %v903_v40 = vld [vmem:[%s2301_s8 + $0xb0] sm:$0xff] }
 0x1a7   : > { %v606_v45 = vpop.xlane.xlu1 %605  ;;  %1443 = vmatpush1.bf16.msra.mxu1 %v1442_v62  ;;  %v904_v41 = vld [vmem:[%s2301_s8 + $0xb8] sm:$0xff]  ;;  %v2042_v42 = vpack.c.bf16 %v886_v39, %v885_v38  ;;  %1465 = vmatprep.subr.bf16.mxu0 %v2027_v37  ;;  %v910_v62 = vld [vmem:[%s2301_s8 + $0xe8] sm:$0xff] }
 0x1a8   : > { %v615_v46 = vmul.f32 0.0078125, %v606_v45  ;;  %v629_v47 = vmul.f32 %v1915_v43, %v1915_v43  ;;  %v630_v48 = vmul.f32 %v1917_v44, %v1917_v44  ;;  %v2045_v45 = vpack.c.bf16 %v904_v41, %v903_v40 }
 0x1a9   : > { %1467 = vmatpush3.bf16.msra.mxu0 %v2042_v42 }
 0x1aa   : > { %v1924_v49 = vsub.f32 %v1852_v63, %v615_v46  ;;  %642 = vadd.xlane.f32.xlu1 %v629_v47  ;;  %644 = vadd.xlane.f32.xlu0 %v630_v48  ;;  %v729_v63 = vld [vmem:[%s2299_s6 + $0xa8] sm:$0xff]  ;;  %v887_v46 = vld [vmem:[%s2301_s8 + $0x30] sm:$0xff]  ;;  %v888_v47 = vld [vmem:[%s2301_s8 + $0x38] sm:$0xff] }
 0x1ab   : > { %v1444_v1 = vpack.c.bf16 %v731_v0, %v729_v63  ;;  %v905_v48 = vld [vmem:[%s2301_s8 + $0xc0] sm:$0xff]  ;;  %v2060_v51 = vpack.c.bf16 %v888_v47, %v887_v46  ;;  %1469 = vmatprep.subr.bf16.mxu0 %v2045_v45  ;;  %v2096_v63 = vpack.c.bf16 %v892_v60, %v891_v59  ;;  %v2099_v0 = vpack.c.bf16 %v910_v62, %v909_v61 }
 0x1ac   : > { %v631_v55 = vmul.f32 %v1924_v49, %v1924_v49  ;;  %v2063_v52 = vpack.c.bf16 %v906_v50, %v905_v48 }
 0x1ad   : > { %1445 = vmatprep.subr.bf16.mxu1 %v1444_v1  ;;  %1471 = vmatpush3.bf16.msra.mxu0 %v2060_v51 }
 0x1ae   : > { %646 = vadd.xlane.f32.xlu1 %v631_v55  ;;  %1447 = vmatpush1.bf16.msra.mxu1 %v1446_v4  ;;  %v907_v55 = vld [vmem:[%s2301_s8 + $0xd0] sm:$0xff] }
 0x1af   : > { %1449 = vmatprep.subr.bf16.mxu1 %v1448_v7  ;;  %1473 = vmatprep.subr.bf16.mxu0 %v2063_v52  ;;  %v2081_v58 = vpack.c.bf16 %v908_v56, %v907_v55 }
 0x1b1   : > { %1475 = vmatpush3.bf16.msra.mxu0 %v2078_v57 }
 0x1b2   : > { %1451 = vmatpush1.bf16.msra.mxu1 %v1450_v10  ;;  %1477 = vmatprep.subr.bf16.mxu0 %v2081_v58 }
 0x1b3   : > { %1453 = vmatprep.subr.bf16.mxu1 %v1452_v13 }
 0x1b5   : > { %1479 = vmatpush3.bf16.msra.mxu0 %v2096_v63 }
 0x1b6   : > { %1455 = vmatpush1.bf16.msra.mxu1 %v1454_v16  ;;  %1481 = vmatprep.subr.bf16.mxu0 %v2099_v0 }
 0x1b7   : > { %1488 = vmatprep.subr.bf16.mxu1 %v1456_v22 }
 0x22b   : > { %v633_v1 = vpop.xlane.xlu0 %632 }
 0x22c   : > { %v648_v2 = vmul.f32 0.0078125, %v633_v1  ;;  %v895_v1 = vld [vmem:[%s2301_s8 + $0x70] sm:$0xff] }
 0x22e   : > { %v656_v3 = vadd.f32 1e-05, %v648_v2  ;;  %v896_v2 = vld [vmem:[%s2301_s8 + $0x78] sm:$0xff] }
 0x22f   : > { %v635_v4 = vpop.xlane.xlu1 %634  ;;  %v637_v5 = vpop.xlane.xlu0 %636 }
 0x230   : > { %1546 = vrsqrt.f32 %v656_v3  ;;  %v649_v6 = vmul.f32 0.0078125, %v635_v4  ;;  %v650_v7 = vmul.f32 0.0078125, %v637_v5  ;;  %v1486_v3 = vpack.c.bf16 %v896_v2, %v895_v1 }
 0x231   : > { %v742_v4 = vlaneseq }
 0x232   : > { %v657_v8 = vadd.f32 1e-05, %v649_v6  ;;  %v658_v9 = vadd.f32 1e-05, %v650_v7  ;;  %v740_v7 = vld [vmem:[%s2300_s7] sm:$0x3] }
 0x233   : > { %v639_v10 = vpop.xlane.xlu1 %638  ;;  %v641_v11 = vpop.xlane.xlu0 %640  ;;  %v743_v5 = vshrl.u32 %v742_v4, 7  ;;  %v1259_v4 = vld [vmem:[%s2302_s9] ss:$0 sm:$0xff] }
 0x234   : > { %1548 = vrsqrt.f32 %v657_v8  ;;  %v651_v12 = vmul.f32 0.0078125, %v639_v10  ;;  %v652_v13 = vmul.f32 0.0078125, %v641_v11 }
 0x235   : > { %1550 = vrsqrt.f32 %v658_v9  ;;  %v744_v6 = vsub.s32 0, %v743_v5  ;;  %v748_v8 = vsub.s32 1, %v743_v5 }
 0x236   : > { %v659_v14 = vadd.f32 1e-05, %v651_v12  ;;  %v660_v15 = vadd.f32 1e-05, %v652_v13 }
 0x237   : > { %v643_v16 = vpop.xlane.xlu1 %642  ;;  %v645_v18 = vpop.xlane.xlu0 %644  ;;  %v745_v9 = vrot.slane %v740_v7, %v744_v6  ;;  %v749_v10 = vrot.slane %v740_v7, %v748_v8 }
 0x238   : > { %1552 = vrsqrt.f32 %v659_v14  ;;  %v653_v19 = vmul.f32 0.0078125, %v643_v16  ;;  %v654_v23 = vmul.f32 0.0078125, %v645_v18 }
 0x239   : > { %1554 = vrsqrt.f32 %v660_v15 }
 0x23a   : > { %v1547_v20 = vpop.eup %1546  ;;  %v661_v22 = vadd.f32 1e-05, %v653_v19  ;;  %v662_v38 = vadd.f32 1e-05, %v654_v23 }
 0x23b   : > { %v647_v25 = vpop.xlane.xlu1 %646  ;;  %v672_v30 = vmul.f32 %v1547_v20, %v1892_v21 }
 0x23c   : > { %1556 = vrsqrt.f32 %v661_v22  ;;  %v655_v39 = vmul.f32 0.0078125, %v647_v25 }
 0x23d   : > { %v686_v32 = vmul.f32 %v1257_v24, %v672_v30  ;;  %1558 = vrsqrt.f32 %v662_v38 }
 0x23e   : > { %v1549_v33 = vpop.eup %1548  ;;  %v663_v50 = vadd.f32 1e-05, %v655_v39 }
 0x23f   : > { %v1551_v40 = vpop.eup %1550  ;;  %v2110_v41 = vadd.f32 %v1258_v31, %v686_v32  ;;  %v673_v46 = vmul.f32 %v1549_v33, %v1899_v28 }
 0x240   : > { %v674_v47 = vmul.f32 %v1551_v40, %v1896_v27  ;;  %1560 = vrsqrt.f32 %v663_v50 }
 0x241   : > { %817 = vmatmul.mubr.f32.vlgmr.msra.gmra.mrb[0].mxu1 %v2110_v41  ;;  %v687_v48 = vmul.f32 %v1257_v24, %v673_v46 }
 0x242   : > { %v1553_v21 = vpop.eup %1552  ;;  %822 = vmatprep.mubr.f32.mxu1 %v1642_v17  ;;  %1496 = vmatpush3.bf16.msra.mxu1 %v2007_v26  ;;  %v688_v54 = vmul.f32 %v1257_v24, %v674_v47 }
 0x243   : > { %v2117_v53 = vadd.f32 %v1258_v31, %v687_v48  ;;  %v675_v55 = vmul.f32 %v1553_v21, %v1906_v35  ;;  %1489 = vmatprep.subr.bf16.mxu1 %v2009_v29  ;;  %v1555_v28 = vpop.eup %1554 }
 0x244   : > { %v2124_v27 = vadd.f32 %v1258_v31, %v688_v54  ;;  %v676_v26 = vmul.f32 %v1555_v28, %v1908_v36 }
 0x245   : > { %823 = vmatmul.mubr.f32.gmra.mrb[2].mxu1 %v2117_v53  ;;  %v689_v56 = vmul.f32 %v1257_v24, %v675_v55 }
 0x246   : > { %828 = vmatprep.mubr.f32.mxu1 %v1642_v17  ;;  %1497 = vmatpush3.bf16.msra.mxu1 %v2024_v34  ;;  %v1557_v59 = vpop.eup %1556  ;;  %v690_v29 = vmul.f32 %v1257_v24, %v676_v26 }
 0x247   : > { %1490 = vmatprep.subr.bf16.mxu1 %v2027_v37  ;;  %v2131_v35 = vadd.f32 %v1258_v31, %v689_v56  ;;  %v677_v60 = vmul.f32 %v1557_v59, %v1915_v43  ;;  %v1559_v34 = vpop.eup %1558 }
 0x248   : > { %v2138_v36 = vadd.f32 %v1258_v31, %v690_v29  ;;  %v678_v61 = vmul.f32 %v1559_v34, %v1917_v44 }
 0x249   : > { %829 = vmatmul.mubr.f32.gmra.mrb[4].mxu1 %v2124_v27  ;;  %v691_v37 = vmul.f32 %v1257_v24, %v677_v60 }
 0x24a   : > { %834 = vmatprep.mubr.f32.mxu1 %v1642_v17  ;;  %1498 = vmatpush3.bf16.msra.mxu1 %v2042_v42  ;;  %v1561_v42 = vpop.eup %1560 }
 0x24b   : > { %1491 = vmatprep.subr.bf16.mxu1 %v2045_v45  ;;  %v2145_v43 = vadd.f32 %v1258_v31, %v691_v37  ;;  %v692_v45 = vmul.f32 %v1257_v24, %v678_v61  ;;  %v679_v62 = vmul.f32 %v1561_v42, %v1924_v49  ;;  %v893_v49 = vld [vmem:[%s2301_s8 + $0x60] sm:$0xff] }
 0x24d   : > { %835 = vmatmul.mubr.f32.gmra.mrb[6].mxu1 %v2131_v35  ;;  %v2152_v44 = vadd.f32 %v1258_v31, %v692_v45 }
 0x24e   : > { %840 = vmatprep.mubr.f32.mxu1 %v1642_v17  ;;  %1499 = vmatpush3.bf16.msra.mxu1 %v2060_v51  ;;  %v693_v51 = vmul.f32 %v1257_v24, %v679_v62 }
 0x24f   : > { %1492 = vmatprep.subr.bf16.mxu1 %v2063_v52 }
 0x250   : > { %v2157_v52 = vadd.f32 %v1258_v31, %v693_v51 }
 0x251   : > { %841 = vmatmul.mubr.f32.gmra.mrb[8].mxu1 %v2138_v36 }
 0x252   : > { %846 = vmatprep.mubr.f32.mxu1 %v1642_v17  ;;  %1500 = vmatpush3.bf16.msra.mxu1 %v2078_v57  ;;  %v894_v57 = vld [vmem:[%s2301_s8 + $0x68] sm:$0xff] }
 0x253   : > { %1493 = vmatprep.subr.bf16.mxu1 %v2081_v58  ;;  %v1482_v58 = vpack.c.bf16 %v894_v57, %v893_v49 }
 0x255   : > { %847 = vmatmul.mubr.f32.gmra.mrb[10].mxu1 %v2145_v43  ;;  %1483 = vmatpush3.bf16.msra.mxu0 %v1482_v58 }
 0x256   : > { %852 = vmatprep.mubr.f32.mxu1 %v1642_v17  ;;  %1501 = vmatpush3.bf16.msra.mxu1 %v2096_v63  ;;  %v911_v63 = vld [vmem:[%s2301_s8 + $0xf0] sm:$0xff] }
 0x257   : > { %1494 = vmatprep.subr.bf16.mxu1 %v2099_v0 }
 0x259   : > { %853 = vmatmul.mubr.f32.gmra.mrb[12].mxu1 %v2152_v44 }
 0x25a   : > { %858 = vmatprep.mubr.f32.mxu1 %v1642_v17  ;;  %v912_v17 = vld [vmem:[%s2301_s8 + $0xf8] sm:$0xff]  ;;  %1502 = vmatpush3.bf16.msra.mxu1 %v1482_v58 }
 0x25b   : > { %v1484_v0 = vpack.c.bf16 %v912_v17, %v911_v63 }
 0x25d   : > { %859 = vmatmul.mubr.f32.gmra.mrb[14].mxu1 %v2157_v52  ;;  %1485 = vmatprep.subr.bf16.mxu0 %v1484_v0 }
 0x25e   : > { %1495 = vmatprep.subr.bf16.mxu1 %v1484_v0  ;;  %1487 = vmatpush3.bf16.msra.mxu0 %v1486_v3 }
 0x25f   : > { %1503 = vmatpush3.bf16.msra.mxu1 %v1486_v3 }
 0x314   : > { %v818_v11 = vpop.f32.mrb[0].mxu1 }
 0x315   : > { %v819_v12 = vadd.f32 %v818_v11, %v745_v9  ;;  %v820_v13 = vpop.f32.mrb[1].mxu1 }
 0x316   : > { %v821_v14 = vadd.f32 %v820_v13, %v749_v10 }
 0x317   : > { %v865_v18 = vmax.f32 %v819_v12, 0.0 }
 0x318   : > { %v866_v15 = vmax.f32 %v821_v14, 0.0  ;;  %v824_v16 = vpop.f32.mrb[2].mxu1 }
 0x319   : > { %v825_v19 = vadd.f32 %v824_v16, %v745_v9  ;;  %v826_v20 = vpop.f32.mrb[3].mxu1 }
 0x31a   : > { %v827_v22 = vadd.f32 %v826_v20, %v749_v10  ;;  %984 = vmatprep.mubr.f32.mxu0 %v866_v15 }
 0x31b   : > { %985 = vmatmul.mubr.f32.vlgmr.msra.gmra.mrb[8].mxu0 %v865_v18  ;;  %v867_v25 = vmax.f32 %v825_v19, 0.0 }
 0x31c   : > { %v868_v23 = vmax.f32 %v827_v22, 0.0  ;;  %v830_v24 = vpop.f32.mrb[4].mxu1 }
 0x31d   : > { %v831_v30 = vadd.f32 %v830_v24, %v745_v9  ;;  %v832_v31 = vpop.f32.mrb[5].mxu1 }
 0x31e   : > { %v833_v32 = vadd.f32 %v832_v31, %v749_v10  ;;  %989 = vmatprep.mubr.f32.mxu0 %v868_v23 }
 0x31f   : > { %990 = vmatmul.mubr.f32.gmra.mrb[10].mxu0 %v867_v25  ;;  %v869_v39 = vmax.f32 %v831_v30, 0.0 }
 0x320   : > { %v870_v33 = vmax.f32 %v833_v32, 0.0  ;;  %v836_v38 = vpop.f32.mrb[6].mxu1 }
 0x321   : > { %v837_v40 = vadd.f32 %v836_v38, %v745_v9  ;;  %v838_v46 = vpop.f32.mrb[7].mxu1 }
 0x322   : > { %v839_v47 = vadd.f32 %v838_v46, %v749_v10  ;;  %994 = vmatprep.mubr.f32.mxu0 %v870_v33 }
 0x323   : > { %995 = vmatmul.mubr.f32.gmra.mrb[12].mxu0 %v869_v39  ;;  %v871_v50 = vmax.f32 %v837_v40, 0.0 }
 0x324   : > { %v872_v48 = vmax.f32 %v839_v47, 0.0  ;;  %v842_v21 = vpop.f32.mrb[8].mxu1 }
 0x325   : > { %v843_v54 = vadd.f32 %v842_v21, %v745_v9  ;;  %v844_v55 = vpop.f32.mrb[9].mxu1 }
 0x326   : > { %v845_v28 = vadd.f32 %v844_v55, %v749_v10  ;;  %999 = vmatprep.mubr.f32.mxu0 %v872_v48 }
 0x327   : > { %1000 = vmatmul.mubr.f32.gmra.mrb[14].mxu0 %v871_v50  ;;  %v873_v59 = vmax.f32 %v843_v54, 0.0 }
 0x328   : > { %v874_v56 = vmax.f32 %v845_v28, 0.0  ;;  %v848_v26 = vpop.f32.mrb[10].mxu1 }
 0x329   : > { %v849_v29 = vadd.f32 %v848_v26, %v745_v9  ;;  %v850_v60 = vpop.f32.mrb[11].mxu1 }
 0x32a   : > { %v851_v34 = vadd.f32 %v850_v60, %v749_v10  ;;  %1004 = vmatprep.mubr.f32.mxu1 %v874_v56 }
 0x32b   : > { %1005 = vmatmul.mubr.f32.vlgmr.msra.gmra.mrb[16].mxu1 %v873_v59  ;;  %v875_v42 = vmax.f32 %v849_v29, 0.0 }
 0x32c   : > { %v876_v37 = vmax.f32 %v851_v34, 0.0  ;;  %v854_v61 = vpop.f32.mrb[12].mxu1 }
 0x32d   : > { %v855_v45 = vadd.f32 %v854_v61, %v745_v9  ;;  %v856_v62 = vpop.f32.mrb[13].mxu1 }
 0x32e   : > { %v857_v51 = vadd.f32 %v856_v62, %v749_v10  ;;  %1009 = vmatprep.mubr.f32.mxu1 %v876_v37 }
 0x32f   : > { %1010 = vmatmul.mubr.f32.gmra.mrb[18].mxu1 %v875_v42  ;;  %v877_v58 = vmax.f32 %v855_v45, 0.0 }
 0x330   : > { %v878_v49 = vmax.f32 %v857_v51, 0.0  ;;  %v860_v57 = vpop.f32.mrb[14].mxu1 }
 0x331   : > { %v861_v63 = vadd.f32 %v860_v57, %v745_v9  ;;  %v862_v17 = vpop.f32.mrb[15].mxu1 }
 0x332   : > { %v863_v0 = vadd.f32 %v862_v17, %v749_v10  ;;  %1014 = vmatprep.mubr.f32.mxu1 %v878_v49 }
 0x333   : > { %1015 = vmatmul.mubr.f32.gmra.mrb[20].mxu1 %v877_v58  ;;  %v879_v2 = vmax.f32 %v861_v63, 0.0 }
 0x334   : > { %v880_v1 = vmax.f32 %v863_v0, 0.0 }
 0x336   : > { %1019 = vmatprep.mubr.f32.mxu1 %v880_v1 }
 0x337   : > { %1020 = vmatmul.mubr.f32.gmra.mrb[22].mxu1 %v879_v2 }
 0x3ee   : > { %v1324_v3 = vpop.f32.mrb[8].mxu0 }
 0x3ef   : > { %v1325_v5 = vpop.f32.mrb[9].mxu0 }
 0x3f0   : > { %v1326_v6 = vadd.f32 %v1325_v5, %v1324_v3 }
 0x3f2   : > { %v987_v7 = vadd.f32 %v1326_v6, %v1259_v4  ;;  %v1327_v8 = vpop.f32.mrb[10].mxu0 }
 0x3f3   : > { %v1328_v11 = vpop.f32.mrb[11].mxu0 }
 0x3f4   : > { %v1329_v12 = vadd.f32 %v1328_v11, %v1327_v8  ;;  %v1025_v9 = vadd.f32 %v987_v7, %v2110_v41 }
 0x3f6   : > { %v992_v10 = vadd.f32 %v1329_v12, %v1259_v4  ;;  %1035 = vadd.xlane.f32.xlu0 %v1025_v9  ;;  %v1330_v13 = vpop.f32.mrb[12].mxu0 }
 0x3f7   : > { %v1331_v14 = vpop.f32.mrb[13].mxu0 }
 0x3f8   : > { %v1332_v15 = vadd.f32 %v1331_v14, %v1330_v13  ;;  %v1026_v16 = vadd.f32 %v992_v10, %v2117_v53 }
 0x3fa   : > { %v997_v18 = vadd.f32 %v1332_v15, %v1259_v4  ;;  %1037 = vadd.xlane.f32.xlu1 %v1026_v16  ;;  %v1333_v19 = vpop.f32.mrb[14].mxu0 }
 0x3fb   : > { %v1334_v20 = vpop.f32.mrb[15].mxu0 }
 0x3fc   : > { %v1335_v22 = vadd.f32 %v1334_v20, %v1333_v19  ;;  %v1027_v23 = vadd.f32 %v997_v18, %v2124_v27 }
 0x3fe   : > { %v1002_v24 = vadd.f32 %v1335_v22, %v1259_v4  ;;  %1039 = vadd.xlane.f32.xlu0 %v1027_v23  ;;  %v1336_v25 = vpop.f32.mrb[16].mxu1 }
 0x3ff   : > { %v1337_v30 = vpop.f32.mrb[17].mxu1 }
 0x400   : > { %v1338_v31 = vadd.f32 %v1337_v30, %v1336_v25  ;;  %v1028_v41 = vadd.f32 %v1002_v24, %v2131_v35  ;;  %v1260_v30 = vld [vmem:[%s2303_s10] ss:$0 sm:$0xff] }
 0x402   : > { %v1007_v32 = vadd.f32 %v1338_v31, %v1259_v4  ;;  %1041 = vadd.xlane.f32.xlu1 %v1028_v41  ;;  %v1339_v33 = vpop.f32.mrb[18].mxu1 }
 0x403   : > { %v1340_v38 = vpop.f32.mrb[19].mxu1 }
 0x404   : > { %v1341_v39 = vadd.f32 %v1340_v38, %v1339_v33  ;;  %v1029_v53 = vadd.f32 %v1007_v32, %v2138_v36  ;;  %v1261_v33 = vld [vmem:[%s2304_s11] ss:$0 sm:$0xff] }
 0x406   : > { %v1012_v40 = vadd.f32 %v1341_v39, %v1259_v4  ;;  %1043 = vadd.xlane.f32.xlu0 %v1029_v53  ;;  %v1342_v46 = vpop.f32.mrb[20].mxu1 }
 0x407   : > { %v1343_v47 = vpop.f32.mrb[21].mxu1 }
 0x408   : > { %v1344_v48 = vadd.f32 %v1343_v47, %v1342_v46  ;;  %v1030_v27 = vadd.f32 %v1012_v40, %v2145_v43 }
 0x40a   : > { %v1017_v21 = vadd.f32 %v1344_v48, %v1259_v4  ;;  %1045 = vadd.xlane.f32.xlu1 %v1030_v27  ;;  %v1345_v50 = vpop.f32.mrb[22].mxu1 }
 0x40b   : > { %v1346_v54 = vpop.f32.mrb[23].mxu1 }
 0x40c   : > { %v1347_v55 = vadd.f32 %v1346_v54, %v1345_v50  ;;  %v1031_v35 = vadd.f32 %v1017_v21, %v2152_v44 }
 0x40e   : > { %v1022_v28 = vadd.f32 %v1347_v55, %v1259_v4  ;;  %1047 = vadd.xlane.f32.xlu0 %v1031_v35 }
 0x410   : > { %v1032_v56 = vadd.f32 %v1022_v28, %v2157_v52 }
 0x412   : > { %1049 = vadd.xlane.f32.xlu1 %v1032_v56 }
 0x483   : > { %v1036_v36 = vpop.xlane.xlu0 %1035 }
 0x484   : > { %v1051_v26 = vmul.f32 0.0078125, %v1036_v36 }
 0x486   : > { %v1059_v59 = vsub.f32 %v1025_v9, %v1051_v26 }
 0x487   : > { %v1038_v29 = vpop.xlane.xlu1 %1037 }
 0x488   : > { %v1052_v60 = vmul.f32 0.0078125, %v1038_v29  ;;  %v1067_v34 = vmul.f32 %v1059_v59, %v1059_v59 }
 0x48a   : > { %v1060_v37 = vsub.f32 %v1026_v16, %v1052_v60  ;;  %1075 = vadd.xlane.f32.xlu0 %v1067_v34 }
 0x48b   : > { %v1040_v43 = vpop.xlane.xlu0 %1039 }
 0x48c   : > { %v1053_v61 = vmul.f32 0.0078125, %v1040_v43  ;;  %v1068_v42 = vmul.f32 %v1060_v37, %v1060_v37 }
 0x48e   : > { %v2192_v45 = vsub.f32 %v1027_v23, %v1053_v61  ;;  %1077 = vadd.xlane.f32.xlu1 %v1068_v42 }
 0x48f   : > { %v1042_v44 = vpop.xlane.xlu1 %1041 }
 0x490   : > { %v1054_v62 = vmul.f32 0.0078125, %v1042_v44  ;;  %v1069_v52 = vmul.f32 %v2192_v45, %v2192_v45 }
 0x492   : > { %v2196_v51 = vsub.f32 %v1028_v41, %v1054_v62  ;;  %1079 = vadd.xlane.f32.xlu0 %v1069_v52 }
 0x493   : > { %v1044_v49 = vpop.xlane.xlu0 %1043 }
 0x494   : > { %v1055_v57 = vmul.f32 0.0078125, %v1044_v49  ;;  %v1070_v58 = vmul.f32 %v2196_v51, %v2196_v51 }
 0x496   : > { %v2200_v63 = vsub.f32 %v1029_v53, %v1055_v57  ;;  %1081 = vadd.xlane.f32.xlu1 %v1070_v58 }
 0x497   : > { %v1046_v17 = vpop.xlane.xlu1 %1045 }
 0x498   : > { %v1056_v0 = vmul.f32 0.0078125, %v1046_v17  ;;  %v1071_v1 = vmul.f32 %v2200_v63, %v2200_v63 }
 0x49a   : > { %v2204_v2 = vsub.f32 %v1030_v27, %v1056_v0  ;;  %1083 = vadd.xlane.f32.xlu0 %v1071_v1 }
 0x49b   : > { %v1048_v3 = vpop.xlane.xlu0 %1047 }
 0x49c   : > { %v1057_v4 = vmul.f32 0.0078125, %v1048_v3  ;;  %v1072_v5 = vmul.f32 %v2204_v2, %v2204_v2 }
 0x49e   : > { %v2208_v6 = vsub.f32 %v1031_v35, %v1057_v4  ;;  %1085 = vadd.xlane.f32.xlu1 %v1072_v5 }
 0x49f   : > { %v1050_v7 = vpop.xlane.xlu1 %1049 }
 0x4a0   : > { %v1058_v8 = vmul.f32 0.0078125, %v1050_v7  ;;  %v1073_v11 = vmul.f32 %v2208_v6, %v2208_v6 }
 0x4a2   : > { %v2212_v12 = vsub.f32 %v1032_v56, %v1058_v8  ;;  %1087 = vadd.xlane.f32.xlu0 %v1073_v11 }
 0x4a4   : > { %v1074_v9 = vmul.f32 %v2212_v12, %v2212_v12 }
 0x4a6   : > { %1089 = vadd.xlane.f32.xlu1 %v1074_v9 }
 0x517   : > { %v1076_v10 = vpop.xlane.xlu0 %1075 }
 0x518   : > { %v1091_v13 = vmul.f32 0.0078125, %v1076_v10 }
 0x51a   : > { %v1099_v14 = vadd.f32 1e-05, %v1091_v13 }
 0x51b   : > { %v1078_v15 = vpop.xlane.xlu1 %1077 }
 0x51c   : > { %1562 = vrsqrt.f32 %v1099_v14  ;;  %v1092_v16 = vmul.f32 0.0078125, %v1078_v15 }
 0x51e   : > { %v1100_v18 = vadd.f32 1e-05, %v1092_v16 }
 0x51f   : > { %v1080_v19 = vpop.xlane.xlu0 %1079 }
 0x520   : > { %1564 = vrsqrt.f32 %v1100_v18  ;;  %v1093_v20 = vmul.f32 0.0078125, %v1080_v19 }
 0x522   : > { %v1101_v22 = vadd.f32 1e-05, %v1093_v20 }
 0x523   : > { %v1082_v23 = vpop.xlane.xlu1 %1081 }
 0x524   : > { %1566 = vrsqrt.f32 %v1101_v22  ;;  %v1094_v24 = vmul.f32 0.0078125, %v1082_v23 }
 0x526   : > { %v1563_v25 = vpop.eup %1562  ;;  %v1102_v31 = vadd.f32 1e-05, %v1094_v24 }
 0x527   : > { %v1115_v41 = vmul.f32 %v1563_v25, %v1059_v59  ;;  %v1084_v32 = vpop.xlane.xlu0 %1083 }
 0x528   : > { %1568 = vrsqrt.f32 %v1102_v31  ;;  %v1095_v38 = vmul.f32 0.0078125, %v1084_v32 }
 0x529   : > { %v1129_v39 = vmul.f32 %v1260_v30, %v1115_v41 }
 0x52a   : > { %v1565_v53 = vpop.eup %1564  ;;  %v1103_v40 = vadd.f32 1e-05, %v1095_v38 }
 0x52b   : > { %v1143_v46 = vadd.f32 %v1261_v33, %v1129_v39  ;;  %v1116_v47 = vmul.f32 %v1565_v53, %v1060_v37  ;;  %v1086_v48 = vpop.xlane.xlu1 %1085 }
 0x52c   : > { %1570 = vrsqrt.f32 %v1103_v40  ;;  %v1096_v27 = vmul.f32 0.0078125, %v1086_v48 }
 0x52d   : > { %1151 = vst [vmem:[%s2225_s20] sm:$0xff] %v1143_v46  ;;  %v1130_v21 = vmul.f32 %v1260_v30, %v1116_v47 }
 0x52e   : > { %v1567_v50 = vpop.eup %1566  ;;  %v1104_v54 = vadd.f32 1e-05, %v1096_v27 }
 0x52f   : > { %v1144_v55 = vadd.f32 %v1261_v33, %v1130_v21  ;;  %v1117_v35 = vmul.f32 %v1567_v50, %v2192_v45  ;;  %v1088_v28 = vpop.xlane.xlu0 %1087 }
 0x530   : > { %1572 = vrsqrt.f32 %v1104_v54  ;;  %v1097_v56 = vmul.f32 0.0078125, %v1088_v28 }
 0x531   : > { %1152 = vst [vmem:[%s2225_s20 + $0x8] sm:$0xff] %v1144_v55  ;;  %v1131_v36 = vmul.f32 %v1260_v30, %v1117_v35 }
 0x532   : > { %v1569_v26 = vpop.eup %1568  ;;  %v1105_v59 = vadd.f32 1e-05, %v1097_v56 }
 0x533   : > { %v1145_v29 = vadd.f32 %v1261_v33, %v1131_v36  ;;  %v1118_v60 = vmul.f32 %v1569_v26, %v2196_v51  ;;  %v1090_v34 = vpop.xlane.xlu1 %1089 }
 0x534   : > { %1574 = vrsqrt.f32 %v1105_v59  ;;  %v1098_v37 = vmul.f32 0.0078125, %v1090_v34 }
 0x535   : > { %1153 = vst [vmem:[%s2225_s20 + $0x10] sm:$0xff] %v1145_v29  ;;  %v1132_v43 = vmul.f32 %v1260_v30, %v1118_v60 }
 0x536   : > { %v1571_v61 = vpop.eup %1570  ;;  %v1106_v42 = vadd.f32 1e-05, %v1098_v37 }
 0x537   : > { %v1146_v45 = vadd.f32 %v1261_v33, %v1132_v43  ;;  %v1119_v44 = vmul.f32 %v1571_v61, %v2200_v63 }
 0x538   : > { %1576 = vrsqrt.f32 %v1106_v42 }
 0x539   : > { %1154 = vst [vmem:[%s2225_s20 + $0x18] sm:$0xff] %v1146_v45  ;;  %v1133_v62 = vmul.f32 %v1260_v30, %v1119_v44 }
 0x53a   : > { %v1573_v52 = vpop.eup %1572 }
 0x53b   : > { %v1147_v51 = vadd.f32 %v1261_v33, %v1133_v62  ;;  %v1120_v49 = vmul.f32 %v1573_v52, %v2204_v2 }
 0x53d   : > { %1155 = vst [vmem:[%s2225_s20 + $0x20] sm:$0xff] %v1147_v51  ;;  %v1134_v57 = vmul.f32 %v1260_v30, %v1120_v49 }
 0x53e   : > { %v1575_v58 = vpop.eup %1574 }
 0x53f   : > { %v1148_v17 = vadd.f32 %v1261_v33, %v1134_v57  ;;  %v1121_v0 = vmul.f32 %v1575_v58, %v2208_v6 }
 0x541   : > { %1156 = vst [vmem:[%s2225_s20 + $0x28] sm:$0xff] %v1148_v17  ;;  %v1135_v63 = vmul.f32 %v1260_v30, %v1121_v0 }
 0x542   : > { %v1577_v1 = vpop.eup %1576 }
 0x543   : > { %v1149_v3 = vadd.f32 %v1261_v33, %v1135_v63  ;;  %v1122_v4 = vmul.f32 %v1577_v1, %v2212_v12 }
 0x545   : > { %1157 = vst [vmem:[%s2225_s20 + $0x30] sm:$0xff] %v1149_v3  ;;  %v1136_v5 = vmul.f32 %v1260_v30, %v1122_v4 }
 0x547   : > { %v1150_v2 = vadd.f32 %v1261_v33, %v1136_v5 }
 0x549   : > { %1158 = vst [vmem:[%s2225_s20 + $0x38] sm:$0xff] %v1150_v2 }
 0x54a   : > { %1591 = shalt.err (!%p1588_p3)
}
 0x54b   : > { %s1592_s23 = scalar_lea.hbm %s2245_s28, 1024  ;;  %s1596_s29 = scalar_lea.hbm %s2305_s12, 2048 }
 0x54c   : > { %p1593_p4 = scmp.ne.s32.totalorder %s2245_s28, %s1592_s23  ;;  %p1597_p9 = scmp.lt.u32.totalorder %s2245_s28, %s2305_s12 }
 0x54d   : > { %p1598_p10 = scmp.lt.u32.totalorder %s1596_s29, %s1592_s23  ;;  %p1600_p12 = scmp.lt.u32.totalorder %s1592_s23, %s2245_s28 }
 0x54e   : > { %p1594_p7 = pnand %p1593_p4, %p1749_p5 }
 0x54f   : > { %p1599_p11 = por %p1598_p10, %p1597_p9 }
 0x550   : > { %p1595_p8 = pneg %p1594_p7 }
 0x551   : > { %p1601_p13 = por %p1600_p12, %p1599_p11 }
 0x553   : > { %p1602_p0 = pnand %p1601_p13, %p1595_p8 }
 0x555   : > { %1605 = shalt.err (!%p1602_p0)
}
 0x556   : > { %s1644_s16 = smov 128   ;;  %s1645_s18 = smov 8  }
 0x557   : > { %1504 = dma.vmem_to_hbm [thread:$0]  (%p1749_p5), %s2247_s17, 1024, %s2245_s28, %s2252_s15, %s1644_s16, %s1644_s16, %s1645_s18  }
 0x558 PF: > { %p1510_p1 = scmp.ge.s32.totalorder %s1640_s24, 2  ;;  %s1188_s19 = sand.u32 1, %s1628_s21  }
 0x559   : > { %s1189_s23 = scalar_lea.sflag [#allocation3], %s1188_s19 }
 0x55a   : > { %p1507_p2 = pnand %p1510_p1, %p1753_p6 }
 0x55c   : > { %1623 = dma.done.wait (!%p1507_p2), %s1189_s23, 1024  }
 0x55d   : > { %1625 = vsyncadd (!%p1507_p2), %s1189_s23, 4294966272  ;;  %s2311_s20 = sld [smem:[#allocation5_spill]]  ;;  %s2312_s23 = sld [smem:[#allocation6_spill]] }
 0x55e   : > { %p22_p3 = scmp.ge.s32.totalorder %s1736_s27, 4   ;;  %s2313_s21 = smov %s1632_s22 }
 0x55f   : > { %s2315_s24 = smov %s1736_s27 }
 0x560   :  { %24 = sbr.rel (!%p22_p3) target bundleno = 3 (0x3), region = 106 }
 0x563   : > { %s2314_s22 = smov %s2311_s20 }
 0x567   :  { %1194 = vsyncpa [#allocation3], 1 }
 0x568   :  { %1196 = vsyncpa [#allocation3 + $0x1], 1 }

// kernel: image_encoder_forward.10
= control target key start
LH: loop header
LB: loop body
LE: loop exit
PB: predicated region body
PF: predicated region fallthrough
CT: control target
= control target key end

     0   :  { %s1599_s21 = smov 0   ;;  %s2073_s0 = inlined_call_operand.vmem [shape: f32[128,128], index: 0, kind: input, shape index: {}]   ;;  %s2074_s1 = inlined_call_operand.vmem [shape: f32[128,128], index: 1, kind: input, shape index: {}]   ;;  %s2075_s2 = inlined_call_operand.vmem [shape: f32[128,128], index: 2, kind: input, shape index: {}]   ;;  %s2076_s3 = inlined_call_operand.vmem [shape: f32[1,128], index: 3, kind: input, shape index: {}]   ;;  %s2077_s4 = inlined_call_operand.vmem [shape: f32[1,128], index: 4, kind: input, shape index: {}]   ;;  %s2078_s5 = inlined_call_operand.vmem [shape: f32[1,128], index: 5, kind: input, shape index: {}]   ;;  %s2079_s6 = inlined_call_operand.vmem [shape: f32[128,256], index: 6, kind: input, shape index: {}]   ;;  %s2080_s7 = inlined_call_operand.vmem [shape: f32[1,256], index: 7, kind: input, shape index: {}]   ;;  %s2081_s8 = inlined_call_operand.vmem [shape: f32[256,128], index: 8, kind: input, shape index: {}]   ;;  %s2082_s9 = inlined_call_operand.vmem [shape: f32[1,128], index: 9, kind: input, shape index: {}]   ;;  %s2083_s10 = inlined_call_operand.vmem [shape: f32[1,128], index: 10, kind: input, shape index: {}]   ;;  %s2084_s11 = inlined_call_operand.vmem [shape: f32[1,128], index: 11, kind: input, shape index: {}]   ;;  %s2085_s12 = inlined_call_operand.vmem [shape: f32[128,128], index: 12, kind: output, shape index: {}]  }
   0x1 LB: > { %s1229_s22 = sadd.s32 4294967295, %s1531_s21   ;;  %p1233_p0 = scmp.ge.s32.totalorder %s1531_s21, 1  ;;  %s1531_s21 = sphi %s1599_s21, %s22_s21  }
   0x2   : > { %p374_p1 = scmp.lt.s32.totalorder %s1531_s21, 3 }
   0x4   : > { %p375_p2 = pnand %p1233_p0, %p374_p1 }
   0x5   : > { %v455_v0 = vld [vmem:[%s2075_s2] sm:$0xff] (!%p375_p2)  ;;  %v456_v1 = vld [vmem:[%s2075_s2 + $0x8] sm:$0xff] (!%p375_p2)  ;;  %v457_v2 = vld [vmem:[%s2075_s2 + $0x10] sm:$0xff] (!%p375_p2)  ;;  %s1234_s29 = sshll.u32 (!%p375_p2), %s1229_s22, 3 }
   0x6   : > { %378 = sbr.rel (%p375_p2) target bundleno = 1345 (0x541), region = 68  ;;  %v1372_v3 = vpack.c.bf16 (!%p375_p2), %v456_v1, %v455_v0  ;;  %v458_v4 = vld [vmem:[%s2075_s2 + $0x18] sm:$0xff] (!%p375_p2)  ;;  %p422_p3 = scmp.lt.s32.totalorder (!%p375_p2), %s1234_s29, 15  ;;  %v459_v6 = vld [vmem:[%s2075_s2 + $0x20] sm:$0xff] (!%p375_p2)  ;;  %v460_v7 = vld [vmem:[%s2075_s2 + $0x28] sm:$0xff] (!%p375_p2) }
   0x7   : > { %v1376_v5 = vpack.c.bf16 (!%p375_p2), %v458_v4, %v457_v2  ;;  %v1380_v8 = vpack.c.bf16 (!%p375_p2), %v460_v7, %v459_v6  ;;  %v461_v9 = vld [vmem:[%s2075_s2 + $0x30] sm:$0xff] (!%p375_p2)  ;;  %v462_v10 = vld [vmem:[%s2075_s2 + $0x38] sm:$0xff] (!%p375_p2)  ;;  %v463_v13 = vld [vmem:[%s2075_s2 + $0x40] sm:$0xff] (!%p375_p2) }
   0x8   : > { %1373 = vmatprep.subr.bf16.mxu0 (!%p375_p2), %v1372_v3  ;;  %v1384_v12 = vpack.c.bf16 (!%p375_p2), %v462_v10, %v461_v9  ;;  %v464_v14 = vld [vmem:[%s2075_s2 + $0x48] sm:$0xff] (!%p375_p2)  ;;  %v465_v16 = vld [vmem:[%s2075_s2 + $0x50] sm:$0xff] (!%p375_p2)  ;;  %v466_v17 = vld [vmem:[%s2075_s2 + $0x58] sm:$0xff] (!%p375_p2) }
   0x9   : > { %1375 = vmatpush3.bf16.msra.mxu0 (!%p375_p2), %v1372_v3  ;;  %v1388_v15 = vpack.c.bf16 (!%p375_p2), %v464_v14, %v463_v13  ;;  %v1392_v18 = vpack.c.bf16 (!%p375_p2), %v466_v17, %v465_v16  ;;  %v467_v19 = vld [vmem:[%s2075_s2 + $0x60] sm:$0xff] (!%p375_p2)  ;;  %v468_v20 = vld [vmem:[%s2075_s2 + $0x68] sm:$0xff] (!%p375_p2)  ;;  %v469_v22 = vld [vmem:[%s2075_s2 + $0x70] sm:$0xff] (!%p375_p2) }
   0xa   : > { %1377 = vmatprep.subr.bf16.mxu0 (!%p375_p2), %v1376_v5  ;;  %v1396_v21 = vpack.c.bf16 (!%p375_p2), %v468_v20, %v467_v19  ;;  %v470_v23 = vld [vmem:[%s2075_s2 + $0x78] sm:$0xff] (!%p375_p2)  ;;  %v1240_v32 = vld [vmem:[%s2076_s3] ss:$0 sm:$0xff] (!%p375_p2)  ;;  %v711_v1 = vld [vmem:[%s2079_s6 + $0x8] sm:$0xff] (!%p375_p2) }
   0xb   : > { %v1400_v24 = vpack.c.bf16 (!%p375_p2), %v470_v23, %v469_v22  ;;  %v713_v2 = vld [vmem:[%s2079_s6 + $0x18] sm:$0xff] (!%p375_p2)  ;;  %v710_v3 = vld [vmem:[%s2079_s6] sm:$0xff] (!%p375_p2)  ;;  %v715_v6 = vld [vmem:[%s2079_s6 + $0x28] sm:$0xff] (!%p375_p2) }
   0xc   : > { %v1404_v4 = vpack.c.bf16 (!%p375_p2), %v713_v2, %v711_v1  ;;  %v717_v7 = vld [vmem:[%s2079_s6 + $0x38] sm:$0xff] (!%p375_p2)  ;;  %v714_v10 = vld [vmem:[%s2079_s6 + $0x20] sm:$0xff] (!%p375_p2)  ;;  %v720_v17 = vld [vmem:[%s2079_s6 + $0x50] sm:$0xff] (!%p375_p2) }
   0xd   : > { %s2087_s29 = smov (!%p422_p3, %s1234_s29), 15  ;;  %1379 = vmatpush3.bf16.msra.mxu0 %v1376_v5  ;;  %v712_v5 = vld [vmem:[%s2079_s6 + $0x10] sm:$0xff]  ;;  %v1408_v9 = vpack.c.bf16 %v717_v7, %v715_v6  ;;  %v721_v13 = vld [vmem:[%s2079_s6 + $0x58] sm:$0xff]  ;;  %v718_v16 = vld [vmem:[%s2079_s6 + $0x40] sm:$0xff] }
   0xe   : > { %s1625_s18 = sshll.u32 %s2087_s29, 3  ;;  %1381 = vmatprep.subr.bf16.mxu0 %v1380_v8  ;;  %1405 = vmatprep.subr.bf16.mxu1 %v1404_v4  ;;  %v730_v2 = vld [vmem:[%s2079_s6 + $0xa0] sm:$0xff]  ;;  %v737_v6 = vld [vmem:[%s2079_s6 + $0xd8] sm:$0xff] }
   0xf   : > { %s1637_s26 = scalar_lea.vmem %s2073_s0, %s1625_s18  ;;  %s1675_s30 = scalar_lea.vmem %s2074_s1, %s1625_s18 }
  0x10   : > { %v447_v11 = vld [vmem:[%s1637_s26] sm:$0xff]  ;;  %v448_v25 = vld [vmem:[%s1637_s26 + $0x8] sm:$0xff]  ;;  %v449_v26 = vld [vmem:[%s1637_s26 + $0x10] sm:$0xff]  ;;  %s2054_s13 = scalar_lea.vmem %s2085_s12, %s1625_s18 }
  0x11   : > { %1360 = vmatprep.mubr.f32.mxu0 %v447_v11  ;;  %1383 = vmatpush3.bf16.msra.mxu0 %v1380_v8  ;;  %v450_v27 = vld [vmem:[%s1637_s26 + $0x18] sm:$0xff]  ;;  %v451_v28 = vld [vmem:[%s1637_s26 + $0x20] sm:$0xff]  ;;  %v452_v29 = vld [vmem:[%s1637_s26 + $0x28] sm:$0xff]  ;;  %v1406_v8 = vpack.c.bf16 %v712_v5, %v710_v3 }
  0x12   : > { %1385 = vmatprep.subr.bf16.mxu0 %v1384_v12  ;;  %v453_v30 = vld [vmem:[%s1637_s26 + $0x30] sm:$0xff]  ;;  %v454_v31 = vld [vmem:[%s1637_s26 + $0x38] sm:$0xff]  ;;  %v439_v35 = vld [vmem:[%s1675_s30] sm:$0xff] }
  0x13   : > { %v441_v41 = vld [vmem:[%s1675_s30 + $0x10] sm:$0xff]  ;;  %v440_v42 = vld [vmem:[%s1675_s30 + $0x8] sm:$0xff]  ;;  %v442_v45 = vld [vmem:[%s1675_s30 + $0x18] sm:$0xff]  ;;  %1407 = vmatpush1.bf16.msra.mxu1 %v1406_v8 }
  0x14   : > { %v443_v50 = vld [vmem:[%s1675_s30 + $0x20] sm:$0xff]  ;;  %v444_v54 = vld [vmem:[%s1675_s30 + $0x28] sm:$0xff]  ;;  %v445_v58 = vld [vmem:[%s1675_s30 + $0x30] sm:$0xff]  ;;  %1409 = vmatprep.subr.bf16.mxu1 %v1408_v9 }
  0x15   : > { %1387 = vmatpush3.bf16.msra.mxu0 %v1384_v12  ;;  %v446_v62 = vld [vmem:[%s1675_s30 + $0x38] sm:$0xff]  ;;  %v716_v11 = vld [vmem:[%s2079_s6 + $0x30] sm:$0xff]  ;;  %v719_v12 = vld [vmem:[%s2079_s6 + $0x48] sm:$0xff] }
  0x16   : > { %1389 = vmatprep.subr.bf16.mxu0 %v1388_v15  ;;  %v1410_v14 = vpack.c.bf16 %v716_v11, %v714_v10  ;;  %v732_v3 = vld [vmem:[%s2079_s6 + $0xb0] sm:$0xff]  ;;  %v735_v5 = vld [vmem:[%s2079_s6 + $0xc8] sm:$0xff]  ;;  %v734_v8 = vld [vmem:[%s2079_s6 + $0xc0] sm:$0xff] }
  0x17   : > { %v1426_v4 = vpack.c.bf16 %v732_v3, %v730_v2  ;;  %v1428_v7 = vpack.c.bf16 %v737_v6, %v735_v5  ;;  %v736_v9 = vld [vmem:[%s2079_s6 + $0xd0] sm:$0xff]  ;;  %v739_v11 = vld [vmem:[%s2079_s6 + $0xe8] sm:$0xff] }
  0x18   : > { %1411 = vmatpush1.bf16.msra.mxu1 %v1410_v14  ;;  %v1430_v10 = vpack.c.bf16 %v736_v9, %v734_v8  ;;  %v738_v14 = vld [vmem:[%s2079_s6 + $0xe0] sm:$0xff] }
  0x19   : > { %1391 = vmatpush3.bf16.msra.mxu0 %v1388_v15  ;;  %v1412_v15 = vpack.c.bf16 %v721_v13, %v719_v12  ;;  %v741_v12 = vld [vmem:[%s2079_s6 + $0xf8] sm:$0xff] }
  0x1a   : > { %1393 = vmatprep.subr.bf16.mxu0 %v1392_v18  ;;  %v1432_v13 = vpack.c.bf16 %v741_v12, %v739_v11 }
  0x1b   : > { %1413 = vmatprep.subr.bf16.mxu1 %v1412_v15  ;;  %v740_v15 = vld [vmem:[%s2079_s6 + $0xf0] sm:$0xff] }
  0x1d   : > { %1395 = vmatpush3.bf16.msra.mxu0 %v1392_v18  ;;  %v1414_v18 = vpack.c.bf16 %v720_v17, %v718_v16  ;;  %v1434_v16 = vpack.c.bf16 %v740_v15, %v738_v14  ;;  %v1533_v17 = vmov 0.0  }
  0x1e   : > { %1397 = vmatprep.subr.bf16.mxu0 %v1396_v21  ;;  %818 = vmatprep.mubr.f32.mxu1 %v1533_v17 }
  0x1f   : > { %1415 = vmatpush1.bf16.msra.mxu1 %v1414_v18  ;;  %v899_v18 = vld [vmem:[%s2081_s8 + $0x80] sm:$0xff] }
  0x21   : > { %1399 = vmatpush3.bf16.msra.mxu0 %v1396_v21 }
  0x22   : > { %1401 = vmatprep.subr.bf16.mxu0 %v1400_v24 }
  0x25   : > { %1403 = vmatpush3.bf16.msra.mxu0 %v1400_v24 }
  0x28   : > { %1361 = vmatmul.mubr.f32.vlgmr.msra.gmra.mrb[0].mxu0 %v448_v25 }
  0x29   : > { %1363 = vmatprep.mubr.f32.mxu0 %v449_v26 }
  0x2c   : > { %1364 = vmatmul.mubr.f32.gmra.mrb[2].mxu0 %v450_v27 }
  0x2d   : > { %1366 = vmatprep.mubr.f32.mxu0 %v451_v28 }
  0x30   : > { %1367 = vmatmul.mubr.f32.gmra.mrb[4].mxu0 %v452_v29 }
  0x31   : > { %1369 = vmatprep.mubr.f32.mxu0 %v453_v30 }
  0x34   : > { %1370 = vmatmul.mubr.f32.gmra.mrb[6].mxu0 %v454_v31 }
  0xfb   : > { %v1362_v33 = vpop.f32.mrb[0].mxu0 }
  0xfc   : > { %v544_v34 = vpop.f32.mrb[1].mxu0  ;;  %v550_v37 = vadd.f32 %v1362_v33, %v1240_v32 }
  0xfd   : > { %v545_v36 = vadd.f32 %v1240_v32, %v544_v34 }
  0xfe   : > { %v584_v48 = vadd.f32 %v550_v37, %v440_v42 }
  0xff   : > { %v1365_v38 = vpop.f32.mrb[2].mxu0  ;;  %v583_v39 = vadd.f32 %v545_v36, %v439_v35 }
 0x100   : > { %v554_v40 = vpop.f32.mrb[3].mxu0  ;;  %v560_v43 = vadd.f32 %v1365_v38, %v1240_v32 }
 0x101   : > { %v555_v44 = vadd.f32 %v1240_v32, %v554_v40  ;;  %593 = vadd.xlane.f32.xlu0 %v583_v39 }
 0x102   : > { %v586_v53 = vadd.f32 %v560_v43, %v442_v45 }
 0x103   : > { %v1368_v46 = vpop.f32.mrb[4].mxu0  ;;  %v585_v47 = vadd.f32 %v555_v44, %v441_v41 }
 0x104   : > { %v564_v49 = vpop.f32.mrb[5].mxu0  ;;  %v570_v51 = vadd.f32 %v1368_v46, %v1240_v32 }
 0x105   : > { %v565_v52 = vadd.f32 %v1240_v32, %v564_v49  ;;  %597 = vadd.xlane.f32.xlu1 %v585_v47  ;;  %595 = vadd.xlane.f32.xlu0 %v584_v48 }
 0x106   : > { %v588_v61 = vadd.f32 %v570_v51, %v444_v54  ;;  %v725_v51 = vld [vmem:[%s2079_s6 + $0x78] sm:$0xff]  ;;  %v724_v54 = vld [vmem:[%s2079_s6 + $0x70] sm:$0xff] }
 0x107   : > { %v1371_v55 = vpop.f32.mrb[6].mxu0  ;;  %v587_v56 = vadd.f32 %v565_v52, %v443_v50  ;;  %v723_v50 = vld [vmem:[%s2079_s6 + $0x68] sm:$0xff] }
 0x108   : > { %v574_v57 = vpop.f32.mrb[7].mxu0  ;;  %v580_v59 = vadd.f32 %v1371_v55, %v1240_v32  ;;  %v1416_v52 = vpack.c.bf16 %v725_v51, %v723_v50  ;;  %v908_v50 = vld [vmem:[%s2081_s8 + $0xc8] sm:$0xff] }
 0x109   : > { %v575_v60 = vadd.f32 %v1240_v32, %v574_v57  ;;  %599 = vadd.xlane.f32.xlu1 %v586_v53  ;;  %601 = vadd.xlane.f32.xlu0 %v587_v56  ;;  %v727_v57 = vld [vmem:[%s2079_s6 + $0x88] sm:$0xff] }
 0x10a   : > { %v590_v0 = vadd.f32 %v580_v59, %v446_v62  ;;  %1417 = vmatprep.subr.bf16.mxu1 %v1416_v52 }
 0x10b   : > { %v589_v63 = vadd.f32 %v575_v60, %v445_v58  ;;  %v729_v58 = vld [vmem:[%s2079_s6 + $0x98] sm:$0xff]  ;;  %v726_v60 = vld [vmem:[%s2079_s6 + $0x80] sm:$0xff] }
 0x10c   : > { %v1420_v59 = vpack.c.bf16 %v729_v58, %v727_v57 }
 0x10d   : > { %603 = vadd.xlane.f32.xlu1 %v588_v61  ;;  %605 = vadd.xlane.f32.xlu0 %v589_v63 }
 0x111   : > { %607 = vadd.xlane.f32.xlu1 %v590_v0 }
 0x18e   : > { %v594_v19 = vpop.xlane.xlu0 %593 }
 0x18f   : > { %v610_v20 = vmul.f32 0.0078125, %v594_v19  ;;  %v900_v19 = vld [vmem:[%s2081_s8 + $0x88] sm:$0xff] }
 0x191   : > { %v1724_v21 = vsub.f32 %v583_v39, %v610_v20  ;;  %v883_v20 = vld [vmem:[%s2081_s8] sm:$0xff] }
 0x192   : > { %v598_v22 = vpop.xlane.xlu1 %597  ;;  %v596_v23 = vpop.xlane.xlu0 %595 }
 0x193   : > { %v612_v24 = vmul.f32 0.0078125, %v598_v22  ;;  %v611_v25 = vmul.f32 0.0078125, %v596_v23  ;;  %v626_v26 = vmul.f32 %v1724_v21, %v1724_v21  ;;  %v1436_v22 = vpack.c.bf16 %v900_v19, %v899_v18  ;;  %v884_v23 = vld [vmem:[%s2081_s8 + $0x8] sm:$0xff] }
 0x195   : > { %v1728_v27 = vsub.f32 %v585_v47, %v612_v24  ;;  %v1730_v28 = vsub.f32 %v584_v48, %v611_v25  ;;  %634 = vadd.xlane.f32.xlu0 %v626_v26  ;;  %v901_v24 = vld [vmem:[%s2081_s8 + $0x90] sm:$0xff]  ;;  %v902_v25 = vld [vmem:[%s2081_s8 + $0x98] sm:$0xff]  ;;  %v1835_v26 = vpack.c.bf16 %v884_v23, %v883_v20  ;;  %1437 = vmatprep.subr.bf16.mxu0 %v1436_v22 }
 0x196   : > { %v600_v29 = vpop.xlane.xlu1 %599  ;;  %v602_v30 = vpop.xlane.xlu0 %601 }
 0x197   : > { %v613_v31 = vmul.f32 0.0078125, %v600_v29  ;;  %v614_v32 = vmul.f32 0.0078125, %v602_v30  ;;  %v628_v33 = vmul.f32 %v1728_v27, %v1728_v27  ;;  %v627_v34 = vmul.f32 %v1730_v28, %v1730_v28  ;;  %v885_v30 = vld [vmem:[%s2081_s8 + $0x10] sm:$0xff]  ;;  %1439 = vmatpush3.bf16.msra.mxu0 %v1835_v26 }
 0x198   : > { %v1837_v29 = vpack.c.bf16 %v902_v25, %v901_v24  ;;  %v1241_v24 = vld [vmem:[%s2077_s4] ss:$0 sm:$0xff] }
 0x199   : > { %v1736_v35 = vsub.f32 %v586_v53, %v613_v31  ;;  %v1738_v36 = vsub.f32 %v587_v56, %v614_v32  ;;  %638 = vadd.xlane.f32.xlu0 %v628_v33  ;;  %636 = vadd.xlane.f32.xlu1 %v627_v34  ;;  %v722_v53 = vld [vmem:[%s2079_s6 + $0x60] sm:$0xff]  ;;  %v886_v31 = vld [vmem:[%s2081_s8 + $0x18] sm:$0xff]  ;;  %v904_v33 = vld [vmem:[%s2081_s8 + $0xa8] sm:$0xff] }
 0x19a   : > { %v604_v37 = vpop.xlane.xlu1 %603  ;;  %v606_v38 = vpop.xlane.xlu0 %605  ;;  %v1418_v56 = vpack.c.bf16 %v724_v54, %v722_v53  ;;  %v903_v32 = vld [vmem:[%s2081_s8 + $0xa0] sm:$0xff]  ;;  %v1852_v34 = vpack.c.bf16 %v886_v31, %v885_v30  ;;  %1441 = vmatprep.subr.bf16.mxu0 %v1837_v29  ;;  %v892_v54 = vld [vmem:[%s2081_s8 + $0x48] sm:$0xff] }
 0x19b   : > { %v615_v39 = vmul.f32 0.0078125, %v604_v37  ;;  %v616_v40 = vmul.f32 0.0078125, %v606_v38  ;;  %v629_v41 = vmul.f32 %v1736_v35, %v1736_v35  ;;  %v630_v42 = vmul.f32 %v1738_v36, %v1738_v36  ;;  %v887_v38 = vld [vmem:[%s2081_s8 + $0x20] sm:$0xff] }
 0x19c   : > { %1419 = vmatpush1.bf16.msra.mxu1 %v1418_v56  ;;  %v1855_v37 = vpack.c.bf16 %v904_v33, %v903_v32  ;;  %1443 = vmatpush3.bf16.msra.mxu0 %v1852_v34  ;;  %v891_v53 = vld [vmem:[%s2081_s8 + $0x40] sm:$0xff]  ;;  %v910_v56 = vld [vmem:[%s2081_s8 + $0xd8] sm:$0xff] }
 0x19d   : > { %v1744_v43 = vsub.f32 %v588_v61, %v615_v39  ;;  %v1746_v44 = vsub.f32 %v589_v63, %v616_v40  ;;  %640 = vadd.xlane.f32.xlu1 %v629_v41  ;;  %642 = vadd.xlane.f32.xlu0 %v630_v42  ;;  %v728_v61 = vld [vmem:[%s2079_s6 + $0x90] sm:$0xff]  ;;  %v731_v63 = vld [vmem:[%s2079_s6 + $0xa8] sm:$0xff]  ;;  %v906_v41 = vld [vmem:[%s2081_s8 + $0xb8] sm:$0xff]  ;;  %v1906_v57 = vpack.c.bf16 %v892_v54, %v891_v53 }
 0x19e   : > { %v608_v45 = vpop.xlane.xlu1 %607  ;;  %v1422_v62 = vpack.c.bf16 %v728_v61, %v726_v60  ;;  %1421 = vmatprep.subr.bf16.mxu1 %v1420_v59  ;;  %v888_v39 = vld [vmem:[%s2081_s8 + $0x28] sm:$0xff]  ;;  %v905_v40 = vld [vmem:[%s2081_s8 + $0xb0] sm:$0xff]  ;;  %1445 = vmatprep.subr.bf16.mxu0 %v1855_v37  ;;  %v894_v60 = vld [vmem:[%s2081_s8 + $0x58] sm:$0xff] }
 0x19f   : > { %v617_v46 = vmul.f32 0.0078125, %v608_v45  ;;  %v631_v47 = vmul.f32 %v1744_v43, %v1744_v43  ;;  %v632_v48 = vmul.f32 %v1746_v44, %v1746_v44  ;;  %v1870_v42 = vpack.c.bf16 %v888_v39, %v887_v38  ;;  %v893_v59 = vld [vmem:[%s2081_s8 + $0x50] sm:$0xff]  ;;  %v911_v61 = vld [vmem:[%s2081_s8 + $0xe0] sm:$0xff] }
 0x1a0   : > { %1423 = vmatpush1.bf16.msra.mxu1 %v1422_v62  ;;  %v1873_v45 = vpack.c.bf16 %v906_v41, %v905_v40  ;;  %v912_v62 = vld [vmem:[%s2081_s8 + $0xe8] sm:$0xff]  ;;  %v1242_v31 = vld [vmem:[%s2078_s5] ss:$0 sm:$0xff] }
 0x1a1   : > { %v1752_v49 = vsub.f32 %v590_v0, %v617_v46  ;;  %644 = vadd.xlane.f32.xlu1 %v631_v47  ;;  %646 = vadd.xlane.f32.xlu0 %v632_v48  ;;  %v733_v0 = vld [vmem:[%s2079_s6 + $0xb8] sm:$0xff]  ;;  %v889_v46 = vld [vmem:[%s2081_s8 + $0x30] sm:$0xff]  ;;  %v907_v48 = vld [vmem:[%s2081_s8 + $0xc0] sm:$0xff] }
 0x1a2   : > { %v1424_v1 = vpack.c.bf16 %v733_v0, %v731_v63  ;;  %v890_v47 = vld [vmem:[%s2081_s8 + $0x38] sm:$0xff]  ;;  %1447 = vmatpush3.bf16.msra.mxu0 %v1870_v42  ;;  %v1891_v52 = vpack.c.bf16 %v908_v50, %v907_v48  ;;  %v1924_v63 = vpack.c.bf16 %v894_v60, %v893_v59  ;;  %v1927_v0 = vpack.c.bf16 %v912_v62, %v911_v61 }
 0x1a3   : > { %v633_v55 = vmul.f32 %v1752_v49, %v1752_v49  ;;  %v1888_v51 = vpack.c.bf16 %v890_v47, %v889_v46  ;;  %1449 = vmatprep.subr.bf16.mxu0 %v1873_v45 }
 0x1a4   : > { %1425 = vmatprep.subr.bf16.mxu1 %v1424_v1 }
 0x1a5   : > { %648 = vadd.xlane.f32.xlu1 %v633_v55  ;;  %1427 = vmatpush1.bf16.msra.mxu1 %v1426_v4  ;;  %v909_v55 = vld [vmem:[%s2081_s8 + $0xd0] sm:$0xff] }
 0x1a6   : > { %1429 = vmatprep.subr.bf16.mxu1 %v1428_v7  ;;  %1451 = vmatpush3.bf16.msra.mxu0 %v1888_v51  ;;  %v1909_v58 = vpack.c.bf16 %v910_v56, %v909_v55 }
 0x1a7   : > { %1453 = vmatprep.subr.bf16.mxu0 %v1891_v52 }
 0x1a9   : > { %1431 = vmatpush1.bf16.msra.mxu1 %v1430_v10 }
 0x1aa   : > { %1433 = vmatprep.subr.bf16.mxu1 %v1432_v13  ;;  %1455 = vmatpush3.bf16.msra.mxu0 %v1906_v57 }
 0x1ab   : > { %1457 = vmatprep.subr.bf16.mxu0 %v1909_v58 }
 0x1ad   : > { %1435 = vmatpush1.bf16.msra.mxu1 %v1434_v16 }
 0x1ae   : > { %1468 = vmatprep.subr.bf16.mxu1 %v1436_v22  ;;  %1459 = vmatpush3.bf16.msra.mxu0 %v1924_v63 }
 0x1af   : > { %1461 = vmatprep.subr.bf16.mxu0 %v1927_v0 }
 0x222   : > { %v635_v1 = vpop.xlane.xlu0 %634 }
 0x223   : > { %v650_v2 = vmul.f32 0.0078125, %v635_v1  ;;  %v897_v1 = vld [vmem:[%s2081_s8 + $0x70] sm:$0xff] }
 0x225   : > { %v658_v3 = vadd.f32 1e-05, %v650_v2  ;;  %v898_v2 = vld [vmem:[%s2081_s8 + $0x78] sm:$0xff] }
 0x226   : > { %v637_v4 = vpop.xlane.xlu1 %636  ;;  %v639_v5 = vpop.xlane.xlu0 %638 }
 0x227   : > { %1493 = vrsqrt.f32 %v658_v3  ;;  %v651_v6 = vmul.f32 0.0078125, %v637_v4  ;;  %v652_v7 = vmul.f32 0.0078125, %v639_v5  ;;  %v1466_v3 = vpack.c.bf16 %v898_v2, %v897_v1 }
 0x228   : > { %v744_v4 = vlaneseq }
 0x229   : > { %v659_v8 = vadd.f32 1e-05, %v651_v6  ;;  %v660_v9 = vadd.f32 1e-05, %v652_v7  ;;  %v742_v7 = vld [vmem:[%s2080_s7] sm:$0x3] }
 0x22a   : > { %v641_v10 = vpop.xlane.xlu1 %640  ;;  %v643_v11 = vpop.xlane.xlu0 %642  ;;  %v745_v5 = vshrl.u32 %v744_v4, 7  ;;  %v1243_v4 = vld [vmem:[%s2082_s9] ss:$0 sm:$0xff] }
 0x22b   : > { %1495 = vrsqrt.f32 %v659_v8  ;;  %v653_v12 = vmul.f32 0.0078125, %v641_v10  ;;  %v654_v13 = vmul.f32 0.0078125, %v643_v11 }
 0x22c   : > { %1497 = vrsqrt.f32 %v660_v9  ;;  %v746_v6 = vsub.s32 0, %v745_v5  ;;  %v750_v8 = vsub.s32 1, %v745_v5 }
 0x22d   : > { %v661_v14 = vadd.f32 1e-05, %v653_v12  ;;  %v662_v15 = vadd.f32 1e-05, %v654_v13 }
 0x22e   : > { %v645_v16 = vpop.xlane.xlu1 %644  ;;  %v647_v18 = vpop.xlane.xlu0 %646  ;;  %v747_v9 = vrot.slane %v742_v7, %v746_v6  ;;  %v751_v10 = vrot.slane %v742_v7, %v750_v8 }
 0x22f   : > { %1499 = vrsqrt.f32 %v661_v14  ;;  %v655_v19 = vmul.f32 0.0078125, %v645_v16  ;;  %v656_v23 = vmul.f32 0.0078125, %v647_v18 }
 0x230   : > { %1501 = vrsqrt.f32 %v662_v15 }
 0x231   : > { %v1494_v20 = vpop.eup %1493  ;;  %v663_v22 = vadd.f32 1e-05, %v655_v19  ;;  %v664_v38 = vadd.f32 1e-05, %v656_v23 }
 0x232   : > { %v649_v25 = vpop.xlane.xlu1 %648  ;;  %v674_v30 = vmul.f32 %v1494_v20, %v1724_v21 }
 0x233   : > { %1503 = vrsqrt.f32 %v663_v22  ;;  %v657_v39 = vmul.f32 0.0078125, %v649_v25 }
 0x234   : > { %v688_v32 = vmul.f32 %v1241_v24, %v674_v30  ;;  %1505 = vrsqrt.f32 %v664_v38 }
 0x235   : > { %v1496_v33 = vpop.eup %1495  ;;  %v665_v50 = vadd.f32 1e-05, %v657_v39 }
 0x236   : > { %v1498_v40 = vpop.eup %1497  ;;  %v1938_v41 = vadd.f32 %v1242_v31, %v688_v32  ;;  %v675_v46 = vmul.f32 %v1496_v33, %v1730_v28 }
 0x237   : > { %v676_v47 = vmul.f32 %v1498_v40, %v1728_v27  ;;  %1507 = vrsqrt.f32 %v665_v50 }
 0x238   : > { %819 = vmatmul.mubr.f32.vlgmr.msra.gmra.mrb[0].mxu1 %v1938_v41  ;;  %v689_v48 = vmul.f32 %v1241_v24, %v675_v46 }
 0x239   : > { %v1500_v21 = vpop.eup %1499  ;;  %824 = vmatprep.mubr.f32.mxu1 %v1533_v17  ;;  %1476 = vmatpush3.bf16.msra.mxu1 %v1835_v26  ;;  %v690_v54 = vmul.f32 %v1241_v24, %v676_v47 }
 0x23a   : > { %v1945_v53 = vadd.f32 %v1242_v31, %v689_v48  ;;  %v677_v55 = vmul.f32 %v1500_v21, %v1736_v35  ;;  %1469 = vmatprep.subr.bf16.mxu1 %v1837_v29  ;;  %v1502_v28 = vpop.eup %1501 }
 0x23b   : > { %v1952_v27 = vadd.f32 %v1242_v31, %v690_v54  ;;  %v678_v26 = vmul.f32 %v1502_v28, %v1738_v36 }
 0x23c   : > { %825 = vmatmul.mubr.f32.gmra.mrb[2].mxu1 %v1945_v53  ;;  %v691_v56 = vmul.f32 %v1241_v24, %v677_v55 }
 0x23d   : > { %830 = vmatprep.mubr.f32.mxu1 %v1533_v17  ;;  %1477 = vmatpush3.bf16.msra.mxu1 %v1852_v34  ;;  %v1504_v59 = vpop.eup %1503  ;;  %v692_v29 = vmul.f32 %v1241_v24, %v678_v26 }
 0x23e   : > { %1470 = vmatprep.subr.bf16.mxu1 %v1855_v37  ;;  %v1959_v35 = vadd.f32 %v1242_v31, %v691_v56  ;;  %v679_v60 = vmul.f32 %v1504_v59, %v1744_v43  ;;  %v1506_v34 = vpop.eup %1505 }
 0x23f   : > { %v1966_v36 = vadd.f32 %v1242_v31, %v692_v29  ;;  %v680_v61 = vmul.f32 %v1506_v34, %v1746_v44 }
 0x240   : > { %831 = vmatmul.mubr.f32.gmra.mrb[4].mxu1 %v1952_v27  ;;  %v693_v37 = vmul.f32 %v1241_v24, %v679_v60 }
 0x241   : > { %836 = vmatprep.mubr.f32.mxu1 %v1533_v17  ;;  %1478 = vmatpush3.bf16.msra.mxu1 %v1870_v42  ;;  %v1508_v42 = vpop.eup %1507 }
 0x242   : > { %1471 = vmatprep.subr.bf16.mxu1 %v1873_v45  ;;  %v1973_v43 = vadd.f32 %v1242_v31, %v693_v37  ;;  %v694_v45 = vmul.f32 %v1241_v24, %v680_v61  ;;  %v681_v62 = vmul.f32 %v1508_v42, %v1752_v49  ;;  %v895_v49 = vld [vmem:[%s2081_s8 + $0x60] sm:$0xff] }
 0x244   : > { %837 = vmatmul.mubr.f32.gmra.mrb[6].mxu1 %v1959_v35  ;;  %v1980_v44 = vadd.f32 %v1242_v31, %v694_v45 }
 0x245   : > { %842 = vmatprep.mubr.f32.mxu1 %v1533_v17  ;;  %1479 = vmatpush3.bf16.msra.mxu1 %v1888_v51  ;;  %v695_v51 = vmul.f32 %v1241_v24, %v681_v62 }
 0x246   : > { %1472 = vmatprep.subr.bf16.mxu1 %v1891_v52 }
 0x247   : > { %v1985_v52 = vadd.f32 %v1242_v31, %v695_v51 }
 0x248   : > { %843 = vmatmul.mubr.f32.gmra.mrb[8].mxu1 %v1966_v36 }
 0x249   : > { %848 = vmatprep.mubr.f32.mxu1 %v1533_v17  ;;  %1480 = vmatpush3.bf16.msra.mxu1 %v1906_v57  ;;  %v896_v57 = vld [vmem:[%s2081_s8 + $0x68] sm:$0xff] }
 0x24a   : > { %1473 = vmatprep.subr.bf16.mxu1 %v1909_v58  ;;  %v1462_v58 = vpack.c.bf16 %v896_v57, %v895_v49 }
 0x24c   : > { %849 = vmatmul.mubr.f32.gmra.mrb[10].mxu1 %v1973_v43  ;;  %1463 = vmatpush3.bf16.msra.mxu0 %v1462_v58 }
 0x24d   : > { %854 = vmatprep.mubr.f32.mxu1 %v1533_v17  ;;  %1481 = vmatpush3.bf16.msra.mxu1 %v1924_v63  ;;  %v913_v63 = vld [vmem:[%s2081_s8 + $0xf0] sm:$0xff] }
 0x24e   : > { %1474 = vmatprep.subr.bf16.mxu1 %v1927_v0 }
 0x250   : > { %855 = vmatmul.mubr.f32.gmra.mrb[12].mxu1 %v1980_v44 }
 0x251   : > { %860 = vmatprep.mubr.f32.mxu1 %v1533_v17  ;;  %v914_v17 = vld [vmem:[%s2081_s8 + $0xf8] sm:$0xff]  ;;  %1482 = vmatpush3.bf16.msra.mxu1 %v1462_v58 }
 0x252   : > { %v1464_v0 = vpack.c.bf16 %v914_v17, %v913_v63 }
 0x254   : > { %861 = vmatmul.mubr.f32.gmra.mrb[14].mxu1 %v1985_v52  ;;  %1465 = vmatprep.subr.bf16.mxu0 %v1464_v0 }
 0x255   : > { %1475 = vmatprep.subr.bf16.mxu1 %v1464_v0  ;;  %1467 = vmatpush3.bf16.msra.mxu0 %v1466_v3 }
 0x256   : > { %1483 = vmatpush3.bf16.msra.mxu1 %v1466_v3 }
 0x30b   : > { %v820_v11 = vpop.f32.mrb[0].mxu1 }
 0x30c   : > { %v821_v12 = vadd.f32 %v820_v11, %v747_v9  ;;  %v822_v13 = vpop.f32.mrb[1].mxu1 }
 0x30d   : > { %v823_v14 = vadd.f32 %v822_v13, %v751_v10 }
 0x30e   : > { %v867_v18 = vmax.f32 %v821_v12, 0.0 }
 0x30f   : > { %v868_v15 = vmax.f32 %v823_v14, 0.0  ;;  %v826_v16 = vpop.f32.mrb[2].mxu1 }
 0x310   : > { %v827_v19 = vadd.f32 %v826_v16, %v747_v9  ;;  %v828_v20 = vpop.f32.mrb[3].mxu1 }
 0x311   : > { %v829_v22 = vadd.f32 %v828_v20, %v751_v10  ;;  %986 = vmatprep.mubr.f32.mxu0 %v868_v15 }
 0x312   : > { %987 = vmatmul.mubr.f32.vlgmr.msra.gmra.mrb[8].mxu0 %v867_v18  ;;  %v869_v25 = vmax.f32 %v827_v19, 0.0 }
 0x313   : > { %v870_v23 = vmax.f32 %v829_v22, 0.0  ;;  %v832_v24 = vpop.f32.mrb[4].mxu1 }
 0x314   : > { %v833_v30 = vadd.f32 %v832_v24, %v747_v9  ;;  %v834_v31 = vpop.f32.mrb[5].mxu1 }
 0x315   : > { %v835_v32 = vadd.f32 %v834_v31, %v751_v10  ;;  %991 = vmatprep.mubr.f32.mxu0 %v870_v23 }
 0x316   : > { %992 = vmatmul.mubr.f32.gmra.mrb[10].mxu0 %v869_v25  ;;  %v871_v39 = vmax.f32 %v833_v30, 0.0 }
 0x317   : > { %v872_v33 = vmax.f32 %v835_v32, 0.0  ;;  %v838_v38 = vpop.f32.mrb[6].mxu1 }
 0x318   : > { %v839_v40 = vadd.f32 %v838_v38, %v747_v9  ;;  %v840_v46 = vpop.f32.mrb[7].mxu1 }
 0x319   : > { %v841_v47 = vadd.f32 %v840_v46, %v751_v10  ;;  %996 = vmatprep.mubr.f32.mxu0 %v872_v33 }
 0x31a   : > { %997 = vmatmul.mubr.f32.gmra.mrb[12].mxu0 %v871_v39  ;;  %v873_v50 = vmax.f32 %v839_v40, 0.0 }
 0x31b   : > { %v874_v48 = vmax.f32 %v841_v47, 0.0  ;;  %v844_v21 = vpop.f32.mrb[8].mxu1 }
 0x31c   : > { %v845_v54 = vadd.f32 %v844_v21, %v747_v9  ;;  %v846_v55 = vpop.f32.mrb[9].mxu1 }
 0x31d   : > { %v847_v28 = vadd.f32 %v846_v55, %v751_v10  ;;  %1001 = vmatprep.mubr.f32.mxu0 %v874_v48 }
 0x31e   : > { %1002 = vmatmul.mubr.f32.gmra.mrb[14].mxu0 %v873_v50  ;;  %v875_v59 = vmax.f32 %v845_v54, 0.0 }
 0x31f   : > { %v876_v56 = vmax.f32 %v847_v28, 0.0  ;;  %v850_v26 = vpop.f32.mrb[10].mxu1 }
 0x320   : > { %v851_v29 = vadd.f32 %v850_v26, %v747_v9  ;;  %v852_v60 = vpop.f32.mrb[11].mxu1 }
 0x321   : > { %v853_v34 = vadd.f32 %v852_v60, %v751_v10  ;;  %1006 = vmatprep.mubr.f32.mxu1 %v876_v56 }
 0x322   : > { %1007 = vmatmul.mubr.f32.vlgmr.msra.gmra.mrb[16].mxu1 %v875_v59  ;;  %v877_v42 = vmax.f32 %v851_v29, 0.0 }
 0x323   : > { %v878_v37 = vmax.f32 %v853_v34, 0.0  ;;  %v856_v61 = vpop.f32.mrb[12].mxu1 }
 0x324   : > { %v857_v45 = vadd.f32 %v856_v61, %v747_v9  ;;  %v858_v62 = vpop.f32.mrb[13].mxu1 }
 0x325   : > { %v859_v51 = vadd.f32 %v858_v62, %v751_v10  ;;  %1011 = vmatprep.mubr.f32.mxu1 %v878_v37 }
 0x326   : > { %1012 = vmatmul.mubr.f32.gmra.mrb[18].mxu1 %v877_v42  ;;  %v879_v58 = vmax.f32 %v857_v45, 0.0 }
 0x327   : > { %v880_v49 = vmax.f32 %v859_v51, 0.0  ;;  %v862_v57 = vpop.f32.mrb[14].mxu1 }
 0x328   : > { %v863_v63 = vadd.f32 %v862_v57, %v747_v9  ;;  %v864_v17 = vpop.f32.mrb[15].mxu1 }
 0x329   : > { %v865_v0 = vadd.f32 %v864_v17, %v751_v10  ;;  %1016 = vmatprep.mubr.f32.mxu1 %v880_v49 }
 0x32a   : > { %1017 = vmatmul.mubr.f32.gmra.mrb[20].mxu1 %v879_v58  ;;  %v881_v2 = vmax.f32 %v863_v63, 0.0 }
 0x32b   : > { %v882_v1 = vmax.f32 %v865_v0, 0.0 }
 0x32d   : > { %1021 = vmatprep.mubr.f32.mxu1 %v882_v1 }
 0x32e   : > { %1022 = vmatmul.mubr.f32.gmra.mrb[22].mxu1 %v881_v2 }
 0x3e5   : > { %v1304_v3 = vpop.f32.mrb[8].mxu0 }
 0x3e6   : > { %v1305_v5 = vpop.f32.mrb[9].mxu0 }
 0x3e7   : > { %v1306_v6 = vadd.f32 %v1305_v5, %v1304_v3 }
 0x3e9   : > { %v989_v7 = vadd.f32 %v1306_v6, %v1243_v4  ;;  %v1307_v8 = vpop.f32.mrb[10].mxu0 }
 0x3ea   : > { %v1308_v11 = vpop.f32.mrb[11].mxu0 }
 0x3eb   : > { %v1309_v12 = vadd.f32 %v1308_v11, %v1307_v8  ;;  %v1027_v9 = vadd.f32 %v989_v7, %v1938_v41 }
 0x3ed   : > { %v994_v10 = vadd.f32 %v1309_v12, %v1243_v4  ;;  %1037 = vadd.xlane.f32.xlu0 %v1027_v9  ;;  %v1310_v13 = vpop.f32.mrb[12].mxu0 }
 0x3ee   : > { %v1311_v14 = vpop.f32.mrb[13].mxu0 }
 0x3ef   : > { %v1312_v15 = vadd.f32 %v1311_v14, %v1310_v13  ;;  %v1028_v16 = vadd.f32 %v994_v10, %v1945_v53 }
 0x3f1   : > { %v999_v18 = vadd.f32 %v1312_v15, %v1243_v4  ;;  %1039 = vadd.xlane.f32.xlu1 %v1028_v16  ;;  %v1313_v19 = vpop.f32.mrb[14].mxu0 }
 0x3f2   : > { %v1314_v20 = vpop.f32.mrb[15].mxu0 }
 0x3f3   : > { %v1315_v22 = vadd.f32 %v1314_v20, %v1313_v19  ;;  %v1029_v23 = vadd.f32 %v999_v18, %v1952_v27 }
 0x3f5   : > { %v1004_v24 = vadd.f32 %v1315_v22, %v1243_v4  ;;  %1041 = vadd.xlane.f32.xlu0 %v1029_v23  ;;  %v1316_v25 = vpop.f32.mrb[16].mxu1 }
 0x3f6   : > { %v1317_v30 = vpop.f32.mrb[17].mxu1 }
 0x3f7   : > { %v1318_v31 = vadd.f32 %v1317_v30, %v1316_v25  ;;  %v1030_v41 = vadd.f32 %v1004_v24, %v1959_v35  ;;  %v1244_v30 = vld [vmem:[%s2083_s10] ss:$0 sm:$0xff] }
 0x3f9   : > { %v1009_v32 = vadd.f32 %v1318_v31, %v1243_v4  ;;  %1043 = vadd.xlane.f32.xlu1 %v1030_v41  ;;  %v1319_v33 = vpop.f32.mrb[18].mxu1 }
 0x3fa   : > { %v1320_v38 = vpop.f32.mrb[19].mxu1 }
 0x3fb   : > { %v1321_v39 = vadd.f32 %v1320_v38, %v1319_v33  ;;  %v1031_v53 = vadd.f32 %v1009_v32, %v1966_v36  ;;  %v1245_v33 = vld [vmem:[%s2084_s11] ss:$0 sm:$0xff] }
 0x3fd   : > { %v1014_v40 = vadd.f32 %v1321_v39, %v1243_v4  ;;  %1045 = vadd.xlane.f32.xlu0 %v1031_v53  ;;  %v1322_v46 = vpop.f32.mrb[20].mxu1 }
 0x3fe   : > { %v1323_v47 = vpop.f32.mrb[21].mxu1 }
 0x3ff   : > { %v1324_v48 = vadd.f32 %v1323_v47, %v1322_v46  ;;  %v1032_v27 = vadd.f32 %v1014_v40, %v1973_v43 }
 0x401   : > { %v1019_v21 = vadd.f32 %v1324_v48, %v1243_v4  ;;  %1047 = vadd.xlane.f32.xlu1 %v1032_v27  ;;  %v1325_v50 = vpop.f32.mrb[22].mxu1 }
 0x402   : > { %v1326_v54 = vpop.f32.mrb[23].mxu1 }
 0x403   : > { %v1327_v55 = vadd.f32 %v1326_v54, %v1325_v50  ;;  %v1033_v35 = vadd.f32 %v1019_v21, %v1980_v44 }
 0x405   : > { %v1024_v28 = vadd.f32 %v1327_v55, %v1243_v4  ;;  %1049 = vadd.xlane.f32.xlu0 %v1033_v35 }
 0x407   : > { %v1034_v56 = vadd.f32 %v1024_v28, %v1985_v52 }
 0x409   : > { %1051 = vadd.xlane.f32.xlu1 %v1034_v56 }
 0x47a   : > { %v1038_v36 = vpop.xlane.xlu0 %1037 }
 0x47b   : > { %v1053_v26 = vmul.f32 0.0078125, %v1038_v36 }
 0x47d   : > { %v1061_v59 = vsub.f32 %v1027_v9, %v1053_v26 }
 0x47e   : > { %v1040_v29 = vpop.xlane.xlu1 %1039 }
 0x47f   : > { %v1054_v60 = vmul.f32 0.0078125, %v1040_v29  ;;  %v1069_v34 = vmul.f32 %v1061_v59, %v1061_v59 }
 0x481   : > { %v1062_v37 = vsub.f32 %v1028_v16, %v1054_v60  ;;  %1077 = vadd.xlane.f32.xlu0 %v1069_v34 }
 0x482   : > { %v1042_v43 = vpop.xlane.xlu0 %1041 }
 0x483   : > { %v1055_v61 = vmul.f32 0.0078125, %v1042_v43  ;;  %v1070_v42 = vmul.f32 %v1062_v37, %v1062_v37 }
 0x485   : > { %v2020_v45 = vsub.f32 %v1029_v23, %v1055_v61  ;;  %1079 = vadd.xlane.f32.xlu1 %v1070_v42 }
 0x486   : > { %v1044_v44 = vpop.xlane.xlu1 %1043 }
 0x487   : > { %v1056_v62 = vmul.f32 0.0078125, %v1044_v44  ;;  %v1071_v52 = vmul.f32 %v2020_v45, %v2020_v45 }
 0x489   : > { %v2024_v51 = vsub.f32 %v1030_v41, %v1056_v62  ;;  %1081 = vadd.xlane.f32.xlu0 %v1071_v52 }
 0x48a   : > { %v1046_v49 = vpop.xlane.xlu0 %1045 }
 0x48b   : > { %v1057_v57 = vmul.f32 0.0078125, %v1046_v49  ;;  %v1072_v58 = vmul.f32 %v2024_v51, %v2024_v51 }
 0x48d   : > { %v2028_v63 = vsub.f32 %v1031_v53, %v1057_v57  ;;  %1083 = vadd.xlane.f32.xlu1 %v1072_v58 }
 0x48e   : > { %v1048_v17 = vpop.xlane.xlu1 %1047 }
 0x48f   : > { %v1058_v0 = vmul.f32 0.0078125, %v1048_v17  ;;  %v1073_v1 = vmul.f32 %v2028_v63, %v2028_v63 }
 0x491   : > { %v2032_v2 = vsub.f32 %v1032_v27, %v1058_v0  ;;  %1085 = vadd.xlane.f32.xlu0 %v1073_v1 }
 0x492   : > { %v1050_v3 = vpop.xlane.xlu0 %1049 }
 0x493   : > { %v1059_v4 = vmul.f32 0.0078125, %v1050_v3  ;;  %v1074_v5 = vmul.f32 %v2032_v2, %v2032_v2 }
 0x495   : > { %v2036_v6 = vsub.f32 %v1033_v35, %v1059_v4  ;;  %1087 = vadd.xlane.f32.xlu1 %v1074_v5 }
 0x496   : > { %v1052_v7 = vpop.xlane.xlu1 %1051 }
 0x497   : > { %v1060_v8 = vmul.f32 0.0078125, %v1052_v7  ;;  %v1075_v11 = vmul.f32 %v2036_v6, %v2036_v6 }
 0x499   : > { %v2040_v12 = vsub.f32 %v1034_v56, %v1060_v8  ;;  %1089 = vadd.xlane.f32.xlu0 %v1075_v11 }
 0x49b   : > { %v1076_v9 = vmul.f32 %v2040_v12, %v2040_v12 }
 0x49d   : > { %1091 = vadd.xlane.f32.xlu1 %v1076_v9 }
 0x50e   : > { %v1078_v10 = vpop.xlane.xlu0 %1077 }
 0x50f   : > { %v1093_v13 = vmul.f32 0.0078125, %v1078_v10 }
 0x511   : > { %v1101_v14 = vadd.f32 1e-05, %v1093_v13 }
 0x512   : > { %v1080_v15 = vpop.xlane.xlu1 %1079 }
 0x513   : > { %1509 = vrsqrt.f32 %v1101_v14  ;;  %v1094_v16 = vmul.f32 0.0078125, %v1080_v15 }
 0x515   : > { %v1102_v18 = vadd.f32 1e-05, %v1094_v16 }
 0x516   : > { %v1082_v19 = vpop.xlane.xlu0 %1081 }
 0x517   : > { %1511 = vrsqrt.f32 %v1102_v18  ;;  %v1095_v20 = vmul.f32 0.0078125, %v1082_v19 }
 0x519   : > { %v1103_v22 = vadd.f32 1e-05, %v1095_v20 }
 0x51a   : > { %v1084_v23 = vpop.xlane.xlu1 %1083 }
 0x51b   : > { %1513 = vrsqrt.f32 %v1103_v22  ;;  %v1096_v24 = vmul.f32 0.0078125, %v1084_v23 }
 0x51d   : > { %v1510_v25 = vpop.eup %1509  ;;  %v1104_v31 = vadd.f32 1e-05, %v1096_v24 }
 0x51e   : > { %v1117_v41 = vmul.f32 %v1510_v25, %v1061_v59  ;;  %v1086_v32 = vpop.xlane.xlu0 %1085 }
 0x51f   : > { %1515 = vrsqrt.f32 %v1104_v31  ;;  %v1097_v38 = vmul.f32 0.0078125, %v1086_v32 }
 0x520   : > { %v1131_v39 = vmul.f32 %v1244_v30, %v1117_v41 }
 0x521   : > { %v1512_v53 = vpop.eup %1511  ;;  %v1105_v40 = vadd.f32 1e-05, %v1097_v38 }
 0x522   : > { %v1145_v46 = vadd.f32 %v1245_v33, %v1131_v39  ;;  %v1118_v47 = vmul.f32 %v1512_v53, %v1062_v37  ;;  %v1088_v48 = vpop.xlane.xlu1 %1087 }
 0x523   : > { %1517 = vrsqrt.f32 %v1105_v40  ;;  %v1098_v27 = vmul.f32 0.0078125, %v1088_v48 }
 0x524   : > { %1153 = vst [vmem:[%s2054_s13] sm:$0xff] %v1145_v46  ;;  %v1132_v21 = vmul.f32 %v1244_v30, %v1118_v47 }
 0x525   : > { %v1514_v50 = vpop.eup %1513  ;;  %v1106_v54 = vadd.f32 1e-05, %v1098_v27 }
 0x526   : > { %v1146_v55 = vadd.f32 %v1245_v33, %v1132_v21  ;;  %v1119_v35 = vmul.f32 %v1514_v50, %v2020_v45  ;;  %v1090_v28 = vpop.xlane.xlu0 %1089 }
 0x527   : > { %1519 = vrsqrt.f32 %v1106_v54  ;;  %v1099_v56 = vmul.f32 0.0078125, %v1090_v28 }
 0x528   : > { %1154 = vst [vmem:[%s2054_s13 + $0x8] sm:$0xff] %v1146_v55  ;;  %v1133_v36 = vmul.f32 %v1244_v30, %v1119_v35 }
 0x529   : > { %v1516_v26 = vpop.eup %1515  ;;  %v1107_v59 = vadd.f32 1e-05, %v1099_v56 }
 0x52a   : > { %v1147_v29 = vadd.f32 %v1245_v33, %v1133_v36  ;;  %v1120_v60 = vmul.f32 %v1516_v26, %v2024_v51  ;;  %v1092_v34 = vpop.xlane.xlu1 %1091 }
 0x52b   : > { %1521 = vrsqrt.f32 %v1107_v59  ;;  %v1100_v37 = vmul.f32 0.0078125, %v1092_v34 }
 0x52c   : > { %1155 = vst [vmem:[%s2054_s13 + $0x10] sm:$0xff] %v1147_v29  ;;  %v1134_v43 = vmul.f32 %v1244_v30, %v1120_v60 }
 0x52d   : > { %v1518_v61 = vpop.eup %1517  ;;  %v1108_v42 = vadd.f32 1e-05, %v1100_v37 }
 0x52e   : > { %v1148_v45 = vadd.f32 %v1245_v33, %v1134_v43  ;;  %v1121_v44 = vmul.f32 %v1518_v61, %v2028_v63 }
 0x52f   : > { %1523 = vrsqrt.f32 %v1108_v42 }
 0x530   : > { %1156 = vst [vmem:[%s2054_s13 + $0x18] sm:$0xff] %v1148_v45  ;;  %v1135_v62 = vmul.f32 %v1244_v30, %v1121_v44 }
 0x531   : > { %v1520_v52 = vpop.eup %1519 }
 0x532   : > { %v1149_v49 = vadd.f32 %v1245_v33, %v1135_v62  ;;  %v1122_v51 = vmul.f32 %v1520_v52, %v2032_v2 }
 0x534   : > { %1157 = vst [vmem:[%s2054_s13 + $0x20] sm:$0xff] %v1149_v49  ;;  %v1136_v57 = vmul.f32 %v1244_v30, %v1122_v51 }
 0x535   : > { %v1522_v58 = vpop.eup %1521 }
 0x536   : > { %v1150_v17 = vadd.f32 %v1245_v33, %v1136_v57  ;;  %v1123_v0 = vmul.f32 %v1522_v58, %v2036_v6 }
 0x538   : > { %1158 = vst [vmem:[%s2054_s13 + $0x28] sm:$0xff] %v1150_v17  ;;  %v1137_v1 = vmul.f32 %v1244_v30, %v1123_v0 }
 0x539   : > { %v1524_v3 = vpop.eup %1523 }
 0x53a   : > { %v1151_v4 = vadd.f32 %v1245_v33, %v1137_v1  ;;  %v1124_v63 = vmul.f32 %v1524_v3, %v2040_v12 }
 0x53c   : > { %1159 = vst [vmem:[%s2054_s13 + $0x30] sm:$0xff] %v1151_v4  ;;  %v1138_v5 = vmul.f32 %v1244_v30, %v1124_v63 }
 0x53e   : > { %v1152_v7 = vadd.f32 %v1245_v33, %v1138_v5 }
 0x540   : > { %1160 = vst [vmem:[%s2054_s13 + $0x38] sm:$0xff] %v1152_v7 }
 0x541 PF: > { %s22_s21 = sadd.s32 1, %s1531_s21  }
 0x542   : > { %p19_p4 = scmp.ge.s32.totalorder %s22_s21, 4  }
 0x544   :  { %21 = sbr.rel (!%p19_p4) target bundleno = 1 (0x1), region = 101 }

</bundles_post_ra>
